<compile_context>
chip_gen: v7x
topology: tpu7x:2x2x1
jax: 0.10.0
libtpu: 0.0.40
codegen_flags: <defaults>
</compile_context>

<pallas_src>
import jax
import jax.numpy as jnp
from jax.experimental import pallas as pl
from jax.experimental.pallas import tpu as pltpu

HIGH = jax.lax.Precision.HIGHEST
ACT_DTYPE = jnp.bfloat16            # matmul-operand dtype for activations / conv weights
VMEM_LIMIT = 32 * 1024 * 1024       # headroom under v7x's 64 MiB physical VMEM


def _cparams():
    return pltpu.CompilerParams(dimension_semantics=("parallel",),
                                vmem_limit_bytes=VMEM_LIMIT)


# ------------------------------ Pallas kernels ------------------------------

def _upsample_kernel(x_ref, bw_ref, bh_ref, o_ref):
    """Separable bilinear x2 upsample of a padded-flat activation: two matmuls.

    x_ref : (1, C*Hi_p, Wi_p)  zero-bordered input, rows are (c, hi) pairs        [bf16]
    bw_ref: (Wi_p, Wo_p)       W interpolation (border rows/cols zero)            [f32]
    bh_ref: (C*He, C*Hi_p)     block-diag kron(I_C, bh) H interpolation; each
                               channel block has 2 extra all-zero rows above and
                               below (they become the conv stage's flat-shift
                               margin) plus the usual zero border rows            [f32]
    o_ref : (1, C*He, Wo_p)    upsampled, zero-bordered + margin rows             [bf16]
    """
    x = x_ref[0].astype(jnp.float32)
    t = jnp.dot(x, bw_ref[...], preferred_element_type=jnp.float32)      # (C*Hi_p, Wo_p)
    u = jnp.dot(bh_ref[...], t, preferred_element_type=jnp.float32)      # (C*He,  Wo_p)
    o_ref[0] = u.astype(o_ref.dtype)


def _make_double_conv_kernel(Wp, P, base, A, fuse_final):
    """Fused (conv3x3 + BN + ReLU) * 2 [+ final 1x1 conv] on a padded-flat activation.

    Layout: the zero-bordered activation (C, Hp, Wp) is flattened to (C, P), P = Hp*Wp.
    A 3x3 tap (dy, dx) is then a CONSTANT flat shift s = (dy-1)*Wp + (dx-1), so each conv
    is ONE matmul (C_out, 9*C_in) @ (9*C_in, P) against the 9 shifted slices stacked in
    VMEM scratch.  The full padded width P is computed; border outputs are garbage and
    are masked to zero, so the result is again a valid zero-bordered padded-flat tensor.
    conv1's shift margin comes from the `base` extra zero columns of the input (two
    all-zero rows emitted by the upsample kernel); the mid activation is staged in VMEM
    at a 128-aligned offset A with zero margins.
    """
    shifts = tuple((dy - 1) * Wp + (dx - 1) for dy in range(3) for dx in range(3))

    def kernel(x_ref, w1_ref, b1_ref, w2_ref, b2_ref, mask_ref, *rest):
        if fuse_final:
            wf_ref, bf_ref, o_ref, mid_ref, im1_ref, im2_ref = rest
        else:
            o_ref, mid_ref, im1_ref, im2_ref = rest
        Ci = x_ref.shape[1]
        Cm, We = mid_ref.shape
        mask = mask_ref[...]                                  # (1, P) f32, 0 on border

        # ---- conv1 + BN1 + ReLU : one matmul over the 9 stacked taps ----
        x = x_ref[0]                                          # (Ci, Pe), bf16
        for k, s in enumerate(shifts):
            im1_ref[k * Ci:(k + 1) * Ci, :] = x[:, base + s: base + s + P]
        y1 = jnp.dot(w1_ref[...], im1_ref[...], preferred_element_type=jnp.float32)
        y1 = jnp.maximum(y1 + b1_ref[...], 0.0) * mask

        # Mid activation: padded-flat at a 128-aligned offset A.  Margins are re-zeroed
        # every step (tiny) so the kernel stays correct when the "parallel" batch grid is
        # split across TensorCores (per-core scratch; step 0 may not run on every core).
        mid_ref[:, 0:A] = jnp.zeros((Cm, A), mid_ref.dtype)
        mid_ref[:, A + P:We] = jnp.zeros((Cm, We - A - P), mid_ref.dtype)
        mid_ref[:, A:A + P] = y1.astype(mid_ref.dtype)

        # ---- conv2 + BN2 + ReLU : one matmul over the 9 stacked taps ----
        mid = mid_ref[...]                                    # (Cm, We)
        for k, s in enumerate(shifts):
            im2_ref[k * Cm:(k + 1) * Cm, :] = mid[:, A + s: A + s + P]
        y2 = jnp.dot(w2_ref[...], im2_ref[...], preferred_element_type=jnp.float32)
        y2 = jnp.maximum(y2 + b2_ref[...], 0.0) * mask

        if fuse_final:
            # Final 1x1 conv + bias fused as an f32 epilogue.  Border positions get the
            # bias value, but the border is stripped on the host at the very end.
            y3 = jnp.dot(wf_ref[...], y2, preferred_element_type=jnp.float32)
            o_ref[0] = (y3 + bf_ref[...]).astype(o_ref.dtype)
        else:
            o_ref[0] = y2.astype(o_ref.dtype)

    return kernel


# ------------------------------ wrappers ------------------------------

def upsample_matrix(n_in, n_out):
    """Bilinear interpolation matrix (align_corners=True), shape (n_out, n_in), f32."""
    i = jnp.arange(n_out, dtype=jnp.float32)
    src = i * (n_in - 1) / max(n_out - 1, 1)
    i0 = jnp.clip(jnp.floor(src).astype(jnp.int32), 0, n_in - 1)
    i1 = jnp.minimum(i0 + 1, n_in - 1)
    frac = src - i0.astype(jnp.float32)
    A = jnp.zeros((n_out, n_in), jnp.float32)
    A = A.at[jnp.arange(n_out), i0].add(1.0 - frac)
    A = A.at[jnp.arange(n_out), i1].add(frac)
    return A


def upsample_x2_padded(h2d, C, Hin, Win):
    """h2d: (N, C*(Hin+2), Win+2) zero-bordered, padded-flat rows.  Bilinear x2.

    Returns (N, C*He, Wo_p) bf16, He = 2*Hin + 6: per channel [2 zero rows,
    zero-bordered (2Hin+2, 2Win+2) upsample, 2 zero rows].
    """
    N = h2d.shape[0]
    Hi_p, Wi_p = Hin + 2, Win + 2
    Ho, Wo = 2 * Hin, 2 * Win
    Ho_p, Wo_p = Ho + 2, Wo + 2
    He = Ho_p + 4
    a_h = upsample_matrix(Hin, Ho)                      # (Ho, Hin)
    a_w = upsample_matrix(Win, Wo)                      # (Wo, Win)
    bw = jnp.zeros((Wi_p, Wo_p), jnp.float32).at[1:Wi_p - 1, 1:Wo_p - 1].set(a_w.T)
    bh = jnp.zeros((He, Hi_p), jnp.float32).at[3:He - 3, 1:Hi_p - 1].set(a_h)
    bh_blk = jnp.kron(jnp.eye(C, dtype=jnp.float32), bh)   # (C*He, C*Hi_p) block-diag
    return pl.pallas_call(
        _upsample_kernel,
        out_shape=jax.ShapeDtypeStruct((N, C * He, Wo_p), ACT_DTYPE),
        grid=(N,),
        in_specs=[pl.BlockSpec((1, C * Hi_p, Wi_p), lambda n: (n, 0, 0)),
                  pl.BlockSpec((Wi_p, Wo_p), lambda n: (0, 0)),
                  pl.BlockSpec((C * He, C * Hi_p), lambda n: (0, 0))],
        out_specs=pl.BlockSpec((1, C * He, Wo_p), lambda n: (n, 0, 0)),
        compiler_params=_cparams(),
    )(h2d, bw, bh_blk)


def double_conv_padded_flat(xflat, p, Hp, Wp, final=None):
    """xflat: (N, C_in, Pe) padded-flat activation with 2*Wp zero margin columns on each
    side of the (Hp*Wp)-long padded image (Pe = (Hp+4)*Wp).  Returns the full padded-flat
    (N, C_out, Hp*Wp) activation with its zero border written in-kernel; if `final` is
    given, the 1x1 conv + bias epilogue is fused and the output dtype is f32."""
    N, Cin, Pe = xflat.shape
    P = Hp * Wp
    base = 2 * Wp                       # flat offset of the padded image inside Pe
    m = Wp + 1                          # max |tap shift|
    A = ((m + 127) // 128) * 128        # 128-aligned margin for the mid scratch
    Cmid, Cout = p['w1'].shape[0], p['w2'].shape[0]

    # fold BN scale into the conv weights; tap-major stacked weights (C_out, 9*C_in)
    w1s = (p['w1'] * p['s1'][:, None, None, None]).transpose(0, 2, 3, 1) \
        .reshape(Cmid, 9 * Cin).astype(ACT_DTYPE)
    w2s = (p['w2'] * p['s2'][:, None, None, None]).transpose(0, 2, 3, 1) \
        .reshape(Cout, 9 * Cmid).astype(ACT_DTYPE)
    b1 = p['b1'].reshape(Cmid, 1).astype(jnp.float32)
    b2 = p['b2'].reshape(Cout, 1).astype(jnp.float32)
    # interior mask over the full padded width: zero on the 1-px border
    pidx = jnp.arange(P, dtype=jnp.int32)
    hh, ww = pidx // Wp, pidx % Wp
    mask = ((hh > 0) & (hh < Hp - 1) & (ww > 0) & (ww < Wp - 1)) \
        .astype(jnp.float32).reshape(1, P)

    fuse_final = final is not None
    if fuse_final:
        wf, bfin = final
        Cf = wf.shape[0]
        extra_in = [wf.reshape(Cf, Cout).astype(jnp.float32),
                    bfin.reshape(Cf, 1).astype(jnp.float32)]
        extra_specs = [pl.BlockSpec((Cf, Cout), lambda n: (0, 0)),
                       pl.BlockSpec((Cf, 1), lambda n: (0, 0))]
        C_last, out_dtype = Cf, jnp.float32
    else:
        extra_in, extra_specs = [], []
        C_last, out_dtype = Cout, ACT_DTYPE

    return pl.pallas_call(
        _make_double_conv_kernel(Wp, P, base, A, fuse_final),
        out_shape=jax.ShapeDtypeStruct((N, C_last, P), out_dtype),
        grid=(N,),
        in_specs=[pl.BlockSpec((1, Cin, Pe), lambda n: (n, 0, 0)),
                  pl.BlockSpec((Cmid, 9 * Cin), lambda n: (0, 0)),
                  pl.BlockSpec((Cmid, 1), lambda n: (0, 0)),
                  pl.BlockSpec((Cout, 9 * Cmid), lambda n: (0, 0)),
                  pl.BlockSpec((Cout, 1), lambda n: (0, 0)),
                  pl.BlockSpec((1, P), lambda n: (0, 0))] + extra_specs,
        out_specs=pl.BlockSpec((1, C_last, P), lambda n: (n, 0, 0)),
        scratch_shapes=[pltpu.VMEM((Cmid, A + P + A), ACT_DTYPE),   # padded-flat mid
                        pltpu.VMEM((9 * Cin, P), ACT_DTYPE),        # conv1 stacked taps
                        pltpu.VMEM((9 * Cmid, P), ACT_DTYPE)],      # conv2 stacked taps
        compiler_params=_cparams(),
    )(xflat, w1s, b1, w2s, b2, mask, *extra_in)


# ------------------------------ params & BN folding ------------------------------

def fold_bn(gamma, beta, mean, var, eps=1e-5):
    scale = gamma / jnp.sqrt(var + eps)
    bias = beta - mean * scale
    return scale, bias


def init_params(key, channels, out_channel):
    up_params = []
    for ch_in, ch_out in zip(channels, channels[1:]):
        mid = ch_in // 2
        key, *ks = jax.random.split(key, 11)
        w1 = jax.random.normal(ks[0], (mid, ch_in, 3, 3), jnp.float32) * (2.0 / (ch_in * 9)) ** 0.5
        g1 = 1.0 + 0.1 * jax.random.normal(ks[1], (mid,), jnp.float32)
        bt1 = 0.1 * jax.random.normal(ks[2], (mid,), jnp.float32)
        m1 = 0.1 * jax.random.normal(ks[3], (mid,), jnp.float32)
        v1 = 1.0 + 0.1 * jnp.abs(jax.random.normal(ks[4], (mid,), jnp.float32))
        w2 = jax.random.normal(ks[5], (ch_out, mid, 3, 3), jnp.float32) * (2.0 / (mid * 9)) ** 0.5
        g2 = 1.0 + 0.1 * jax.random.normal(ks[6], (ch_out,), jnp.float32)
        bt2 = 0.1 * jax.random.normal(ks[7], (ch_out,), jnp.float32)
        m2 = 0.1 * jax.random.normal(ks[8], (ch_out,), jnp.float32)
        v2 = 1.0 + 0.1 * jnp.abs(jax.random.normal(ks[9], (ch_out,), jnp.float32))
        s1, b1 = fold_bn(g1, bt1, m1, v1)
        s2, b2 = fold_bn(g2, bt2, m2, v2)
        up_params.append(dict(w1=w1, s1=s1, b1=b1, w2=w2, s2=s2, b2=b2))
    key, k1, k2 = jax.random.split(key, 3)
    wf = jax.random.normal(k1, (out_channel, channels[-1], 1, 1), jnp.float32) * (1.0 / channels[-1]) ** 0.5
    bf = 0.1 * jax.random.normal(k2, (out_channel,), jnp.float32)
    return up_params, (wf, bf)


# ------------------------------ MultiUp forward (Pallas) ------------------------------

@jax.jit
def multi_up_pallas(x, up_params, final_params):
    N, C, H, W = x.shape
    wf, bf = final_params
    n_stages = len(up_params)
    # Pad the raw input once with a 1-px zero border; everything downstream stays
    # padded-flat (only free host reshapes between kernels) until the final strip.
    h = jnp.pad(x, ((0, 0), (0, 0), (1, 1), (1, 1))).astype(ACT_DTYPE)
    h = h.reshape(N, C * (H + 2), W + 2)
    Hin, Win, Cin = H, W, C
    for si, p in enumerate(up_params):
        last = si == n_stages - 1
        Ho, Wo = 2 * Hin, 2 * Win
        Hp, Wp = Ho + 2, Wo + 2
        u = upsample_x2_padded(h, Cin, Hin, Win)                 # (N, Cin*(Hp+4), Wp)
        u = u.reshape(N, Cin, (Hp + 4) * Wp)                     # free reshape
        h = double_conv_padded_flat(u, p, Hp, Wp,
                                    final=(wf, bf) if last else None)
        Cin = p['w2'].shape[0]
        if not last:
            h = h.reshape(N, Cin * Hp, Wp)                       # free reshape
        Hin, Win = Ho, Wo
    Hp, Wp = Hin + 2, Win + 2
    out = h.reshape(N, wf.shape[0], Hp, Wp)[:, :, 1:Hp - 1, 1:Wp - 1]
    return out.astype(jnp.float32)


# ------------------------------ plain-JAX reference ------------------------------

def _conv3x3_ref(x, w):
    return jax.lax.conv_general_dilated(
        x, w, (1, 1), ((1, 1), (1, 1)),
        dimension_numbers=('NCHW', 'OIHW', 'NCHW'), precision=HIGH)


def multi_up_ref(x, up_params, final_params):
    for p in up_params:
        _, _, H, W = x.shape
        a_h = upsample_matrix(H, 2 * H)
        a_w = upsample_matrix(W, 2 * W)
        x = jnp.einsum('oh,nchw,pw->ncop', a_h, x, a_w, precision=HIGH)
        y = _conv3x3_ref(x, p['w1'])
        y = jnp.maximum(y * p['s1'][None, :, None, None] + p['b1'][None, :, None, None], 0.0)
        y = _conv3x3_ref(y, p['w2'])
        x = jnp.maximum(y * p['s2'][None, :, None, None] + p['b2'][None, :, None, None], 0.0)
    wf, bf = final_params
    y = jax.lax.conv_general_dilated(
        x, wf, (1, 1), ((0, 0), (0, 0)),
        dimension_numbers=('NCHW', 'OIHW', 'NCHW'), precision=HIGH)
    return y + bf[None, :, None, None]


# ------------------------------ main ------------------------------

if __name__ == "__main__":
    channels = (8, 8, 4)      # two Up stages: Up(8->8, mid 4), Up(8->4, mid 4)
    out_channel = 3
    N, H, W = 2, 8, 8

    key = jax.random.PRNGKey(0)
    key, kx = jax.random.split(key)
    x = jax.random.normal(kx, (N, channels[0], H, W), jnp.float32)
    up_params, final_params = init_params(key, channels, out_channel)

    out = multi_up_pallas(x, up_params, final_params)
    out = jax.block_until_ready(out)
    assert out.shape == (N, out_channel, H * 4, W * 4), out.shape

    ref = multi_up_ref(x, up_params, final_params)
    # The Pallas path uses bf16 activations/conv weights (f32 accumulation, f32 interp
    # matrices and f32 1x1 epilogue); the reference is f32 HIGHEST.
    scale = float(jnp.max(jnp.abs(ref))) + 1e-6
    max_rel = float(jnp.max(jnp.abs(out - ref))) / scale
    mean_rel = float(jnp.mean(jnp.abs(out - ref))) / (float(jnp.mean(jnp.abs(ref))) + 1e-6)
    assert max_rel < 5e-2, f"max rel err vs reference: {max_rel}"
    assert mean_rel < 2e-2, f"mean rel err vs reference: {mean_rel}"

    print("KERNEL_OK")
</pallas_src>

<mosaic_0001>
module attributes {stable_mosaic.version = 11 : i64} {
  func.func private @main(%arg0: i32) attributes {dimension_semantics = [#tpu.dimension_semantics<core_parallel>], iteration_bounds = array<i64: 2>, tpu.core_type = #tpu.core_type<sc_scalar_subcore>, window_params = []} {
    return
  }
}

module attributes {stable_mosaic.version = 11 : i64} {
  func.func private @main(%arg0: i32) attributes {dimension_semantics = [#tpu.dimension_semantics<core_parallel>], iteration_bounds = array<i64: 2>, tpu.core_type = #tpu.core_type<sc_scalar_subcore>, window_params = []} {
    return
  }
}

module attributes {stable_mosaic.version = 11 : i64} {
  func.func @kernel(%arg0: i32, %arg1: memref<1x8x396xbf16, #tpu.memory_space<vmem>>, %arg2: memref<4x72xbf16, #tpu.memory_space<vmem>>, %arg3: memref<4x1xf32, #tpu.memory_space<vmem>>, %arg4: memref<8x36xbf16, #tpu.memory_space<vmem>>, %arg5: memref<8x1xf32, #tpu.memory_space<vmem>>, %arg6: memref<1x324xf32, #tpu.memory_space<vmem>>, %arg7: memref<1x8x324xbf16, #tpu.memory_space<vmem>>, %arg8: memref<4x580xbf16, #tpu.memory_space<vmem>>, %arg9: memref<72x324xbf16, #tpu.memory_space<vmem>>, %arg10: memref<36x324xbf16, #tpu.memory_space<vmem>>) attributes {dimension_semantics = [#tpu.dimension_semantics<parallel>], iteration_bounds = array<i64: 2>, scalar_prefetch = 0 : i64, scratch_operands = 3 : i64, tpu.core_type = #tpu.core_type<tc>, window_params = [{transform_indices = @transform_0, window_bounds = array<i64: 1, 8, 396>}, {pipeline_mode = #tpu.pipeline_mode<synchronous>, transform_indices = @transform_1, window_bounds = array<i64: 4, 72>}, {pipeline_mode = #tpu.pipeline_mode<synchronous>, transform_indices = @transform_2, window_bounds = array<i64: 4, 1>}, {pipeline_mode = #tpu.pipeline_mode<synchronous>, transform_indices = @transform_3, window_bounds = array<i64: 8, 36>}, {pipeline_mode = #tpu.pipeline_mode<synchronous>, transform_indices = @transform_4, window_bounds = array<i64: 8, 1>}, {pipeline_mode = #tpu.pipeline_mode<synchronous>, transform_indices = @transform_5, window_bounds = array<i64: 1, 324>}, {transform_indices = @transform_6, window_bounds = array<i64: 1, 8, 324>}]} {
    %c0 = arith.constant 0 : index
    %c0_0 = arith.constant 0 : index
    %0 = vector.load %arg6[%c0, %c0_0] : memref<1x324xf32, #tpu.memory_space<vmem>>, vector<1x324xf32>
    %c0_1 = arith.constant 0 : index
    %c0_2 = arith.constant 0 : index
    %c0_3 = arith.constant 0 : index
    %1 = vector.load %arg1[%c0_1, %c0_2, %c0_3] : memref<1x8x396xbf16, #tpu.memory_space<vmem>>, vector<1x8x396xbf16>
    %2 = vector.shape_cast %1 : vector<1x8x396xbf16> to vector<8x396xbf16>
    %3 = vector.extract_strided_slice %2 {offsets = [0, 17], sizes = [8, 324], strides = [1, 1]} : vector<8x396xbf16> to vector<8x324xbf16>
    %c0_4 = arith.constant 0 : index
    %c0_5 = arith.constant 0 : index
    %4 = vector.load %arg9[%c0_4, %c0_5] : memref<72x324xbf16, #tpu.memory_space<vmem>>, vector<8x324xbf16>
    tpu.vector_store %arg9[%c0_4, %c0_5], %3 {strides = array<i32>} : memref<72x324xbf16, #tpu.memory_space<vmem>>, vector<8x324xbf16>,
    %5 = vector.extract_strided_slice %2 {offsets = [0, 18], sizes = [8, 324], strides = [1, 1]} : vector<8x396xbf16> to vector<8x324xbf16>
    %c8 = arith.constant 8 : index
    %c0_6 = arith.constant 0 : index
    %6 = vector.load %arg9[%c8, %c0_6] : memref<72x324xbf16, #tpu.memory_space<vmem>>, vector<8x324xbf16>
    tpu.vector_store %arg9[%c8, %c0_6], %5 {strides = array<i32>} : memref<72x324xbf16, #tpu.memory_space<vmem>>, vector<8x324xbf16>,
    %7 = vector.extract_strided_slice %2 {offsets = [0, 19], sizes = [8, 324], strides = [1, 1]} : vector<8x396xbf16> to vector<8x324xbf16>
    %c16 = arith.constant 16 : index
    %c0_7 = arith.constant 0 : index
    %8 = vector.load %arg9[%c16, %c0_7] : memref<72x324xbf16, #tpu.memory_space<vmem>>, vector<8x324xbf16>
    tpu.vector_store %arg9[%c16, %c0_7], %7 {strides = array<i32>} : memref<72x324xbf16, #tpu.memory_space<vmem>>, vector<8x324xbf16>,
    %9 = vector.extract_strided_slice %2 {offsets = [0, 35], sizes = [8, 324], strides = [1, 1]} : vector<8x396xbf16> to vector<8x324xbf16>
    %c24 = arith.constant 24 : index
    %c0_8 = arith.constant 0 : index
    %10 = vector.load %arg9[%c24, %c0_8] : memref<72x324xbf16, #tpu.memory_space<vmem>>, vector<8x324xbf16>
    tpu.vector_store %arg9[%c24, %c0_8], %9 {strides = array<i32>} : memref<72x324xbf16, #tpu.memory_space<vmem>>, vector<8x324xbf16>,
    %11 = vector.extract_strided_slice %2 {offsets = [0, 36], sizes = [8, 324], strides = [1, 1]} : vector<8x396xbf16> to vector<8x324xbf16>
    %c32 = arith.constant 32 : index
    %c0_9 = arith.constant 0 : index
    %12 = vector.load %arg9[%c32, %c0_9] : memref<72x324xbf16, #tpu.memory_space<vmem>>, vector<8x324xbf16>
    tpu.vector_store %arg9[%c32, %c0_9], %11 {strides = array<i32>} : memref<72x324xbf16, #tpu.memory_space<vmem>>, vector<8x324xbf16>,
    %13 = vector.extract_strided_slice %2 {offsets = [0, 37], sizes = [8, 324], strides = [1, 1]} : vector<8x396xbf16> to vector<8x324xbf16>
    %c40 = arith.constant 40 : index
    %c0_10 = arith.constant 0 : index
    %14 = vector.load %arg9[%c40, %c0_10] : memref<72x324xbf16, #tpu.memory_space<vmem>>, vector<8x324xbf16>
    tpu.vector_store %arg9[%c40, %c0_10], %13 {strides = array<i32>} : memref<72x324xbf16, #tpu.memory_space<vmem>>, vector<8x324xbf16>,
    %15 = vector.extract_strided_slice %2 {offsets = [0, 53], sizes = [8, 324], strides = [1, 1]} : vector<8x396xbf16> to vector<8x324xbf16>
    %c48 = arith.constant 48 : index
    %c0_11 = arith.constant 0 : index
    %16 = vector.load %arg9[%c48, %c0_11] : memref<72x324xbf16, #tpu.memory_space<vmem>>, vector<8x324xbf16>
    tpu.vector_store %arg9[%c48, %c0_11], %15 {strides = array<i32>} : memref<72x324xbf16, #tpu.memory_space<vmem>>, vector<8x324xbf16>,
    %17 = vector.extract_strided_slice %2 {offsets = [0, 54], sizes = [8, 324], strides = [1, 1]} : vector<8x396xbf16> to vector<8x324xbf16>
    %c56 = arith.constant 56 : index
    %c0_12 = arith.constant 0 : index
    %18 = vector.load %arg9[%c56, %c0_12] : memref<72x324xbf16, #tpu.memory_space<vmem>>, vector<8x324xbf16>
    tpu.vector_store %arg9[%c56, %c0_12], %17 {strides = array<i32>} : memref<72x324xbf16, #tpu.memory_space<vmem>>, vector<8x324xbf16>,
    %19 = vector.extract_strided_slice %2 {offsets = [0, 55], sizes = [8, 324], strides = [1, 1]} : vector<8x396xbf16> to vector<8x324xbf16>
    %c64 = arith.constant 64 : index
    %c0_13 = arith.constant 0 : index
    %20 = vector.load %arg9[%c64, %c0_13] : memref<72x324xbf16, #tpu.memory_space<vmem>>, vector<8x324xbf16>
    tpu.vector_store %arg9[%c64, %c0_13], %19 {strides = array<i32>} : memref<72x324xbf16, #tpu.memory_space<vmem>>, vector<8x324xbf16>,
    %c0_14 = arith.constant 0 : index
    %c0_15 = arith.constant 0 : index
    %21 = vector.load %arg2[%c0_14, %c0_15] : memref<4x72xbf16, #tpu.memory_space<vmem>>, vector<4x72xbf16>
    %c0_16 = arith.constant 0 : index
    %c0_17 = arith.constant 0 : index
    %22 = vector.load %arg9[%c0_16, %c0_17] : memref<72x324xbf16, #tpu.memory_space<vmem>>, vector<72x324xbf16>
    %cst = arith.constant dense<0.000000e+00> : vector<4x324xf32>
    %23 = tpu.matmul %21, %22, %cst {dimension_numbers = #tpu.dot_dimension_numbers<[1], [0], [0], [1], [0, 0, 1, 1], [], []>} : vector<4x72xbf16>, vector<72x324xbf16>, vector<4x324xf32> -> vector<4x324xf32>
    %c0_18 = arith.constant 0 : index
    %c0_19 = arith.constant 0 : index
    %24 = vector.load %arg3[%c0_18, %c0_19] : memref<4x1xf32, #tpu.memory_space<vmem>>, vector<4x1xf32>
    %25 = vector.broadcast %24 : vector<4x1xf32> to vector<4x324xf32>
    %26 = arith.addf %23, %25 : vector<4x324xf32>
    %cst_20 = arith.constant 0.000000e+00 : f32
    %27 = vector.broadcast %cst_20 : f32 to vector<4x324xf32>
    %28 = arith.maximumf %26, %27 : vector<4x324xf32>
    %29 = vector.broadcast %0 : vector<1x324xf32> to vector<4x324xf32>
    %30 = arith.mulf %28, %29 : vector<4x324xf32>
    %cst_21 = arith.constant 0.000000e+00 : bf16
    %31 = vector.broadcast %cst_21 : bf16 to vector<4x128xbf16>
    %c0_22 = arith.constant 0 : index
    %c0_23 = arith.constant 0 : index
    %32 = vector.load %arg8[%c0_22, %c0_23] : memref<4x580xbf16, #tpu.memory_space<vmem>>, vector<4x128xbf16>
    tpu.vector_store %arg8[%c0_22, %c0_23], %31 {strides = array<i32>} : memref<4x580xbf16, #tpu.memory_space<vmem>>, vector<4x128xbf16>,
    %cst_24 = arith.constant 0.000000e+00 : bf16
    %33 = vector.broadcast %cst_24 : bf16 to vector<4x128xbf16>
    %c0_25 = arith.constant 0 : index
    %c452 = arith.constant 452 : index
    %34 = vector.load %arg8[%c0_25, %c452] : memref<4x580xbf16, #tpu.memory_space<vmem>>, vector<4x128xbf16>
    tpu.vector_store %arg8[%c0_25, %c452], %33 {strides = array<i32>} : memref<4x580xbf16, #tpu.memory_space<vmem>>, vector<4x128xbf16>,
    %35 = arith.truncf %30 : vector<4x324xf32> to vector<4x324xbf16>
    %c0_26 = arith.constant 0 : index
    %c128 = arith.constant 128 : index
    %36 = vector.load %arg8[%c0_26, %c128] : memref<4x580xbf16, #tpu.memory_space<vmem>>, vector<4x324xbf16>
    tpu.vector_store %arg8[%c0_26, %c128], %35 {strides = array<i32>} : memref<4x580xbf16, #tpu.memory_space<vmem>>, vector<4x324xbf16>,
    %c0_27 = arith.constant 0 : index
    %c0_28 = arith.constant 0 : index
    %37 = vector.load %arg8[%c0_27, %c0_28] : memref<4x580xbf16, #tpu.memory_space<vmem>>, vector<4x580xbf16>
    %38 = vector.extract_strided_slice %37 {offsets = [0, 109], sizes = [4, 324], strides = [1, 1]} : vector<4x580xbf16> to vector<4x324xbf16>
    %c0_29 = arith.constant 0 : index
    %c0_30 = arith.constant 0 : index
    %39 = vector.load %arg10[%c0_29, %c0_30] : memref<36x324xbf16, #tpu.memory_space<vmem>>, vector<4x324xbf16>
    tpu.vector_store %arg10[%c0_29, %c0_30], %38 {strides = array<i32>} : memref<36x324xbf16, #tpu.memory_space<vmem>>, vector<4x324xbf16>,
    %40 = vector.extract_strided_slice %37 {offsets = [0, 110], sizes = [4, 324], strides = [1, 1]} : vector<4x580xbf16> to vector<4x324xbf16>
    %c4 = arith.constant 4 : index
    %c0_31 = arith.constant 0 : index
    %41 = vector.load %arg10[%c4, %c0_31] : memref<36x324xbf16, #tpu.memory_space<vmem>>, vector<4x324xbf16>
    tpu.vector_store %arg10[%c4, %c0_31], %40 {strides = array<i32>} : memref<36x324xbf16, #tpu.memory_space<vmem>>, vector<4x324xbf16>,
    %42 = vector.extract_strided_slice %37 {offsets = [0, 111], sizes = [4, 324], strides = [1, 1]} : vector<4x580xbf16> to vector<4x324xbf16>
    %c8_32 = arith.constant 8 : index
    %c0_33 = arith.constant 0 : index
    %43 = vector.load %arg10[%c8_32, %c0_33] : memref<36x324xbf16, #tpu.memory_space<vmem>>, vector<4x324xbf16>
    tpu.vector_store %arg10[%c8_32, %c0_33], %42 {strides = array<i32>} : memref<36x324xbf16, #tpu.memory_space<vmem>>, vector<4x324xbf16>,
    %44 = vector.extract_strided_slice %37 {offsets = [0, 127], sizes = [4, 324], strides = [1, 1]} : vector<4x580xbf16> to vector<4x324xbf16>
    %c12 = arith.constant 12 : index
    %c0_34 = arith.constant 0 : index
    %45 = vector.load %arg10[%c12, %c0_34] : memref<36x324xbf16, #tpu.memory_space<vmem>>, vector<4x324xbf16>
    tpu.vector_store %arg10[%c12, %c0_34], %44 {strides = array<i32>} : memref<36x324xbf16, #tpu.memory_space<vmem>>, vector<4x324xbf16>,
    %46 = vector.extract_strided_slice %37 {offsets = [0, 128], sizes = [4, 324], strides = [1, 1]} : vector<4x580xbf16> to vector<4x324xbf16>
    %c16_35 = arith.constant 16 : index
    %c0_36 = arith.constant 0 : index
    %47 = vector.load %arg10[%c16_35, %c0_36] : memref<36x324xbf16, #tpu.memory_space<vmem>>, vector<4x324xbf16>
    tpu.vector_store %arg10[%c16_35, %c0_36], %46 {strides = array<i32>} : memref<36x324xbf16, #tpu.memory_space<vmem>>, vector<4x324xbf16>,
    %48 = vector.extract_strided_slice %37 {offsets = [0, 129], sizes = [4, 324], strides = [1, 1]} : vector<4x580xbf16> to vector<4x324xbf16>
    %c20 = arith.constant 20 : index
    %c0_37 = arith.constant 0 : index
    %49 = vector.load %arg10[%c20, %c0_37] : memref<36x324xbf16, #tpu.memory_space<vmem>>, vector<4x324xbf16>
    tpu.vector_store %arg10[%c20, %c0_37], %48 {strides = array<i32>} : memref<36x324xbf16, #tpu.memory_space<vmem>>, vector<4x324xbf16>,
    %50 = vector.extract_strided_slice %37 {offsets = [0, 145], sizes = [4, 324], strides = [1, 1]} : vector<4x580xbf16> to vector<4x324xbf16>
    %c24_38 = arith.constant 24 : index
    %c0_39 = arith.constant 0 : index
    %51 = vector.load %arg10[%c24_38, %c0_39] : memref<36x324xbf16, #tpu.memory_space<vmem>>, vector<4x324xbf16>
    tpu.vector_store %arg10[%c24_38, %c0_39], %50 {strides = array<i32>} : memref<36x324xbf16, #tpu.memory_space<vmem>>, vector<4x324xbf16>,
    %52 = vector.extract_strided_slice %37 {offsets = [0, 146], sizes = [4, 324], strides = [1, 1]} : vector<4x580xbf16> to vector<4x324xbf16>
    %c28 = arith.constant 28 : index
    %c0_40 = arith.constant 0 : index
    %53 = vector.load %arg10[%c28, %c0_40] : memref<36x324xbf16, #tpu.memory_space<vmem>>, vector<4x324xbf16>
    tpu.vector_store %arg10[%c28, %c0_40], %52 {strides = array<i32>} : memref<36x324xbf16, #tpu.memory_space<vmem>>, vector<4x324xbf16>,
    %54 = vector.extract_strided_slice %37 {offsets = [0, 147], sizes = [4, 324], strides = [1, 1]} : vector<4x580xbf16> to vector<4x324xbf16>
    %c32_41 = arith.constant 32 : index
    %c0_42 = arith.constant 0 : index
    %55 = vector.load %arg10[%c32_41, %c0_42] : memref<36x324xbf16, #tpu.memory_space<vmem>>, vector<4x324xbf16>
    tpu.vector_store %arg10[%c32_41, %c0_42], %54 {strides = array<i32>} : memref<36x324xbf16, #tpu.memory_space<vmem>>, vector<4x324xbf16>,
    %c0_43 = arith.constant 0 : index
    %c0_44 = arith.constant 0 : index
    %56 = vector.load %arg4[%c0_43, %c0_44] : memref<8x36xbf16, #tpu.memory_space<vmem>>, vector<8x36xbf16>
    %c0_45 = arith.constant 0 : index
    %c0_46 = arith.constant 0 : index
    %57 = vector.load %arg10[%c0_45, %c0_46] : memref<36x324xbf16, #tpu.memory_space<vmem>>, vector<36x324xbf16>
    %cst_47 = arith.constant dense<0.000000e+00> : vector<8x324xf32>
    %58 = tpu.matmul %56, %57, %cst_47 {dimension_numbers = #tpu.dot_dimension_numbers<[1], [0], [0], [1], [0, 0, 1, 1], [], []>} : vector<8x36xbf16>, vector<36x324xbf16>, vector<8x324xf32> -> vector<8x324xf32>
    %c0_48 = arith.constant 0 : index
    %c0_49 = arith.constant 0 : index
    %59 = vector.load %arg5[%c0_48, %c0_49] : memref<8x1xf32, #tpu.memory_space<vmem>>, vector<8x1xf32>
    %60 = vector.broadcast %59 : vector<8x1xf32> to vector<8x324xf32>
    %61 = arith.addf %58, %60 : vector<8x324xf32>
    %cst_50 = arith.constant 0.000000e+00 : f32
    %62 = vector.broadcast %cst_50 : f32 to vector<8x324xf32>
    %63 = arith.maximumf %61, %62 : vector<8x324xf32>
    %64 = vector.broadcast %0 : vector<1x324xf32> to vector<8x324xf32>
    %65 = arith.mulf %63, %64 : vector<8x324xf32>
    %66 = arith.truncf %65 : vector<8x324xf32> to vector<8x324xbf16>
    %c0_51 = arith.constant 0 : index
    %c0_52 = arith.constant 0 : index
    %c0_53 = arith.constant 0 : index
    %67 = vector.load %arg7[%c0_51, %c0_52, %c0_53] : memref<1x8x324xbf16, #tpu.memory_space<vmem>>, vector<1x8x324xbf16>
    %68 = vector.shape_cast %67 : vector<1x8x324xbf16> to vector<8x324xbf16>
    %69 = vector.shape_cast %66 : vector<8x324xbf16> to vector<1x8x324xbf16>
    tpu.vector_store %arg7[%c0_51, %c0_52, %c0_53], %69 {strides = array<i32>} : memref<1x8x324xbf16, #tpu.memory_space<vmem>>, vector<1x8x324xbf16>,
    return
  }
  func.func @transform_0(%arg0: i32) -> (i32, i32, i32) {
    %c0_i32 = arith.constant 0 : i32
    %c0_i32_0 = arith.constant 0 : i32
    %c0_i32_1 = arith.constant 0 : i32
    return %arg0, %c0_i32, %c0_i32_0 : i32, i32, i32
  }
  func.func @transform_1(%arg0: i32) -> (i32, i32) {
    %c0_i32 = arith.constant 0 : i32
    %c0_i32_0 = arith.constant 0 : i32
    %c0_i32_1 = arith.constant 0 : i32
    return %c0_i32, %c0_i32_0 : i32, i32
  }
  func.func @transform_2(%arg0: i32) -> (i32, i32) {
    %c0_i32 = arith.constant 0 : i32
    %c0_i32_0 = arith.constant 0 : i32
    %c0_i32_1 = arith.constant 0 : i32
    return %c0_i32, %c0_i32_0 : i32, i32
  }
  func.func @transform_3(%arg0: i32) -> (i32, i32) {
    %c0_i32 = arith.constant 0 : i32
    %c0_i32_0 = arith.constant 0 : i32
    %c0_i32_1 = arith.constant 0 : i32
    return %c0_i32, %c0_i32_0 : i32, i32
  }
  func.func @transform_4(%arg0: i32) -> (i32, i32) {
    %c0_i32 = arith.constant 0 : i32
    %c0_i32_0 = arith.constant 0 : i32
    %c0_i32_1 = arith.constant 0 : i32
    return %c0_i32, %c0_i32_0 : i32, i32
  }
  func.func @transform_5(%arg0: i32) -> (i32, i32) {
    %c0_i32 = arith.constant 0 : i32
    %c0_i32_0 = arith.constant 0 : i32
    %c0_i32_1 = arith.constant 0 : i32
    return %c0_i32, %c0_i32_0 : i32, i32
  }
  func.func @transform_6(%arg0: i32) -> (i32, i32, i32) {
    %c0_i32 = arith.constant 0 : i32
    %c0_i32_0 = arith.constant 0 : i32
    %c0_i32_1 = arith.constant 0 : i32
    return %arg0, %c0_i32, %c0_i32_0 : i32, i32, i32
  }
}

module attributes {stable_mosaic.version = 11 : i64} {
  func.func @_upsample_kernel(%arg0: i32, %arg1: memref<1x80x10xbf16, #tpu.memory_space<vmem>>, %arg2: memref<10x18xf32, #tpu.memory_space<vmem>>, %arg3: memref<176x80xf32, #tpu.memory_space<vmem>>, %arg4: memref<1x176x18xbf16, #tpu.memory_space<vmem>>) attributes {dimension_semantics = [#tpu.dimension_semantics<parallel>], iteration_bounds = array<i64: 2>, scalar_prefetch = 0 : i64, scratch_operands = 0 : i64, tpu.core_type = #tpu.core_type<tc>, window_params = [{transform_indices = @transform_0, window_bounds = array<i64: 1, 80, 10>}, {pipeline_mode = #tpu.pipeline_mode<synchronous>, transform_indices = @transform_1, window_bounds = array<i64: 10, 18>}, {pipeline_mode = #tpu.pipeline_mode<synchronous>, transform_indices = @transform_2, window_bounds = array<i64: 176, 80>}, {transform_indices = @transform_3, window_bounds = array<i64: 1, 176, 18>}]} {
    %c0 = arith.constant 0 : index
    %c0_0 = arith.constant 0 : index
    %c0_1 = arith.constant 0 : index
    %0 = vector.load %arg1[%c0, %c0_0, %c0_1] : memref<1x80x10xbf16, #tpu.memory_space<vmem>>, vector<1x80x10xbf16>
    %1 = vector.shape_cast %0 : vector<1x80x10xbf16> to vector<80x10xbf16>
    %2 = arith.extf %1 : vector<80x10xbf16> to vector<80x10xf32>
    %c0_2 = arith.constant 0 : index
    %c0_3 = arith.constant 0 : index
    %3 = vector.load %arg2[%c0_2, %c0_3] : memref<10x18xf32, #tpu.memory_space<vmem>>, vector<10x18xf32>
    %cst = arith.constant dense<0.000000e+00> : vector<80x18xf32>
    %4 = tpu.matmul %2, %3, %cst {dimension_numbers = #tpu.dot_dimension_numbers<[1], [0], [0], [1], [0, 0, 1, 1], [], []>} : vector<80x10xf32>, vector<10x18xf32>, vector<80x18xf32> -> vector<80x18xf32>
    %c0_4 = arith.constant 0 : index
    %c0_5 = arith.constant 0 : index
    %5 = vector.load %arg3[%c0_4, %c0_5] : memref<176x80xf32, #tpu.memory_space<vmem>>, vector<176x80xf32>
    %cst_6 = arith.constant dense<0.000000e+00> : vector<176x18xf32>
    %6 = tpu.matmul %5, %4, %cst_6 {dimension_numbers = #tpu.dot_dimension_numbers<[1], [0], [0], [1], [0, 0, 1, 1], [], []>} : vector<176x80xf32>, vector<80x18xf32>, vector<176x18xf32> -> vector<176x18xf32>
    %7 = arith.truncf %6 : vector<176x18xf32> to vector<176x18xbf16>
    %c0_7 = arith.constant 0 : index
    %c0_8 = arith.constant 0 : index
    %c0_9 = arith.constant 0 : index
    %8 = vector.load %arg4[%c0_7, %c0_8, %c0_9] : memref<1x176x18xbf16, #tpu.memory_space<vmem>>, vector<1x176x18xbf16>
    %9 = vector.shape_cast %8 : vector<1x176x18xbf16> to vector<176x18xbf16>
    %10 = vector.shape_cast %7 : vector<176x18xbf16> to vector<1x176x18xbf16>
    tpu.vector_store %arg4[%c0_7, %c0_8, %c0_9], %10 {strides = array<i32>} : memref<1x176x18xbf16, #tpu.memory_space<vmem>>, vector<1x176x18xbf16>,
    return
  }
  func.func @transform_0(%arg0: i32) -> (i32, i32, i32) {
    %c0_i32 = arith.constant 0 : i32
    %c0_i32_0 = arith.constant 0 : i32
    %c0_i32_1 = arith.constant 0 : i32
    return %arg0, %c0_i32, %c0_i32_0 : i32, i32, i32
  }
  func.func @transform_1(%arg0: i32) -> (i32, i32) {
    %c0_i32 = arith.constant 0 : i32
    %c0_i32_0 = arith.constant 0 : i32
    %c0_i32_1 = arith.constant 0 : i32
    return %c0_i32, %c0_i32_0 : i32, i32
  }
  func.func @transform_2(%arg0: i32) -> (i32, i32) {
    %c0_i32 = arith.constant 0 : i32
    %c0_i32_0 = arith.constant 0 : i32
    %c0_i32_1 = arith.constant 0 : i32
    return %c0_i32, %c0_i32_0 : i32, i32
  }
  func.func @transform_3(%arg0: i32) -> (i32, i32, i32) {
    %c0_i32 = arith.constant 0 : i32
    %c0_i32_0 = arith.constant 0 : i32
    %c0_i32_1 = arith.constant 0 : i32
    return %arg0, %c0_i32, %c0_i32_0 : i32, i32, i32
  }
}

module attributes {stable_mosaic.version = 11 : i64} {
  func.func @_upsample_kernel(%arg0: i32, %arg1: memref<1x144x18xbf16, #tpu.memory_space<vmem>>, %arg2: memref<18x34xf32, #tpu.memory_space<vmem>>, %arg3: memref<304x144xf32, #tpu.memory_space<vmem>>, %arg4: memref<1x304x34xbf16, #tpu.memory_space<vmem>>) attributes {dimension_semantics = [#tpu.dimension_semantics<parallel>], iteration_bounds = array<i64: 2>, scalar_prefetch = 0 : i64, scratch_operands = 0 : i64, tpu.core_type = #tpu.core_type<tc>, window_params = [{transform_indices = @transform_0, window_bounds = array<i64: 1, 144, 18>}, {pipeline_mode = #tpu.pipeline_mode<synchronous>, transform_indices = @transform_1, window_bounds = array<i64: 18, 34>}, {pipeline_mode = #tpu.pipeline_mode<synchronous>, transform_indices = @transform_2, window_bounds = array<i64: 304, 144>}, {transform_indices = @transform_3, window_bounds = array<i64: 1, 304, 34>}]} {
    %c0 = arith.constant 0 : index
    %c0_0 = arith.constant 0 : index
    %c0_1 = arith.constant 0 : index
    %0 = vector.load %arg1[%c0, %c0_0, %c0_1] : memref<1x144x18xbf16, #tpu.memory_space<vmem>>, vector<1x144x18xbf16>
    %1 = vector.shape_cast %0 : vector<1x144x18xbf16> to vector<144x18xbf16>
    %2 = arith.extf %1 : vector<144x18xbf16> to vector<144x18xf32>
    %c0_2 = arith.constant 0 : index
    %c0_3 = arith.constant 0 : index
    %3 = vector.load %arg2[%c0_2, %c0_3] : memref<18x34xf32, #tpu.memory_space<vmem>>, vector<18x34xf32>
    %cst = arith.constant dense<0.000000e+00> : vector<144x34xf32>
    %4 = tpu.matmul %2, %3, %cst {dimension_numbers = #tpu.dot_dimension_numbers<[1], [0], [0], [1], [0, 0, 1, 1], [], []>} : vector<144x18xf32>, vector<18x34xf32>, vector<144x34xf32> -> vector<144x34xf32>
    %c0_4 = arith.constant 0 : index
    %c0_5 = arith.constant 0 : index
    %5 = vector.load %arg3[%c0_4, %c0_5] : memref<304x144xf32, #tpu.memory_space<vmem>>, vector<304x144xf32>
    %cst_6 = arith.constant dense<0.000000e+00> : vector<304x34xf32>
    %6 = tpu.matmul %5, %4, %cst_6 {dimension_numbers = #tpu.dot_dimension_numbers<[1], [0], [0], [1], [0, 0, 1, 1], [], []>} : vector<304x144xf32>, vector<144x34xf32>, vector<304x34xf32> -> vector<304x34xf32>
    %7 = arith.truncf %6 : vector<304x34xf32> to vector<304x34xbf16>
    %c0_7 = arith.constant 0 : index
    %c0_8 = arith.constant 0 : index
    %c0_9 = arith.constant 0 : index
    %8 = vector.load %arg4[%c0_7, %c0_8, %c0_9] : memref<1x304x34xbf16, #tpu.memory_space<vmem>>, vector<1x304x34xbf16>
    %9 = vector.shape_cast %8 : vector<1x304x34xbf16> to vector<304x34xbf16>
    %10 = vector.shape_cast %7 : vector<304x34xbf16> to vector<1x304x34xbf16>
    tpu.vector_store %arg4[%c0_7, %c0_8, %c0_9], %10 {strides = array<i32>} : memref<1x304x34xbf16, #tpu.memory_space<vmem>>, vector<1x304x34xbf16>,
    return
  }
  func.func @transform_0(%arg0: i32) -> (i32, i32, i32) {
    %c0_i32 = arith.constant 0 : i32
    %c0_i32_0 = arith.constant 0 : i32
    %c0_i32_1 = arith.constant 0 : i32
    return %arg0, %c0_i32, %c0_i32_0 : i32, i32, i32
  }
  func.func @transform_1(%arg0: i32) -> (i32, i32) {
    %c0_i32 = arith.constant 0 : i32
    %c0_i32_0 = arith.constant 0 : i32
    %c0_i32_1 = arith.constant 0 : i32
    return %c0_i32, %c0_i32_0 : i32, i32
  }
  func.func @transform_2(%arg0: i32) -> (i32, i32) {
    %c0_i32 = arith.constant 0 : i32
    %c0_i32_0 = arith.constant 0 : i32
    %c0_i32_1 = arith.constant 0 : i32
    return %c0_i32, %c0_i32_0 : i32, i32
  }
  func.func @transform_3(%arg0: i32) -> (i32, i32, i32) {
    %c0_i32 = arith.constant 0 : i32
    %c0_i32_0 = arith.constant 0 : i32
    %c0_i32_1 = arith.constant 0 : i32
    return %arg0, %c0_i32, %c0_i32_0 : i32, i32, i32
  }
}

module attributes {stable_mosaic.version = 11 : i64} {
  func.func @kernel(%arg0: i32, %arg1: memref<1x8x1292xbf16, #tpu.memory_space<vmem>>, %arg2: memref<4x72xbf16, #tpu.memory_space<vmem>>, %arg3: memref<4x1xf32, #tpu.memory_space<vmem>>, %arg4: memref<4x36xbf16, #tpu.memory_space<vmem>>, %arg5: memref<4x1xf32, #tpu.memory_space<vmem>>, %arg6: memref<1x1156xf32, #tpu.memory_space<vmem>>, %arg7: memref<3x4xf32, #tpu.memory_space<vmem>>, %arg8: memref<3x1xf32, #tpu.memory_space<vmem>>, %arg9: memref<1x3x1156xf32, #tpu.memory_space<vmem>>, %arg10: memref<4x1412xbf16, #tpu.memory_space<vmem>>, %arg11: memref<72x1156xbf16, #tpu.memory_space<vmem>>, %arg12: memref<36x1156xbf16, #tpu.memory_space<vmem>>) attributes {dimension_semantics = [#tpu.dimension_semantics<parallel>], iteration_bounds = array<i64: 2>, scalar_prefetch = 0 : i64, scratch_operands = 3 : i64, tpu.core_type = #tpu.core_type<tc>, window_params = [{transform_indices = @transform_0, window_bounds = array<i64: 1, 8, 1292>}, {pipeline_mode = #tpu.pipeline_mode<synchronous>, transform_indices = @transform_1, window_bounds = array<i64: 4, 72>}, {pipeline_mode = #tpu.pipeline_mode<synchronous>, transform_indices = @transform_2, window_bounds = array<i64: 4, 1>}, {pipeline_mode = #tpu.pipeline_mode<synchronous>, transform_indices = @transform_3, window_bounds = array<i64: 4, 36>}, {pipeline_mode = #tpu.pipeline_mode<synchronous>, transform_indices = @transform_4, window_bounds = array<i64: 4, 1>}, {pipeline_mode = #tpu.pipeline_mode<synchronous>, transform_indices = @transform_5, window_bounds = array<i64: 1, 1156>}, {pipeline_mode = #tpu.pipeline_mode<synchronous>, transform_indices = @transform_6, window_bounds = array<i64: 3, 4>}, {pipeline_mode = #tpu.pipeline_mode<synchronous>, transform_indices = @transform_7, window_bounds = array<i64: 3, 1>}, {transform_indices = @transform_8, window_bounds = array<i64: 1, 3, 1156>}]} {
    %c0 = arith.constant 0 : index
    %c0_0 = arith.constant 0 : index
    %0 = vector.load %arg6[%c0, %c0_0] : memref<1x1156xf32, #tpu.memory_space<vmem>>, vector<1x1156xf32>
    %c0_1 = arith.constant 0 : index
    %c0_2 = arith.constant 0 : index
    %c0_3 = arith.constant 0 : index
    %1 = vector.load %arg1[%c0_1, %c0_2, %c0_3] : memref<1x8x1292xbf16, #tpu.memory_space<vmem>>, vector<1x8x1292xbf16>
    %2 = vector.shape_cast %1 : vector<1x8x1292xbf16> to vector<8x1292xbf16>
    %3 = vector.extract_strided_slice %2 {offsets = [0, 33], sizes = [8, 1156], strides = [1, 1]} : vector<8x1292xbf16> to vector<8x1156xbf16>
    %c0_4 = arith.constant 0 : index
    %c0_5 = arith.constant 0 : index
    %4 = vector.load %arg11[%c0_4, %c0_5] : memref<72x1156xbf16, #tpu.memory_space<vmem>>, vector<8x1156xbf16>
    tpu.vector_store %arg11[%c0_4, %c0_5], %3 {strides = array<i32>} : memref<72x1156xbf16, #tpu.memory_space<vmem>>, vector<8x1156xbf16>,
    %5 = vector.extract_strided_slice %2 {offsets = [0, 34], sizes = [8, 1156], strides = [1, 1]} : vector<8x1292xbf16> to vector<8x1156xbf16>
    %c8 = arith.constant 8 : index
    %c0_6 = arith.constant 0 : index
    %6 = vector.load %arg11[%c8, %c0_6] : memref<72x1156xbf16, #tpu.memory_space<vmem>>, vector<8x1156xbf16>
    tpu.vector_store %arg11[%c8, %c0_6], %5 {strides = array<i32>} : memref<72x1156xbf16, #tpu.memory_space<vmem>>, vector<8x1156xbf16>,
    %7 = vector.extract_strided_slice %2 {offsets = [0, 35], sizes = [8, 1156], strides = [1, 1]} : vector<8x1292xbf16> to vector<8x1156xbf16>
    %c16 = arith.constant 16 : index
    %c0_7 = arith.constant 0 : index
    %8 = vector.load %arg11[%c16, %c0_7] : memref<72x1156xbf16, #tpu.memory_space<vmem>>, vector<8x1156xbf16>
    tpu.vector_store %arg11[%c16, %c0_7], %7 {strides = array<i32>} : memref<72x1156xbf16, #tpu.memory_space<vmem>>, vector<8x1156xbf16>,
    %9 = vector.extract_strided_slice %2 {offsets = [0, 67], sizes = [8, 1156], strides = [1, 1]} : vector<8x1292xbf16> to vector<8x1156xbf16>
    %c24 = arith.constant 24 : index
    %c0_8 = arith.constant 0 : index
    %10 = vector.load %arg11[%c24, %c0_8] : memref<72x1156xbf16, #tpu.memory_space<vmem>>, vector<8x1156xbf16>
    tpu.vector_store %arg11[%c24, %c0_8], %9 {strides = array<i32>} : memref<72x1156xbf16, #tpu.memory_space<vmem>>, vector<8x1156xbf16>,
    %11 = vector.extract_strided_slice %2 {offsets = [0, 68], sizes = [8, 1156], strides = [1, 1]} : vector<8x1292xbf16> to vector<8x1156xbf16>
    %c32 = arith.constant 32 : index
    %c0_9 = arith.constant 0 : index
    %12 = vector.load %arg11[%c32, %c0_9] : memref<72x1156xbf16, #tpu.memory_space<vmem>>, vector<8x1156xbf16>
    tpu.vector_store %arg11[%c32, %c0_9], %11 {strides = array<i32>} : memref<72x1156xbf16, #tpu.memory_space<vmem>>, vector<8x1156xbf16>,
    %13 = vector.extract_strided_slice %2 {offsets = [0, 69], sizes = [8, 1156], strides = [1, 1]} : vector<8x1292xbf16> to vector<8x1156xbf16>
    %c40 = arith.constant 40 : index
    %c0_10 = arith.constant 0 : index
    %14 = vector.load %arg11[%c40, %c0_10] : memref<72x1156xbf16, #tpu.memory_space<vmem>>, vector<8x1156xbf16>
    tpu.vector_store %arg11[%c40, %c0_10], %13 {strides = array<i32>} : memref<72x1156xbf16, #tpu.memory_space<vmem>>, vector<8x1156xbf16>,
    %15 = vector.extract_strided_slice %2 {offsets = [0, 101], sizes = [8, 1156], strides = [1, 1]} : vector<8x1292xbf16> to vector<8x1156xbf16>
    %c48 = arith.constant 48 : index
    %c0_11 = arith.constant 0 : index
    %16 = vector.load %arg11[%c48, %c0_11] : memref<72x1156xbf16, #tpu.memory_space<vmem>>, vector<8x1156xbf16>
    tpu.vector_store %arg11[%c48, %c0_11], %15 {strides = array<i32>} : memref<72x1156xbf16, #tpu.memory_space<vmem>>, vector<8x1156xbf16>,
    %17 = vector.extract_strided_slice %2 {offsets = [0, 102], sizes = [8, 1156], strides = [1, 1]} : vector<8x1292xbf16> to vector<8x1156xbf16>
    %c56 = arith.constant 56 : index
    %c0_12 = arith.constant 0 : index
    %18 = vector.load %arg11[%c56, %c0_12] : memref<72x1156xbf16, #tpu.memory_space<vmem>>, vector<8x1156xbf16>
    tpu.vector_store %arg11[%c56, %c0_12], %17 {strides = array<i32>} : memref<72x1156xbf16, #tpu.memory_space<vmem>>, vector<8x1156xbf16>,
    %19 = vector.extract_strided_slice %2 {offsets = [0, 103], sizes = [8, 1156], strides = [1, 1]} : vector<8x1292xbf16> to vector<8x1156xbf16>
    %c64 = arith.constant 64 : index
    %c0_13 = arith.constant 0 : index
    %20 = vector.load %arg11[%c64, %c0_13] : memref<72x1156xbf16, #tpu.memory_space<vmem>>, vector<8x1156xbf16>
    tpu.vector_store %arg11[%c64, %c0_13], %19 {strides = array<i32>} : memref<72x1156xbf16, #tpu.memory_space<vmem>>, vector<8x1156xbf16>,
    %c0_14 = arith.constant 0 : index
    %c0_15 = arith.constant 0 : index
    %21 = vector.load %arg2[%c0_14, %c0_15] : memref<4x72xbf16, #tpu.memory_space<vmem>>, vector<4x72xbf16>
    %c0_16 = arith.constant 0 : index
    %c0_17 = arith.constant 0 : index
    %22 = vector.load %arg11[%c0_16, %c0_17] : memref<72x1156xbf16, #tpu.memory_space<vmem>>, vector<72x1156xbf16>
    %cst = arith.constant dense<0.000000e+00> : vector<4x1156xf32>
    %23 = tpu.matmul %21, %22, %cst {dimension_numbers = #tpu.dot_dimension_numbers<[1], [0], [0], [1], [0, 0, 1, 1], [], []>} : vector<4x72xbf16>, vector<72x1156xbf16>, vector<4x1156xf32> -> vector<4x1156xf32>
    %c0_18 = arith.constant 0 : index
    %c0_19 = arith.constant 0 : index
    %24 = vector.load %arg3[%c0_18, %c0_19] : memref<4x1xf32, #tpu.memory_space<vmem>>, vector<4x1xf32>
    %25 = vector.broadcast %24 : vector<4x1xf32> to vector<4x1156xf32>
    %26 = arith.addf %23, %25 : vector<4x1156xf32>
    %cst_20 = arith.constant 0.000000e+00 : f32
    %27 = vector.broadcast %cst_20 : f32 to vector<4x1156xf32>
    %28 = arith.maximumf %26, %27 : vector<4x1156xf32>
    %29 = vector.broadcast %0 : vector<1x1156xf32> to vector<4x1156xf32>
    %30 = arith.mulf %28, %29 : vector<4x1156xf32>
    %cst_21 = arith.constant 0.000000e+00 : bf16
    %31 = vector.broadcast %cst_21 : bf16 to vector<4x128xbf16>
    %c0_22 = arith.constant 0 : index
    %c0_23 = arith.constant 0 : index
    %32 = vector.load %arg10[%c0_22, %c0_23] : memref<4x1412xbf16, #tpu.memory_space<vmem>>, vector<4x128xbf16>
    tpu.vector_store %arg10[%c0_22, %c0_23], %31 {strides = array<i32>} : memref<4x1412xbf16, #tpu.memory_space<vmem>>, vector<4x128xbf16>,
    %cst_24 = arith.constant 0.000000e+00 : bf16
    %33 = vector.broadcast %cst_24 : bf16 to vector<4x128xbf16>
    %c0_25 = arith.constant 0 : index
    %c1284 = arith.constant 1284 : index
    %34 = vector.load %arg10[%c0_25, %c1284] : memref<4x1412xbf16, #tpu.memory_space<vmem>>, vector<4x128xbf16>
    tpu.vector_store %arg10[%c0_25, %c1284], %33 {strides = array<i32>} : memref<4x1412xbf16, #tpu.memory_space<vmem>>, vector<4x128xbf16>,
    %35 = arith.truncf %30 : vector<4x1156xf32> to vector<4x1156xbf16>
    %c0_26 = arith.constant 0 : index
    %c128 = arith.constant 128 : index
    %36 = vector.load %arg10[%c0_26, %c128] : memref<4x1412xbf16, #tpu.memory_space<vmem>>, vector<4x1156xbf16>
    tpu.vector_store %arg10[%c0_26, %c128], %35 {strides = array<i32>} : memref<4x1412xbf16, #tpu.memory_space<vmem>>, vector<4x1156xbf16>,
    %c0_27 = arith.constant 0 : index
    %c0_28 = arith.constant 0 : index
    %37 = vector.load %arg10[%c0_27, %c0_28] : memref<4x1412xbf16, #tpu.memory_space<vmem>>, vector<4x1412xbf16>
    %38 = vector.extract_strided_slice %37 {offsets = [0, 93], sizes = [4, 1156], strides = [1, 1]} : vector<4x1412xbf16> to vector<4x1156xbf16>
    %c0_29 = arith.constant 0 : index
    %c0_30 = arith.constant 0 : index
    %39 = vector.load %arg12[%c0_29, %c0_30] : memref<36x1156xbf16, #tpu.memory_space<vmem>>, vector<4x1156xbf16>
    tpu.vector_store %arg12[%c0_29, %c0_30], %38 {strides = array<i32>} : memref<36x1156xbf16, #tpu.memory_space<vmem>>, vector<4x1156xbf16>,
    %40 = vector.extract_strided_slice %37 {offsets = [0, 94], sizes = [4, 1156], strides = [1, 1]} : vector<4x1412xbf16> to vector<4x1156xbf16>
    %c4 = arith.constant 4 : index
    %c0_31 = arith.constant 0 : index
    %41 = vector.load %arg12[%c4, %c0_31] : memref<36x1156xbf16, #tpu.memory_space<vmem>>, vector<4x1156xbf16>
    tpu.vector_store %arg12[%c4, %c0_31], %40 {strides = array<i32>} : memref<36x1156xbf16, #tpu.memory_space<vmem>>, vector<4x1156xbf16>,
    %42 = vector.extract_strided_slice %37 {offsets = [0, 95], sizes = [4, 1156], strides = [1, 1]} : vector<4x1412xbf16> to vector<4x1156xbf16>
    %c8_32 = arith.constant 8 : index
    %c0_33 = arith.constant 0 : index
    %43 = vector.load %arg12[%c8_32, %c0_33] : memref<36x1156xbf16, #tpu.memory_space<vmem>>, vector<4x1156xbf16>
    tpu.vector_store %arg12[%c8_32, %c0_33], %42 {strides = array<i32>} : memref<36x1156xbf16, #tpu.memory_space<vmem>>, vector<4x1156xbf16>,
    %44 = vector.extract_strided_slice %37 {offsets = [0, 127], sizes = [4, 1156], strides = [1, 1]} : vector<4x1412xbf16> to vector<4x1156xbf16>
    %c12 = arith.constant 12 : index
    %c0_34 = arith.constant 0 : index
    %45 = vector.load %arg12[%c12, %c0_34] : memref<36x1156xbf16, #tpu.memory_space<vmem>>, vector<4x1156xbf16>
    tpu.vector_store %arg12[%c12, %c0_34], %44 {strides = array<i32>} : memref<36x1156xbf16, #tpu.memory_space<vmem>>, vector<4x1156xbf16>,
    %46 = vector.extract_strided_slice %37 {offsets = [0, 128], sizes = [4, 1156], strides = [1, 1]} : vector<4x1412xbf16> to vector<4x1156xbf16>
    %c16_35 = arith.constant 16 : index
    %c0_36 = arith.constant 0 : index
    %47 = vector.load %arg12[%c16_35, %c0_36] : memref<36x1156xbf16, #tpu.memory_space<vmem>>, vector<4x1156xbf16>
    tpu.vector_store %arg12[%c16_35, %c0_36], %46 {strides = array<i32>} : memref<36x1156xbf16, #tpu.memory_space<vmem>>, vector<4x1156xbf16>,
    %48 = vector.extract_strided_slice %37 {offsets = [0, 129], sizes = [4, 1156], strides = [1, 1]} : vector<4x1412xbf16> to vector<4x1156xbf16>
    %c20 = arith.constant 20 : index
    %c0_37 = arith.constant 0 : index
    %49 = vector.load %arg12[%c20, %c0_37] : memref<36x1156xbf16, #tpu.memory_space<vmem>>, vector<4x1156xbf16>
    tpu.vector_store %arg12[%c20, %c0_37], %48 {strides = array<i32>} : memref<36x1156xbf16, #tpu.memory_space<vmem>>, vector<4x1156xbf16>,
    %50 = vector.extract_strided_slice %37 {offsets = [0, 161], sizes = [4, 1156], strides = [1, 1]} : vector<4x1412xbf16> to vector<4x1156xbf16>
    %c24_38 = arith.constant 24 : index
    %c0_39 = arith.constant 0 : index
    %51 = vector.load %arg12[%c24_38, %c0_39] : memref<36x1156xbf16, #tpu.memory_space<vmem>>, vector<4x1156xbf16>
    tpu.vector_store %arg12[%c24_38, %c0_39], %50 {strides = array<i32>} : memref<36x1156xbf16, #tpu.memory_space<vmem>>, vector<4x1156xbf16>,
    %52 = vector.extract_strided_slice %37 {offsets = [0, 162], sizes = [4, 1156], strides = [1, 1]} : vector<4x1412xbf16> to vector<4x1156xbf16>
    %c28 = arith.constant 28 : index
    %c0_40 = arith.constant 0 : index
    %53 = vector.load %arg12[%c28, %c0_40] : memref<36x1156xbf16, #tpu.memory_space<vmem>>, vector<4x1156xbf16>
    tpu.vector_store %arg12[%c28, %c0_40], %52 {strides = array<i32>} : memref<36x1156xbf16, #tpu.memory_space<vmem>>, vector<4x1156xbf16>,
    %54 = vector.extract_strided_slice %37 {offsets = [0, 163], sizes = [4, 1156], strides = [1, 1]} : vector<4x1412xbf16> to vector<4x1156xbf16>
    %c32_41 = arith.constant 32 : index
    %c0_42 = arith.constant 0 : index
    %55 = vector.load %arg12[%c32_41, %c0_42] : memref<36x1156xbf16, #tpu.memory_space<vmem>>, vector<4x1156xbf16>
    tpu.vector_store %arg12[%c32_41, %c0_42], %54 {strides = array<i32>} : memref<36x1156xbf16, #tpu.memory_space<vmem>>, vector<4x1156xbf16>,
    %c0_43 = arith.constant 0 : index
    %c0_44 = arith.constant 0 : index
    %56 = vector.load %arg4[%c0_43, %c0_44] : memref<4x36xbf16, #tpu.memory_space<vmem>>, vector<4x36xbf16>
    %c0_45 = arith.constant 0 : index
    %c0_46 = arith.constant 0 : index
    %57 = vector.load %arg12[%c0_45, %c0_46] : memref<36x1156xbf16, #tpu.memory_space<vmem>>, vector<36x1156xbf16>
    %cst_47 = arith.constant dense<0.000000e+00> : vector<4x1156xf32>
    %58 = tpu.matmul %56, %57, %cst_47 {dimension_numbers = #tpu.dot_dimension_numbers<[1], [0], [0], [1], [0, 0, 1, 1], [], []>} : vector<4x36xbf16>, vector<36x1156xbf16>, vector<4x1156xf32> -> vector<4x1156xf32>
    %c0_48 = arith.constant 0 : index
    %c0_49 = arith.constant 0 : index
    %59 = vector.load %arg5[%c0_48, %c0_49] : memref<4x1xf32, #tpu.memory_space<vmem>>, vector<4x1xf32>
    %60 = vector.broadcast %59 : vector<4x1xf32> to vector<4x1156xf32>
    %61 = arith.addf %58, %60 : vector<4x1156xf32>
    %cst_50 = arith.constant 0.000000e+00 : f32
    %62 = vector.broadcast %cst_50 : f32 to vector<4x1156xf32>
    %63 = arith.maximumf %61, %62 : vector<4x1156xf32>
    %64 = vector.broadcast %0 : vector<1x1156xf32> to vector<4x1156xf32>
    %65 = arith.mulf %63, %64 : vector<4x1156xf32>
    %c0_51 = arith.constant 0 : index
    %c0_52 = arith.constant 0 : index
    %66 = vector.load %arg7[%c0_51, %c0_52] : memref<3x4xf32, #tpu.memory_space<vmem>>, vector<3x4xf32>
    %cst_53 = arith.constant dense<0.000000e+00> : vector<3x1156xf32>
    %67 = tpu.matmul %66, %65, %cst_53 {dimension_numbers = #tpu.dot_dimension_numbers<[1], [0], [0], [1], [0, 0, 1, 1], [], []>} : vector<3x4xf32>, vector<4x1156xf32>, vector<3x1156xf32> -> vector<3x1156xf32>
    %c0_54 = arith.constant 0 : index
    %c0_55 = arith.constant 0 : index
    %68 = vector.load %arg8[%c0_54, %c0_55] : memref<3x1xf32, #tpu.memory_space<vmem>>, vector<3x1xf32>
    %69 = vector.broadcast %68 : vector<3x1xf32> to vector<3x1156xf32>
    %70 = arith.addf %67, %69 : vector<3x1156xf32>
    %c0_56 = arith.constant 0 : index
    %c0_57 = arith.constant 0 : index
    %c0_58 = arith.constant 0 : index
    %71 = vector.load %arg9[%c0_56, %c0_57, %c0_58] : memref<1x3x1156xf32, #tpu.memory_space<vmem>>, vector<1x3x1156xf32>
    %72 = vector.shape_cast %71 : vector<1x3x1156xf32> to vector<3x1156xf32>
    %73 = vector.shape_cast %70 : vector<3x1156xf32> to vector<1x3x1156xf32>
    tpu.vector_store %arg9[%c0_56, %c0_57, %c0_58], %73 {strides = array<i32>} : memref<1x3x1156xf32, #tpu.memory_space<vmem>>, vector<1x3x1156xf32>,
    return
  }
  func.func @transform_0(%arg0: i32) -> (i32, i32, i32) {
    %c0_i32 = arith.constant 0 : i32
    %c0_i32_0 = arith.constant 0 : i32
    %c0_i32_1 = arith.constant 0 : i32
    return %arg0, %c0_i32, %c0_i32_0 : i32, i32, i32
  }
  func.func @transform_1(%arg0: i32) -> (i32, i32) {
    %c0_i32 = arith.constant 0 : i32
    %c0_i32_0 = arith.constant 0 : i32
    %c0_i32_1 = arith.constant 0 : i32
    return %c0_i32, %c0_i32_0 : i32, i32
  }
  func.func @transform_2(%arg0: i32) -> (i32, i32) {
    %c0_i32 = arith.constant 0 : i32
    %c0_i32_0 = arith.constant 0 : i32
    %c0_i32_1 = arith.constant 0 : i32
    return %c0_i32, %c0_i32_0 : i32, i32
  }
  func.func @transform_3(%arg0: i32) -> (i32, i32) {
    %c0_i32 = arith.constant 0 : i32
    %c0_i32_0 = arith.constant 0 : i32
    %c0_i32_1 = arith.constant 0 : i32
    return %c0_i32, %c0_i32_0 : i32, i32
  }
  func.func @transform_4(%arg0: i32) -> (i32, i32) {
    %c0_i32 = arith.constant 0 : i32
    %c0_i32_0 = arith.constant 0 : i32
    %c0_i32_1 = arith.constant 0 : i32
    return %c0_i32, %c0_i32_0 : i32, i32
  }
  func.func @transform_5(%arg0: i32) -> (i32, i32) {
    %c0_i32 = arith.constant 0 : i32
    %c0_i32_0 = arith.constant 0 : i32
    %c0_i32_1 = arith.constant 0 : i32
    return %c0_i32, %c0_i32_0 : i32, i32
  }
  func.func @transform_6(%arg0: i32) -> (i32, i32) {
    %c0_i32 = arith.constant 0 : i32
    %c0_i32_0 = arith.constant 0 : i32
    %c0_i32_1 = arith.constant 0 : i32
    return %c0_i32, %c0_i32_0 : i32, i32
  }
  func.func @transform_7(%arg0: i32) -> (i32, i32) {
    %c0_i32 = arith.constant 0 : i32
    %c0_i32_0 = arith.constant 0 : i32
    %c0_i32_1 = arith.constant 0 : i32
    return %c0_i32, %c0_i32_0 : i32, i32
  }
  func.func @transform_8(%arg0: i32) -> (i32, i32, i32) {
    %c0_i32 = arith.constant 0 : i32
    %c0_i32_0 = arith.constant 0 : i32
    %c0_i32_1 = arith.constant 0 : i32
    return %arg0, %c0_i32, %c0_i32_0 : i32, i32, i32
  }
}

</mosaic_0001>

<bundles_post_ra>
// kernel: multi_up_pallas.4
= control target key start
LH: loop header
LB: loop body
LE: loop exit
PB: predicated region body
PF: predicated region fallthrough
CT: control target
= control target key end

     0   :  { %s1075_s12 = smov 0   ;;  %s1246_s0 = inlined_call_operand.vmem [shape: bf16[2,80,10], index: 0, kind: input, shape index: {}]   ;;  %s1247_s1 = inlined_call_operand.vmem [shape: f32[10,18], index: 1, kind: input, shape index: {}]   ;;  %s1248_s2 = inlined_call_operand.vmem [shape: f32[176,80], index: 2, kind: input, shape index: {}]   ;;  %s1249_s3 = inlined_call_operand.vmem [shape: bf16[2,176,18], index: 3, kind: output, shape index: {}]  }
   0x1 LB: > { %s773_s13 = sadd.s32 4294967295, %s1052_s12   ;;  %p777_p0 = scmp.ge.s32.totalorder %s1052_s12, 1  ;;  %s1052_s12 = sphi %s1075_s12, %s13_s12  }
   0x2   : > { %p137_p1 = scmp.lt.s32.totalorder %s1052_s12, 3 }
   0x4   : > { %p138_p2 = pnand %p777_p0, %p137_p1 }
   0x5   : > { %v191_v0 = vld [vmem:[%s1247_s1] sm:$0xff] (!%p138_p2)  ;;  %v192_v1 = vld [vmem:[%s1247_s1 + $0x8] sm:$0x3] (!%p138_p2)  ;;  %vm224_vm0 = vcmask (!%p138_p2), 1041408   ;;  %p161_p3 = scmp.lt.s32.totalorder (!%p138_p2), %s773_s13, 1  ;;  %vm1054_vm1 = vmmov (!%p138_p2), 1  }
   0x6   : > { %141 = sbr.rel (%p138_p2) target bundleno = 492 (0x1ec), region = 32  ;;  %v999_v2 = vpack.c.bf16 (!%p138_p2), %v192_v1, %v191_v0  ;;  %vm1000_vm2 = vmpackc.low (!%p138_p2), %vm224_vm0, %vm1054_vm1  ;;  %vm193_vm3 = vcmask (!%p138_p2), 80896   ;;  %v353_v18 = vld [vmem:[%s1248_s2 + $0x50] sm:$0xff] (!%p138_p2)  ;;  %vm365_vm4 = vcmask (!%p138_p2), 654336   ;;  %v343_v19 = vld [vmem:[%s1248_s2] sm:$0xff] (!%p138_p2)  ;;  %vm695_vm5 = vcmask (!%p138_p2), 142336  }
   0x7   : > { %981 = vmatprep.mubr.msk.f32.mxu1 (!%p138_p2), %vm365_vm4, %v353_v18  ;;  %v354_v35 = vld [vmem:[%s1248_s2 + $0x58] sm:$0xff] (!%p138_p2)  ;;  %v344_v36 = vld [vmem:[%s1248_s2 + $0x8] sm:$0xff] (!%p138_p2)  ;;  %v355_v37 = vld [vmem:[%s1248_s2 + $0x60] sm:$0xff] (!%p138_p2) }
   0x8   : > { %1001 = vmatprep.subr.msk.bf16.mxu0 (!%p138_p2), %vm1000_vm2, %v999_v2  ;;  %v345_v38 = vld [vmem:[%s1248_s2 + $0x10] sm:$0xff] (!%p138_p2)  ;;  %v356_v39 = vld [vmem:[%s1248_s2 + $0x68] sm:$0xff] (!%p138_p2)  ;;  %v346_v40 = vld [vmem:[%s1248_s2 + $0x18] sm:$0xff] (!%p138_p2) }
   0x9   : > { %1004 = vmatpush3.bf16.msk.msra.mxu0 (!%p138_p2), %vm1000_vm2, %v999_v2  ;;  %v357_v41 = vld [vmem:[%s1248_s2 + $0x70] sm:$0xff] (!%p138_p2)  ;;  %v347_v42 = vld [vmem:[%s1248_s2 + $0x20] sm:$0xff] (!%p138_p2)  ;;  %v358_v43 = vld [vmem:[%s1248_s2 + $0x78] sm:$0xff] (!%p138_p2) }
   0xa   : > { %v348_v44 = vld [vmem:[%s1248_s2 + $0x28] sm:$0xff] (!%p138_p2)  ;;  %v359_v45 = vld [vmem:[%s1248_s2 + $0x80] sm:$0xff] (!%p138_p2)  ;;  %v349_v46 = vld [vmem:[%s1248_s2 + $0x30] sm:$0xff] (!%p138_p2) }
   0xb   : > { %v360_v47 = vld [vmem:[%s1248_s2 + $0x88] sm:$0xff] (!%p138_p2)  ;;  %v350_v48 = vld [vmem:[%s1248_s2 + $0x38] sm:$0xff] (!%p138_p2)  ;;  %v361_v49 = vld [vmem:[%s1248_s2 + $0x90] sm:$0xff] (!%p138_p2) }
   0xc   : > { %v351_v50 = vld [vmem:[%s1248_s2 + $0x40] sm:$0xff] (!%p138_p2)  ;;  %v362_v51 = vld [vmem:[%s1248_s2 + $0x98] sm:$0xff] (!%p138_p2)  ;;  %v352_v52 = vld [vmem:[%s1248_s2 + $0x48] sm:$0xff] (!%p138_p2) }
   0xd   : > { %s1251_s13 = smov (!%p161_p3, %s773_s13), 1  ;;  %v363_v53 = vld [vmem:[%s1248_s2 + $0xa0] sm:$0xff]  ;;  %v364_v54 = vld [vmem:[%s1248_s2 + $0xa8] sm:$0xff] }
   0xe   : > { %s1035_s18 = smul.u32 40, %s1251_s13 }
   0xf   : > { %s1036_s16 = smul.u32 88, %s1251_s13 }
  0x10   : > { %s165_s21 = scalar_lea.vmem %s1246_s0, %s1035_s18 }
  0x11   : > { %v860_v3 = vld [vmem:[%s165_s21] sm:$0xff]   ;;  %v879_v4 = vld [vmem:[%s165_s21 + $0x8] sm:$0xff]   ;;  %v880_v8 = vld [vmem:[%s165_s21 + $0x10] sm:$0xff]   ;;  %s1197_s19 = scalar_lea.vmem %s1249_s3, %s1036_s16 }
  0x12   : > { %v861_v5 = vunpack.c.l.bf16 %v860_v3  ;;  %v862_v6 = vunpack.c.h.bf16 %v860_v3  ;;  %v865_v7 = vunpack.c.l.bf16 %v879_v4  ;;  %v866_v9 = vunpack.c.h.bf16 %v879_v4  ;;  %v881_v11 = vld [vmem:[%s165_s21 + $0x18] sm:$0xff]   ;;  %v882_v14 = vld [vmem:[%s165_s21 + $0x20] sm:$0xff]  }
  0x13   : > { %v869_v10 = vunpack.c.l.bf16 %v880_v8  ;;  %v870_v12 = vunpack.c.h.bf16 %v880_v8  ;;  %v873_v13 = vunpack.c.l.bf16 %v881_v11  ;;  %v874_v15 = vunpack.c.h.bf16 %v881_v11 }
  0x14   : > { %931 = vmatprep.mubr.msk.f32.mxu0 %vm193_vm3, %v861_v5  ;;  %v877_v16 = vunpack.c.l.bf16 %v882_v14  ;;  %v878_v17 = vunpack.c.h.bf16 %v882_v14 }
  0x15   : > { %932 = vmatmul.mubr.msk.f32.vlgmr.msra.gmra.mrb[0].mxu0 %vm193_vm3, %v862_v6 }
  0x16   : > { %934 = vmatprep.mubr.msk.f32.mxu0 %vm193_vm3, %v865_v7 }
  0x19   : > { %935 = vmatmul.mubr.msk.f32.gmra.mrb[2].mxu0 %vm193_vm3, %v866_v9 }
  0x1a   : > { %937 = vmatprep.mubr.msk.f32.mxu0 %vm193_vm3, %v869_v10 }
  0x1d   : > { %938 = vmatmul.mubr.msk.f32.gmra.mrb[4].mxu0 %vm193_vm3, %v870_v12 }
  0x1e   : > { %940 = vmatprep.mubr.msk.f32.mxu0 %vm193_vm3, %v873_v13 }
  0x21   : > { %941 = vmatmul.mubr.msk.f32.gmra.mrb[6].mxu0 %vm193_vm3, %v874_v15 }
  0x22   : > { %943 = vmatprep.mubr.msk.f32.mxu0 %vm193_vm3, %v877_v16 }
  0x25   : > { %944 = vmatmul.mubr.msk.f32.gmra.mrb[8].mxu0 %vm193_vm3, %v878_v17 }
  0x26   : > { %966 = vmatprep.mubr.msk.f32.mxu0 %vm365_vm4, %v343_v19 }
  0xe8   : > { %v933_v20 = vpop.f32.mrb[0].mxu0 }
  0xe9   : > { %v294_v21 = vpop.f32.mrb[1].mxu0 }
  0xea   : > { %v1005_v22 = vpack.c.bf16 %v933_v20, %v294_v21 }
  0xec   : > { %v936_v23 = vpop.f32.mrb[2].mxu0  ;;  %1006 = vmatprep.subr.bf16.mxu0 %v1005_v22  ;;  %1025 = vmatprep.subr.bf16.mxu1 %v1005_v22 }
  0xed   : > { %v304_v24 = vpop.f32.mrb[3].mxu0  ;;  %1008 = vmatpush3.bf16.msra.mxu0 %v1005_v22  ;;  %1030 = vmatpush3.bf16.msra.mxu1 %v1005_v22 }
  0xee   : > { %v1009_v25 = vpack.c.bf16 %v936_v23, %v304_v24 }
  0xf0   : > { %v939_v26 = vpop.f32.mrb[4].mxu0  ;;  %1010 = vmatprep.subr.bf16.mxu0 %v1009_v25  ;;  %1026 = vmatprep.subr.bf16.mxu1 %v1009_v25 }
  0xf1   : > { %v314_v27 = vpop.f32.mrb[5].mxu0  ;;  %1012 = vmatpush3.bf16.msra.mxu0 %v1009_v25  ;;  %1031 = vmatpush3.bf16.msra.mxu1 %v1009_v25 }
  0xf2   : > { %v1013_v28 = vpack.c.bf16 %v939_v26, %v314_v27 }
  0xf4   : > { %v942_v29 = vpop.f32.mrb[6].mxu0  ;;  %1014 = vmatprep.subr.bf16.mxu0 %v1013_v28  ;;  %1027 = vmatprep.subr.bf16.mxu1 %v1013_v28 }
  0xf5   : > { %v324_v30 = vpop.f32.mrb[7].mxu0  ;;  %1016 = vmatpush3.bf16.msra.mxu0 %v1013_v28  ;;  %1032 = vmatpush3.bf16.msra.mxu1 %v1013_v28 }
  0xf6   : > { %v1017_v31 = vpack.c.bf16 %v942_v29, %v324_v30 }
  0xf8   : > { %v945_v32 = vpop.f32.mrb[8].mxu0  ;;  %1018 = vmatprep.subr.bf16.mxu0 %v1017_v31  ;;  %1028 = vmatprep.subr.bf16.mxu1 %v1017_v31 }
  0xf9   : > { %v334_v33 = vpop.f32.mrb[9].mxu0  ;;  %1020 = vmatpush3.bf16.msra.mxu0 %v1017_v31  ;;  %1033 = vmatpush3.bf16.msra.mxu1 %v1017_v31 }
  0xfa   : > { %v1021_v34 = vpack.c.bf16 %v945_v32, %v334_v33 }
  0xfc   : > { %1022 = vmatprep.subr.bf16.mxu0 %v1021_v34  ;;  %1029 = vmatprep.subr.bf16.mxu1 %v1021_v34 }
  0xfd   : > { %1024 = vmatpush3.bf16.msra.mxu0 %v1021_v34  ;;  %1034 = vmatpush3.bf16.msra.mxu1 %v1021_v34 }
 0x100   : > { %982 = vmatmul.mubr.msk.f32.vlgmr.msra.gmra.mrb[0].mxu1 %vm365_vm4, %v354_v35  ;;  %967 = vmatmul.mubr.msk.f32.vlgmr.msra.gmra.mrb[10].mxu0 %vm365_vm4, %v344_v36 }
 0x101   : > { %984 = vmatprep.mubr.msk.f32.mxu1 %vm365_vm4, %v355_v37  ;;  %969 = vmatprep.mubr.msk.f32.mxu0 %vm365_vm4, %v345_v38 }
 0x104   : > { %985 = vmatmul.mubr.msk.f32.gmra.mrb[2].mxu1 %vm365_vm4, %v356_v39  ;;  %970 = vmatmul.mubr.msk.f32.gmra.mrb[12].mxu0 %vm365_vm4, %v346_v40 }
 0x105   : > { %987 = vmatprep.mubr.msk.f32.mxu1 %vm365_vm4, %v357_v41  ;;  %972 = vmatprep.mubr.msk.f32.mxu0 %vm365_vm4, %v347_v42 }
 0x108   : > { %988 = vmatmul.mubr.msk.f32.gmra.mrb[4].mxu1 %vm365_vm4, %v358_v43  ;;  %973 = vmatmul.mubr.msk.f32.gmra.mrb[14].mxu0 %vm365_vm4, %v348_v44 }
 0x109   : > { %990 = vmatprep.mubr.msk.f32.mxu1 %vm365_vm4, %v359_v45  ;;  %975 = vmatprep.mubr.msk.f32.mxu0 %vm365_vm4, %v349_v46 }
 0x10c   : > { %991 = vmatmul.mubr.msk.f32.gmra.mrb[6].mxu1 %vm365_vm4, %v360_v47  ;;  %976 = vmatmul.mubr.msk.f32.gmra.mrb[16].mxu0 %vm365_vm4, %v350_v48 }
 0x10d   : > { %993 = vmatprep.mubr.msk.f32.mxu1 %vm365_vm4, %v361_v49  ;;  %978 = vmatprep.mubr.msk.f32.mxu0 %vm365_vm4, %v351_v50 }
 0x110   : > { %994 = vmatmul.mubr.msk.f32.gmra.mrb[8].mxu1 %vm365_vm4, %v362_v51  ;;  %979 = vmatmul.mubr.msk.f32.gmra.mrb[18].mxu0 %vm365_vm4, %v352_v52 }
 0x111   : > { %996 = vmatprep.mubr.msk.f32.mxu1 %vm365_vm4, %v363_v53 }
 0x114   : > { %997 = vmatmul.mubr.msk.f32.gmra.mrb[10].mxu1 %vm365_vm4, %v364_v54 }
 0x1d3   : > { %v983_v55 = vpop.f32.mrb[0].mxu1  ;;  %v968_v56 = vpop.f32.mrb[10].mxu0 }
 0x1d4   : > { %v848_v57 = vpack.c.bf16 %v983_v55, %v983_v55  ;;  %v548_v58 = vpop.f32.mrb[1].mxu1  ;;  %v838_v59 = vpack.c.bf16 %v968_v56, %v968_v56  ;;  %v498_v60 = vpop.f32.mrb[11].mxu0 }
 0x1d5   : > { %v847_v61 = vpack.c.bf16 %v548_v58, %v548_v58  ;;  %v837_v62 = vpack.c.bf16 %v498_v60, %v498_v60 }
 0x1d6   : > { %707 = vst.msk [vmem:[%s1197_s19 + $0x2c] sm:$0xf] %vm695_vm5, %v848_v57  ;;  %697 = vst.msk [vmem:[%s1197_s19 + $0x4] sm:$0xf] %vm695_vm5, %v838_v59 }
 0x1d7   : > { %706 = vst.msk [vmem:[%s1197_s19 + $0x28] sm:$0xf] %vm695_vm5, %v847_v61  ;;  %696 = vst.msk [vmem:[%s1197_s19] sm:$0xf] %vm695_vm5, %v837_v62  ;;  %v986_v63 = vpop.f32.mrb[2].mxu1  ;;  %v971_v0 = vpop.f32.mrb[12].mxu0 }
 0x1d8   : > { %v850_v1 = vpack.c.bf16 %v986_v63, %v986_v63  ;;  %v558_v2 = vpop.f32.mrb[3].mxu1  ;;  %v840_v3 = vpack.c.bf16 %v971_v0, %v971_v0  ;;  %v508_v4 = vpop.f32.mrb[13].mxu0 }
 0x1d9   : > { %v849_v5 = vpack.c.bf16 %v558_v2, %v558_v2  ;;  %v839_v6 = vpack.c.bf16 %v508_v4, %v508_v4 }
 0x1da   : > { %709 = vst.msk [vmem:[%s1197_s19 + $0x34] sm:$0xf] %vm695_vm5, %v850_v1  ;;  %699 = vst.msk [vmem:[%s1197_s19 + $0xc] sm:$0xf] %vm695_vm5, %v840_v3 }
 0x1db   : > { %708 = vst.msk [vmem:[%s1197_s19 + $0x30] sm:$0xf] %vm695_vm5, %v849_v5  ;;  %698 = vst.msk [vmem:[%s1197_s19 + $0x8] sm:$0xf] %vm695_vm5, %v839_v6  ;;  %v989_v7 = vpop.f32.mrb[4].mxu1  ;;  %v974_v8 = vpop.f32.mrb[14].mxu0 }
 0x1dc   : > { %v852_v9 = vpack.c.bf16 %v989_v7, %v989_v7  ;;  %v568_v10 = vpop.f32.mrb[5].mxu1  ;;  %v842_v11 = vpack.c.bf16 %v974_v8, %v974_v8  ;;  %v518_v12 = vpop.f32.mrb[15].mxu0 }
 0x1dd   : > { %v851_v13 = vpack.c.bf16 %v568_v10, %v568_v10  ;;  %v841_v14 = vpack.c.bf16 %v518_v12, %v518_v12 }
 0x1de   : > { %711 = vst.msk [vmem:[%s1197_s19 + $0x3c] sm:$0xf] %vm695_vm5, %v852_v9  ;;  %701 = vst.msk [vmem:[%s1197_s19 + $0x14] sm:$0xf] %vm695_vm5, %v842_v11 }
 0x1df   : > { %710 = vst.msk [vmem:[%s1197_s19 + $0x38] sm:$0xf] %vm695_vm5, %v851_v13  ;;  %700 = vst.msk [vmem:[%s1197_s19 + $0x10] sm:$0xf] %vm695_vm5, %v841_v14  ;;  %v992_v15 = vpop.f32.mrb[6].mxu1  ;;  %v977_v16 = vpop.f32.mrb[16].mxu0 }
 0x1e0   : > { %v854_v17 = vpack.c.bf16 %v992_v15, %v992_v15  ;;  %v578_v18 = vpop.f32.mrb[7].mxu1  ;;  %v844_v19 = vpack.c.bf16 %v977_v16, %v977_v16  ;;  %v528_v20 = vpop.f32.mrb[17].mxu0 }
 0x1e1   : > { %v853_v21 = vpack.c.bf16 %v578_v18, %v578_v18  ;;  %v843_v22 = vpack.c.bf16 %v528_v20, %v528_v20 }
 0x1e2   : > { %713 = vst.msk [vmem:[%s1197_s19 + $0x44] sm:$0xf] %vm695_vm5, %v854_v17  ;;  %703 = vst.msk [vmem:[%s1197_s19 + $0x1c] sm:$0xf] %vm695_vm5, %v844_v19 }
 0x1e3   : > { %712 = vst.msk [vmem:[%s1197_s19 + $0x40] sm:$0xf] %vm695_vm5, %v853_v21  ;;  %702 = vst.msk [vmem:[%s1197_s19 + $0x18] sm:$0xf] %vm695_vm5, %v843_v22  ;;  %v995_v23 = vpop.f32.mrb[8].mxu1  ;;  %v980_v24 = vpop.f32.mrb[18].mxu0 }
 0x1e4   : > { %v856_v25 = vpack.c.bf16 %v995_v23, %v995_v23  ;;  %v588_v26 = vpop.f32.mrb[9].mxu1  ;;  %v846_v27 = vpack.c.bf16 %v980_v24, %v980_v24  ;;  %v538_v28 = vpop.f32.mrb[19].mxu0 }
 0x1e5   : > { %v855_v29 = vpack.c.bf16 %v588_v26, %v588_v26  ;;  %v845_v30 = vpack.c.bf16 %v538_v28, %v538_v28 }
 0x1e6   : > { %715 = vst.msk [vmem:[%s1197_s19 + $0x4c] sm:$0xf] %vm695_vm5, %v856_v25  ;;  %705 = vst.msk [vmem:[%s1197_s19 + $0x24] sm:$0xf] %vm695_vm5, %v846_v27 }
 0x1e7   : > { %714 = vst.msk [vmem:[%s1197_s19 + $0x48] sm:$0xf] %vm695_vm5, %v855_v29  ;;  %704 = vst.msk [vmem:[%s1197_s19 + $0x20] sm:$0xf] %vm695_vm5, %v845_v30  ;;  %v998_v31 = vpop.f32.mrb[10].mxu1 }
 0x1e8   : > { %v858_v32 = vpack.c.bf16 %v998_v31, %v998_v31  ;;  %v598_v33 = vpop.f32.mrb[11].mxu1 }
 0x1e9   : > { %v857_v34 = vpack.c.bf16 %v598_v33, %v598_v33 }
 0x1ea   : > { %717 = vst.msk [vmem:[%s1197_s19 + $0x54] sm:$0xf] %vm695_vm5, %v858_v32 }
 0x1eb   : > { %716 = vst.msk [vmem:[%s1197_s19 + $0x50] sm:$0xf] %vm695_vm5, %v857_v34 }
 0x1ec PF: > { %s13_s12 = sadd.s32 1, %s1052_s12  }
 0x1ed   : > { %p10_p4 = scmp.ge.s32.totalorder %s13_s12, 4  }
 0x1ef   :  { %12 = sbr.rel (!%p10_p4) target bundleno = 1 (0x1), region = 62 }

// kernel: multi_up_pallas.5
= control target key start
LH: loop header
LB: loop body
LE: loop exit
PB: predicated region body
PF: predicated region fallthrough
CT: control target
= control target key end

     0   :  { %s1177_s21 = smov 0   ;;  %s1305_s0 = inlined_call_operand.vmem [shape: bf16[2,8,396], index: 0, kind: input, shape index: {}]   ;;  %s1306_s1 = inlined_call_operand.vmem [shape: bf16[4,72], index: 1, kind: input, shape index: {}]   ;;  %s1307_s2 = inlined_call_operand.vmem [shape: f32[4,1], index: 2, kind: input, shape index: {}]   ;;  %s1308_s3 = inlined_call_operand.vmem [shape: bf16[8,36], index: 3, kind: input, shape index: {}]   ;;  %s1309_s4 = inlined_call_operand.vmem [shape: f32[8,1], index: 4, kind: input, shape index: {}]   ;;  %s1310_s5 = inlined_call_operand.vmem [shape: f32[1,324], index: 5, kind: input, shape index: {}]   ;;  %s1311_s6 = inlined_call_operand.vmem [shape: bf16[2,8,324], index: 6, kind: output, shape index: {}]  }
   0x1 LB: > { %s990_s22 = sadd.s32 4294967295, %s1122_s21   ;;  %p994_p0 = scmp.ge.s32.totalorder %s1122_s21, 1  ;;  %s1122_s21 = sphi %s1177_s21, %s16_s21  }
   0x2   : > { %p212_p1 = scmp.lt.s32.totalorder %s1122_s21, 3 }
   0x4   : > { %p213_p2 = pnand %p994_p0, %p212_p1 }
   0x5   : > { %p242_p3 = scmp.lt.s32.totalorder (!%p213_p2), %s990_s22, 1  ;;  %v1124_v1 = vmov (!%p213_p2), 0.0   ;;  %s1125_s27 = smov (!%p213_p2), 110   ;;  %v1133_v3 = vmov (!%p213_p2), 0   ;;  %vm1134_vm0 = vmmov (!%p213_p2), 0   ;;  %vm592_vm1 = vcmask (!%p213_p2), 1041952  }
   0x6   : > { %216 = sbr.rel (%p213_p2) target bundleno = 797 (0x31d), region = 44  ;;  %1046 = vmatprep.subr.bf16.mxu1 (!%p213_p2), %v1124_v1  ;;  %s1126_s28 = smov (!%p213_p2), 111   ;;  %591 = vst [vmem:[#allocation2] sm:$0x3] (!%p213_p2), %v1133_v3  ;;  %520 = vmatprep.mubr.bf16.mxu0 (!%p213_p2), %v1133_v3  ;;  %vm593_vm2 = vcmask (!%p213_p2), 551938   ;;  %vm271_vm4 = vcmask (!%p213_p2), 551936  }
   0x7   : > { %s1127_s29 = smov (!%p213_p2), 109   ;;  %s1128_s30 = smov (!%p213_p2), 93   ;;  %1097 = vset.pattern.permute.xlu0 (!%p213_p2), %v1133_v3  ;;  %1056 = vmatprep.mubr.msk.bf16.mxu1 (!%p213_p2), %vm1134_vm0, %v1124_v1  ;;  %vm594_vm3 = vmor (!%p213_p2), %vm593_vm2, %vm592_vm1  ;;  %v396_v4 = vld [vmem:[%s1307_s2] sm:$0xf] (!%p213_p2)  ;;  %vm264_vm5 = vcmask (!%p213_p2), 1043456   ;;  %vm280_vm6 = vcmask (!%p213_p2), 900096  }
   0x8   : > { %s1129_s7 = smov (!%p213_p2), 92   ;;  %s1130_s8 = smov (!%p213_p2), 91   ;;  %595 = vst.msk [vmem:[#allocation2 + $0x6] sm:$0xf] (!%p213_p2), %vm594_vm3, %v1133_v3  ;;  %vm266_vm7 = vcmask (!%p213_p2), 908288   ;;  %vm293_vm8 = vcmask (!%p213_p2), 891904  }
   0x9   : > { %s1131_s9 = smov (!%p213_p2), 75   ;;  %s1132_s10 = smov (!%p213_p2), 74   ;;  %vm306_vm9 = vcmask (!%p213_p2), 760832   ;;  %vm319_vm10 = vcmask (!%p213_p2), 752640   ;;  %vm332_vm11 = vcmask (!%p213_p2), 744448   ;;  %vm345_vm12 = vcmask (!%p213_p2), 613376  }
   0xa   : > { %s1135_s11 = smov (!%p213_p2), 73   ;;  %vm358_vm13 = vcmask (!%p213_p2), 605184   ;;  %vm371_vm14 = vcmask (!%p213_p2), 596992   ;;  %vm474_vm15 = vcmask (!%p213_p2), 588800   ;;  %vm620_vm1 = vcmask (!%p213_p2), 1043458   ;;  %s1137_s18 = smov (!%p213_p2), 17  }
   0xb   : > { %s1138_s19 = smov (!%p213_p2), 19   ;;  %s1139_s20 = smov (!%p213_p2), 18  }
   0xc   : > { %s1141_s24 = smov (!%p213_p2), 127  }
   0xd   : > { %s1313_s22 = smov (!%p242_p3, %s990_s22), 1 }
   0xe   : > { %s1033_s23 = sshll.u32 %s1313_s22, 4 }
   0xf   : > { %s246_s26 = scalar_lea.vmem %s1305_s0, %s1033_s23  ;;  %s1140_s23 = smov 1  }
  0x10   : > { %v254_v0 = vld [vmem:[%s246_s26] sm:$0xff]  ;;  %v255_v2 = vld [vmem:[%s246_s26 + $0x8] sm:$0xff] }
  0x11   : > { %273 = vrot.lane.b32.xlu1 %v254_v0, %s1125_s27  ;;  %258 = vrot.lane.b32.xlu0 %v254_v0, %s1126_s28 }
  0x15   : > { %275 = vrot.lane.b32.xlu1 %v255_v2, %s1125_s27  ;;  %260 = vrot.lane.b32.xlu0 %v255_v2, %s1126_s28 }
  0x19   : > { %288 = vrot.lane.b32.xlu1 %v255_v2, %s1127_s29  ;;  %286 = vrot.lane.b32.xlu0 %v254_v0, %s1127_s29 }
  0x1d   : > { %301 = vrot.lane.b32.xlu1 %v255_v2, %s1128_s30  ;;  %299 = vrot.lane.b32.xlu0 %v254_v0, %s1128_s30 }
  0x21   : > { %314 = vrot.lane.b32.xlu1 %v255_v2, %s1129_s7  ;;  %312 = vrot.lane.b32.xlu0 %v254_v0, %s1129_s7 }
  0x25   : > { %327 = vrot.lane.b32.xlu1 %v255_v2, %s1130_s8  ;;  %325 = vrot.lane.b32.xlu0 %v254_v0, %s1130_s8 }
  0x29   : > { %340 = vrot.lane.b32.xlu1 %v255_v2, %s1131_s9  ;;  %338 = vrot.lane.b32.xlu0 %v254_v0, %s1131_s9 }
  0x2d   : > { %353 = vrot.lane.b32.xlu1 %v255_v2, %s1132_s10  ;;  %351 = vrot.lane.b32.xlu0 %v254_v0, %s1132_s10 }
  0x31   : > { %366 = vrot.lane.b32.xlu1 %v255_v2, %s1135_s11  ;;  %364 = vrot.lane.b32.xlu0 %v254_v0, %s1135_s11 }
  0x35   : > { %399 = vperm.xlu0 %1097, %v396_v4  }
  0x83   : > { %v274_v5 = vpop.permute.xlu1 %273  ;;  %v259_v6 = vpop.permute.xlu0 %258 }
  0x84   : > { %v277_v9 = vrot.slane %v274_v5, 4  ;;  %v262_v10 = vrot.slane %v259_v6, 4 }
  0x87   : > { %v276_v7 = vpop.permute.xlu1 %275  ;;  %v261_v8 = vpop.permute.xlu0 %260 }
  0x88   : > { %v278_v11 = vrot.slane %v276_v7, 4  ;;  %285 = vst.msk [vmem:[#allocation3 + $0x14] sm:$0xf] %vm271_vm4, %v276_v7  ;;  %v263_v12 = vrot.slane %v261_v8, 4  ;;  %272 = vst.msk [vmem:[#allocation3 + $0x8] sm:$0xf] %vm271_vm4, %v261_v8 }
  0x8a   : > { %v279_v13 = vsel %vm264_vm5, %v277_v9, %v278_v11  ;;  %v265_v14 = vsel %vm264_vm5, %v262_v10, %v263_v12  ;;  %v377_v12 = vld [vmem:[%s1306_s1] sm:$0x3] }
  0x8b   : > { %v281_v15 = vsel %vm280_vm6, %v274_v5, %v279_v13  ;;  %v267_v16 = vsel %vm266_vm7, %v259_v6, %v265_v14  ;;  %v289_v17 = vpop.permute.xlu1 %288  ;;  %v287_v18 = vpop.permute.xlu0 %286 }
  0x8c   : > { %v291_v19 = vrot.slane %v289_v17, 4  ;;  %298 = vst.msk [vmem:[#allocation3 + $0x20] sm:$0xf] %vm271_vm4, %v289_v17  ;;  %v290_v20 = vrot.slane %v287_v18, 4  ;;  %v999_v21 = vcombine.high %v267_v16, %v281_v15  ;;  %v998_v22 = vcombine.low %v267_v16, %v281_v15 }
  0x8d   : > { %v573_v15 = vlaneseq }
  0x8e   : > { %v292_v23 = vsel %vm264_vm5, %v290_v20, %v291_v19  ;;  %488 = vmatprep.subr.bf16.mxu0 %v999_v21  ;;  %v1136_v19 = vmov 1983009808  }
  0x8f   : > { %v294_v24 = vsel %vm293_vm8, %v287_v18, %v292_v23  ;;  %v302_v25 = vpop.permute.xlu1 %301  ;;  %v300_v26 = vpop.permute.xlu0 %299  ;;  %v1098_v27 = vld [vmem:[#allocation3 + $0x8] ss:$12 sps:$4 sm:$0xff]   ;;  %489 = vmatpush1.bf16.msra.mxu0 %v998_v22  ;;  %v574_v16 = vshrl.u32 %v573_v15, 7  ;;  %v604_v20 = vunpack.c.l.s4 %v1136_v19 }
  0x90   : > { %v304_v28 = vrot.slane %v302_v25, 4  ;;  %311 = vst.msk [vmem:[#allocation3 + $0x2c] sm:$0xf] %vm271_vm4, %v302_v25  ;;  %v303_v29 = vrot.slane %v300_v26, 4  ;;  %1047 = vmatpush3.bf16.msra.mxu1 %v1098_v27  ;;  %v253_v18 = vld [vmem:[%s1310_s5] sm:$0x7] }
  0x91   : > { %1048 = vmatprep.subr.bf16.mxu1 %v1124_v1  ;;  %v575_v17 = vsub.s32 0, %v574_v16  ;;  %v579_v22 = vsub.s32 1, %v574_v16  ;;  %v605_v27 = vunpack.c.0.s8 %v604_v20 }
  0x92   : > { %v305_v30 = vsel %vm264_vm5, %v303_v29, %v304_v28 }
  0x93   : > { %v307_v31 = vsel %vm306_vm9, %v300_v26, %v305_v30  ;;  %v315_v32 = vpop.permute.xlu1 %314  ;;  %v313_v33 = vpop.permute.xlu0 %312  ;;  %v1246_v25 = vrot.slane %v253_v18, %v575_v17  ;;  %v1248_v29 = vrot.slane %v253_v18, %v579_v22  ;;  %vm622_vm9 = vcmask 553988  }
  0x94   : > { %v317_v34 = vrot.slane %v315_v32, 4  ;;  %324 = vst.msk [vmem:[#allocation3 + $0x38] sm:$0xf] %vm271_vm4, %v315_v32  ;;  %v316_v35 = vrot.slane %v313_v33, 4  ;;  %v1002_v36 = vcombine.high %v294_v24, %v307_v31  ;;  %v1001_v37 = vcombine.low %v294_v24, %v307_v31 }
  0x95   : > { %v583_v24 = vsub.s32 2, %v574_v16 }
  0x96   : > { %v318_v38 = vsel %vm264_vm5, %v316_v35, %v317_v34  ;;  %490 = vmatprep.subr.bf16.mxu0 %v1002_v36 }
  0x97   : > { %v320_v39 = vsel %vm319_vm10, %v313_v33, %v318_v38  ;;  %v328_v40 = vpop.permute.xlu1 %327  ;;  %v326_v41 = vpop.permute.xlu0 %325  ;;  %v1099_v42 = vld [vmem:[#allocation3 + $0x20] ss:$12 sps:$4 sm:$0xff]   ;;  %491 = vmatpush1.bf16.msra.mxu0 %v1001_v37  ;;  %v1250_v35 = vrot.slane %v253_v18, %v583_v24 }
  0x98   : > { %v330_v43 = vrot.slane %v328_v40, 4  ;;  %337 = vst.msk [vmem:[#allocation3 + $0x44] sm:$0xf] %vm271_vm4, %v328_v40  ;;  %v329_v44 = vrot.slane %v326_v41, 4  ;;  %1049 = vmatpush3.bf16.msra.mxu1 %v1099_v42  ;;  %v608_v40 = vsub.s32 %v605_v27, %v574_v16 }
  0x99   : > { %1050 = vmatprep.subr.bf16.mxu1 %v1124_v1 }
  0x9a   : > { %v331_v45 = vsel %vm264_vm5, %v329_v44, %v330_v43 }
  0x9b   : > { %v333_v46 = vsel %vm332_vm11, %v326_v41, %v331_v45  ;;  %v341_v47 = vpop.permute.xlu1 %340  ;;  %v339_v48 = vpop.permute.xlu0 %338  ;;  %vm655_vm11 = vcmask 549888  }
  0x9c   : > { %v343_v49 = vrot.slane %v341_v47, 4  ;;  %350 = vst.msk [vmem:[#allocation3 + $0x50] sm:$0xf] %vm271_vm4, %v341_v47  ;;  %v342_v50 = vrot.slane %v339_v48, 4  ;;  %v1005_v51 = vcombine.high %v320_v39, %v333_v46  ;;  %v1004_v52 = vcombine.low %v320_v39, %v333_v46 }
  0x9e   : > { %v344_v53 = vsel %vm264_vm5, %v342_v50, %v343_v49  ;;  %492 = vmatprep.subr.bf16.mxu0 %v1005_v51 }
  0x9f   : > { %v346_v54 = vsel %vm345_vm12, %v339_v48, %v344_v53  ;;  %v354_v55 = vpop.permute.xlu1 %353  ;;  %v352_v56 = vpop.permute.xlu0 %351  ;;  %v1100_v57 = vld [vmem:[#allocation3 + $0x38] ss:$12 sps:$4 sm:$0xff]   ;;  %493 = vmatpush1.bf16.msra.mxu0 %v1004_v52  ;;  %vm672_vm12 = vcmask 146432  }
  0xa0   : > { %v356_v58 = vrot.slane %v354_v55, 4  ;;  %363 = vst.msk [vmem:[#allocation3 + $0x5c] sm:$0xf] %vm271_vm4, %v354_v55  ;;  %v355_v59 = vrot.slane %v352_v56, 4  ;;  %1051 = vmatpush3.bf16.msra.mxu1 %v1100_v57 }
  0xa1   : > { %1052 = vmatprep.subr.bf16.mxu1 %v1124_v1 }
  0xa2   : > { %v357_v60 = vsel %vm264_vm5, %v355_v59, %v356_v58  ;;  %v774_v59 = vld [vmem:[%s1309_s4] sm:$0xff] }
  0xa3   : > { %v359_v61 = vsel %vm358_vm13, %v352_v56, %v357_v60  ;;  %v367_v62 = vpop.permute.xlu1 %366  ;;  %v365_v63 = vpop.permute.xlu0 %364  ;;  %vm700_vm13 = vcmask 7168  }
  0xa4   : > { %v369_v0 = vrot.slane %v367_v62, 4  ;;  %376 = vst.msk [vmem:[#allocation3 + $0x68] sm:$0xf] %vm271_vm4, %v367_v62  ;;  %v368_v2 = vrot.slane %v365_v63, 4  ;;  %v1008_v4 = vcombine.high %v346_v54, %v359_v61  ;;  %v1007_v5 = vcombine.low %v346_v54, %v359_v61 }
  0xa6   : > { %v370_v6 = vsel %vm264_vm5, %v368_v2, %v369_v0  ;;  %494 = vmatprep.subr.bf16.mxu0 %v1008_v4 }
  0xa7   : > { %v372_v7 = vsel %vm371_vm14, %v365_v63, %v370_v6  ;;  %v1101_v8 = vld [vmem:[#allocation3 + $0x50] ss:$12 sps:$4 sm:$0xff]   ;;  %495 = vmatpush1.bf16.msra.mxu0 %v1007_v5  ;;  %vm721_vm14 = vcmask 1039360  }
  0xa8   : > { %v1011_v9 = vcombine.high %v372_v7, %v372_v7  ;;  %v1010_v10 = vcombine.low %v372_v7, %v372_v7  ;;  %1053 = vmatpush3.bf16.msra.mxu1 %v1101_v8 }
  0xa9   : > { %1054 = vmatprep.subr.bf16.mxu1 %v1124_v1 }
  0xaa   : > { %1013 = vmatprep.subr.msk.bf16.mxu0 %vm264_vm5, %v1011_v9  ;;  %v480_v11 = vsel %vm264_vm5, %v1010_v10, 0 }
  0xab   : > { %v1102_v13 = vld [vmem:[#allocation3 + $0x68] ss:$0 sps:$4 sm:$0xff]   ;;  %497 = vmatpush1.bf16.msra.mxu0 %v480_v11 }
  0xac   : > { %v486_v14 = vsel %vm264_vm5, %v1102_v13, 0 }
  0xad   : > { %1055 = vmatpush3.bf16.msra.mxu1 %v486_v14 }
  0xae   : > { %1014 = vmatmul.mubr.msk.bf16.vlgmr.msra.gmra.mrb[0].mxu0 %vm474_vm15, %v377_v12  ;;  %1060 = vmatprep.subr.bf16.mxu1 %v1124_v1 }
  0xaf   : > { %865 = vmatprep.mubr.bf16.mxu0 %v1133_v3 }
  0xb0   : > { %1057 = vmatmul.mubr.msk.bf16.vlgmr.msra.gmra.mrb[0].mxu1 %vm474_vm15, %v377_v12  ;;  %vm649_vm15 = vcmask 154624  }
  0xb1   : > { %1066 = vmatprep.mubr.msk.bf16.mxu1 %vm1134_vm0, %v1124_v1  ;;  %vm619_vm0 = vcmask 1041408  }
  0xb2   : > { %vm621_vm3 = vmor %vm620_vm1, %vm619_vm0  ;;  %vm686_vm1 = vcmask 138240  }
  0xb3   : > { %vm623_vm10 = vmor %vm622_vm9, %vm621_vm3 }
  0xb4   : > { %v400_v21 = vpop.permute.xlu0 %399 }
 0x181   : > { %v522_v23 = vpop.f32.mrb[0].mxu0 }
 0x182   : > { %v523_v3 = vadd.f32 %v522_v23, %v400_v21  ;;  %v524_v26 = vpop.f32.mrb[1].mxu0 }
 0x183   : > { %v525_v28 = vadd.f32 %v524_v26, %v400_v21  ;;  %v526_v30 = vpop.f32.mrb[2].mxu0  ;;  %v563_v31 = vpop.f32.mrb[0].mxu1 }
 0x184   : > { %v569_v32 = vmax.f32 %v523_v3, 0.0  ;;  %v527_v33 = vpop.f32.mrb[3].mxu0  ;;  %v1058_v34 = vpop.f32.mrb[1].mxu1  ;;  %v564_v36 = vadd.f32 %v563_v31, %v400_v21 }
 0x185   : > { %v570_v37 = vmax.f32 %v525_v28, 0.0  ;;  %v566_v38 = vpop.f32.mrb[2].mxu1 }
 0x186   : > { %v588_v39 = vmul.f32 %v1246_v25, %v569_v32  ;;  %v571_v41 = vmax.f32 %v564_v36, 0.0  ;;  %v1059_v43 = vpop.f32.mrb[3].mxu1 }
 0x187   : > { %v589_v42 = vmul.f32 %v1248_v29, %v570_v37 }
 0x188   : > { %v590_v44 = vmul.f32 %v1250_v35, %v571_v41 }
 0x189   : > { %v1016_v45 = vpack.c.bf16 %v589_v42, %v588_v39 }
 0x18a   : > { %v598_v46 = vpack.c.bf16 %v590_v44, %v590_v44 }
 0x18b   : > { %v609_v47 = vrot.slane %v1016_v45, %v608_v40 }
 0x18c   : > { %v616_v48 = vrot.slane %v598_v46, %v608_v40 }
 0x18e   : > { %v617_v49 = vcombine.low %v609_v47, %v616_v48 }
 0x190   : > { %624 = vst.msk [vmem:[#allocation2 + $0x2] sm:$0x3f] %vm623_vm10, %v617_v49 }
 0x197   : > { %v625_v50 = vld [vmem:[#allocation2] sm:$0xff] }
 0x198   : > { %v634_v51 = vrot.slane %v625_v50, %v608_v40  ;;  %v627_v52 = vcombine.high %v625_v50, %v625_v50  ;;  %v657_v54 = vcombine.low %v625_v50, %v625_v50 }
 0x19a   : > { %679 = vrot.lane.b32.xlu0 %v634_v51, %s1137_s18  ;;  %642 = vrot.lane.b32.xlu1 %v634_v51, %s1138_s19  ;;  %v641_v53 = vrot.slane %v627_v52, %v608_v40  ;;  %v707_v55 = vrot.slane %v634_v51, 4  ;;  %v664_v58 = vrot.slane %v657_v54, %v608_v40 }
 0x19c   : > { %v708_v56 = vrot.slane %v641_v53, 4 }
 0x19e   : > { %727 = vrot.lane.b32.xlu0 %v634_v51, %s1126_s28  ;;  %667 = vrot.lane.b32.xlu1 %v634_v51, %s1139_s20  ;;  %v709_v57 = vsel %vm264_vm5, %v707_v55, %v708_v56  ;;  %713 = vst.msk [vmem:[#allocation4 + $0x20] sm:$0x3] %vm655_vm11, %v708_v56 }
 0x19f   : > { %712 = vst [vmem:[#allocation4 + $0x18] sm:$0x33] %v709_v57 }
 0x1a2   : > { %665 = vrot.lane.b32.xlu0 %v664_v58, %s1139_s20  ;;  %695 = vrot.lane.b32.xlu1 %v634_v51, %s1140_s23 }
 0x1a6   : > { %693 = vrot.lane.b32.xlu0 %v664_v58, %s1140_s23  ;;  %716 = vrot.lane.b32.xlu1 %v634_v51, %s1141_s24 }
 0x1aa   : > { %714 = vrot.lane.b32.xlu0 %v664_v58, %s1141_s24  ;;  %741 = vrot.lane.b32.xlu1 %v634_v51, %s1125_s27 }
 0x1ae   : > { %739 = vrot.lane.b32.xlu0 %v664_v58, %s1125_s27  ;;  %644 = vrot.lane.b32.xlu1 %v641_v53, %s1138_s19 }
 0x1b2   : > { %751 = vrot.lane.b32.xlu0 %v634_v51, %s1127_s29  ;;  %681 = vrot.lane.b32.xlu1 %v641_v53, %s1137_s18 }
 0x1b6   : > { %777 = vperm.xlu0 %1097, %v774_v59   ;;  %729 = vrot.lane.b32.xlu1 %v641_v53, %s1126_s28 }
 0x1ba   : > { %753 = vrot.lane.b32.xlu1 %v641_v53, %s1127_s29  ;;  %s1070_s29 = smul.u32 12, %s1313_s22 }
 0x1bc   : > { %s251_s8 = scalar_lea.vmem %s1311_s6, %s1070_s29 }
 0x20c   : > { %v680_v60 = vpop.permute.xlu0 %679  ;;  %v643_v61 = vpop.permute.xlu1 %642 }
 0x20d   : > { %v646_v3 = vrot.slane %v643_v61, 4  ;;  %v683_v36 = vrot.slane %v680_v60, 4 }
 0x210   : > { %v728_v62 = vpop.permute.xlu0 %727  ;;  %v668_v63 = vpop.permute.xlu1 %667 }
 0x211   : > { %v670_v0 = vrot.slane %v668_v63, 4  ;;  %v731_v42 = vrot.slane %v728_v62, 4 }
 0x213   : > { %v674_v2 = vsel %vm672_vm12, %v668_v63, %v670_v0  ;;  %v763_v63 = vld [vmem:[%s1308_s3] sm:$0xf] }
 0x214   : > { %678 = vst.msk [vmem:[#allocation4 + $0x8] sm:$0xc] %vm593_vm2, %v674_v2  ;;  %v666_v4 = vpop.permute.xlu0 %665  ;;  %v696_v5 = vpop.permute.xlu1 %695 }
 0x215   : > { %v669_v6 = vrot.slane %v666_v4, 4  ;;  %v698_v7 = vrot.slane %v696_v5, 4 }
 0x217   : > { %v671_v8 = vsel %vm264_vm5, %v669_v6, %v670_v0  ;;  %v702_v9 = vsel %vm700_vm13, %v696_v5, %v698_v7 }
 0x218   : > { %v673_v10 = vsel %vm672_vm12, %v666_v4, %v671_v8  ;;  %706 = vst.msk [vmem:[#allocation4 + $0x14] sm:$0xc] %vm593_vm2, %v702_v9  ;;  %v694_v11 = vpop.permute.xlu0 %693  ;;  %v717_v12 = vpop.permute.xlu1 %716 }
 0x219   : > { %677 = vst [vmem:[#allocation4] sm:$0xcc] %v673_v10  ;;  %v697_v13 = vrot.slane %v694_v11, 4  ;;  %v719_v14 = vrot.slane %v717_v12, 4 }
 0x21b   : > { %v699_v15 = vsel %vm264_vm5, %v697_v13, %v698_v7  ;;  %726 = vst.msk [vmem:[#allocation4 + $0x20] sm:$0xc] %vm593_vm2, %v719_v14 }
 0x21c   : > { %v701_v16 = vsel %vm700_vm13, %v694_v11, %v699_v15  ;;  %v715_v17 = vpop.permute.xlu0 %714  ;;  %v742_v18 = vpop.permute.xlu1 %741 }
 0x21d   : > { %705 = vst [vmem:[#allocation4 + $0xc] sm:$0xcc] %v701_v16  ;;  %v718_v19 = vrot.slane %v715_v17, 4  ;;  %v744_v20 = vrot.slane %v742_v18, 4 }
 0x21f   : > { %v720_v21 = vsel %vm264_vm5, %v718_v19, %v719_v14  ;;  %750 = vst.msk [vmem:[#allocation4 + $0x2c] sm:$0xc] %vm593_vm2, %v744_v20  ;;  %vm820_vm2 = vcmask 293888  }
 0x220   : > { %v722_v22 = vsel %vm721_vm14, %v720_v21, %v717_v12  ;;  %v740_v23 = vpop.permute.xlu0 %739  ;;  %v645_v24 = vpop.permute.xlu1 %644 }
 0x221   : > { %725 = vst [vmem:[#allocation4 + $0x18] sm:$0xcc] %v722_v22  ;;  %v743_v26 = vrot.slane %v740_v23, 4  ;;  %v647_v27 = vrot.slane %v645_v24, 4 }
 0x223   : > { %v745_v28 = vsel %vm264_vm5, %v743_v26, %v744_v20  ;;  %v648_v30 = vsel %vm264_vm5, %v646_v3, %v647_v27  ;;  %v651_v31 = vsel %vm649_vm15, %v645_v24, %v647_v27 }
 0x224   : > { %v746_v32 = vsel %vm280_vm6, %v745_v28, %v742_v18  ;;  %v650_v33 = vsel %vm649_vm15, %v643_v61, %v648_v30  ;;  %656 = vst.msk [vmem:[#allocation4 + $0x8] sm:$0x3] %vm655_vm11, %v651_v31  ;;  %v682_v34 = vpop.permute.xlu1 %681  ;;  %v752_v44 = vpop.permute.xlu0 %751 }
 0x225   : > { %749 = vst [vmem:[#allocation4 + $0x24] sm:$0xcc] %v746_v32  ;;  %654 = vst [vmem:[#allocation4] sm:$0x33] %v650_v33  ;;  %v684_v37 = vrot.slane %v682_v34, 4  ;;  %v755_v48 = vrot.slane %v752_v44, 4 }
 0x227   : > { %v685_v38 = vsel %vm264_vm5, %v683_v36, %v684_v37  ;;  %v688_v39 = vsel %vm686_vm1, %v682_v34, %v684_v37 }
 0x228   : > { %v687_v40 = vsel %vm686_vm1, %v680_v60, %v685_v38  ;;  %692 = vst.msk [vmem:[#allocation4 + $0x14] sm:$0x3] %vm655_vm11, %v688_v39  ;;  %v730_v41 = vpop.permute.xlu1 %729 }
 0x229   : > { %691 = vst [vmem:[#allocation4 + $0xc] sm:$0x33] %v687_v40  ;;  %v732_v43 = vrot.slane %v730_v41, 4 }
 0x22b   : > { %v733_v45 = vsel %vm264_vm5, %v731_v42, %v732_v43  ;;  %738 = vst.msk [vmem:[#allocation4 + $0x2c] sm:$0x3] %vm655_vm11, %v732_v43 }
 0x22c   : > { %v734_v46 = vsel %vm266_vm7, %v733_v45, %v730_v41  ;;  %v754_v47 = vpop.permute.xlu1 %753 }
 0x22d   : > { %737 = vst [vmem:[#allocation4 + $0x24] sm:$0x33] %v734_v46  ;;  %v756_v49 = vrot.slane %v754_v47, 4 }
 0x22f   : > { %v757_v50 = vsel %vm264_vm5, %v755_v48, %v756_v49  ;;  %762 = vst.msk [vmem:[#allocation4 + $0x38] sm:$0x3] %vm655_vm11, %v756_v49  ;;  %v1105_v51 = vld [vmem:[#allocation4 + $0x8] ss:$12 sps:$4 sm:$0xff]  }
 0x230   : > { %v758_v52 = vsel %vm293_vm8, %v757_v50, %v754_v47  ;;  %v1106_v53 = vld [vmem:[#allocation4] ss:$12 sps:$4 sm:$0xff]   ;;  %v1108_v54 = vld [vmem:[#allocation4 + $0x4] ss:$12 sps:$4 sm:$0xff]   ;;  %1061 = vmatpush3.bf16.msra.mxu1 %v1105_v51 }
 0x231   : > { %761 = vst [vmem:[#allocation4 + $0x30] sm:$0x33] %v758_v52  ;;  %833 = vmatprep.subr.bf16.mxu0 %v1108_v54  ;;  %1062 = vmatprep.subr.bf16.mxu1 %v1124_v1 }
 0x232   : > { %v1109_v55 = vld [vmem:[#allocation4 + $0x20] ss:$12 sps:$4 sm:$0xff]   ;;  %834 = vmatpush1.bf16.msra.mxu0 %v1106_v53 }
 0x234   : > { %v1110_v56 = vld [vmem:[#allocation4 + $0x18] ss:$12 sps:$4 sm:$0xff]   ;;  %v1112_v57 = vld [vmem:[#allocation4 + $0x1c] ss:$12 sps:$4 sm:$0xff]   ;;  %1063 = vmatpush3.bf16.msra.mxu1 %v1109_v55 }
 0x235   : > { %835 = vmatprep.subr.bf16.mxu0 %v1112_v57  ;;  %1064 = vmatprep.subr.bf16.mxu1 %v1124_v1  ;;  %v778_v1 = vpop.permute.xlu0 %777 }
 0x236   : > { %v1113_v58 = vld [vmem:[#allocation4 + $0x38] ss:$0 sps:$4 sm:$0x33]   ;;  %836 = vmatpush1.bf16.msra.mxu0 %v1110_v56 }
 0x237   : > { %v831_v59 = vsel %vm619_vm0, %v1113_v58, 0 }
 0x238   : > { %v772_v60 = vld [vmem:[#allocation4 + $0x30] sm:$0x33]  ;;  %1065 = vmatpush3.bf16.msra.mxu1 %v831_v59 }
 0x239   : > { %v1024_v61 = vcombine.high %v772_v60, %v772_v60  ;;  %v1023_v62 = vcombine.low %v772_v60, %v772_v60 }
 0x23b   : > { %1026 = vmatprep.subr.msk.bf16.mxu0 %vm619_vm0, %v1024_v61  ;;  %v825_v0 = vsel %vm619_vm0, %v1023_v62, 0  ;;  %1067 = vmatmul.mubr.msk.bf16.vlgmr.msra.gmra.mrb[4].mxu1 %vm820_vm2, %v763_v63 }
 0x23c   : > { %838 = vmatpush1.bf16.msra.mxu0 %v825_v0 }
 0x23f   : > { %1027 = vmatmul.mubr.msk.bf16.vlgmr.msra.gmra.mrb[4].mxu0 %vm820_vm2, %v763_v63 }
 0x30e   : > { %v908_v2 = vpop.f32.mrb[4].mxu1 }
 0x30f   : > { %v909_v4 = vadd.f32 %v908_v2, %v778_v1  ;;  %v1068_v5 = vpop.f32.mrb[5].mxu1 }
 0x310   : > { %v911_v6 = vpop.f32.mrb[6].mxu1 }
 0x311   : > { %v916_v7 = vmax.f32 %v909_v4, 0.0  ;;  %v1069_v9 = vpop.f32.mrb[7].mxu1 }
 0x312   : > { %v867_v8 = vpop.f32.mrb[4].mxu0 }
 0x313   : > { %v868_v10 = vadd.f32 %v867_v8, %v778_v1  ;;  %v869_v11 = vpop.f32.mrb[5].mxu0  ;;  %v919_v12 = vmul.f32 %v916_v7, %v1250_v35 }
 0x314   : > { %v870_v13 = vadd.f32 %v869_v11, %v778_v1  ;;  %v871_v14 = vpop.f32.mrb[6].mxu0 }
 0x315   : > { %v914_v15 = vmax.f32 %v868_v10, 0.0  ;;  %v872_v16 = vpop.f32.mrb[7].mxu0  ;;  %v1035_v17 = vpack.c.bf16 %v919_v12, %v919_v12 }
 0x316   : > { %v915_v18 = vmax.f32 %v870_v13, 0.0 }
 0x317   : > { %v917_v19 = vmul.f32 %v914_v15, %v1246_v25  ;;  %934 = vst.msk [vmem:[%s251_s8 + $0x8] sm:$0xf] %vm271_vm4, %v1035_v17 }
 0x318   : > { %v918_v20 = vmul.f32 %v915_v18, %v1248_v29 }
 0x31a   : > { %v1034_v21 = vpack.c.bf16 %v918_v20, %v917_v19 }
 0x31c   : > { %933 = vst [vmem:[%s251_s8] sm:$0xff] %v1034_v21 }
 0x31d PF: > { %s16_s21 = sadd.s32 1, %s1122_s21  }
 0x31e   : > { %p13_p4 = scmp.ge.s32.totalorder %s16_s21, 4  }
 0x320   :  { %15 = sbr.rel (!%p13_p4) target bundleno = 1 (0x1), region = 74 }

// kernel: multi_up_pallas.6
= control target key start
LH: loop header
LB: loop body
LE: loop exit
PB: predicated region body
PF: predicated region fallthrough
CT: control target
= control target key end

     0   :  { %s1445_s12 = smov 0   ;;  %s1866_s0 = inlined_call_operand.vmem [shape: bf16[2,144,18], index: 0, kind: input, shape index: {}]   ;;  %s1867_s1 = inlined_call_operand.vmem [shape: f32[18,34], index: 1, kind: input, shape index: {}]   ;;  %s1868_s2 = inlined_call_operand.vmem [shape: f32[304,144], index: 2, kind: input, shape index: {}]   ;;  %s1869_s3 = inlined_call_operand.vmem [shape: bf16[2,304,34], index: 3, kind: output, shape index: {}]  }
   0x1 LB: > { %s1116_s13 = sadd.s32 4294967295, %s1422_s12   ;;  %p1120_p0 = scmp.ge.s32.totalorder %s1422_s12, 1  ;;  %s1422_s12 = sphi %s1445_s12, %s13_s12  }
   0x2   : > { %p137_p1 = scmp.lt.s32.totalorder %s1422_s12, 3 }
   0x4   : > { %p138_p2 = pnand %p1120_p0, %p137_p1 }
   0x5   : > { %v207_v0 = vld [vmem:[%s1867_s1] sm:$0xff] (!%p138_p2)  ;;  %v208_v1 = vld [vmem:[%s1867_s1 + $0x8] sm:$0xff] (!%p138_p2)  ;;  %p161_p3 = scmp.lt.s32.totalorder (!%p138_p2), %s1116_s13, 1  ;;  %v209_v3 = vld [vmem:[%s1867_s1 + $0x10] sm:$0x3] (!%p138_p2)  ;;  %vm265_vm0 = vcmask (!%p138_p2), 1041408  }
   0x6   : > { %141 = sbr.rel (%p138_p2) target bundleno = 562 (0x232), region = 32  ;;  %v1356_v2 = vpack.c.bf16 (!%p138_p2), %v208_v1, %v207_v0  ;;  %vm210_vm1 = vcmask (!%p138_p2), 146432   ;;  %v1424_v31 = vmov (!%p138_p2), 0.0|0.0   ;;  %v461_v32 = vld [vmem:[%s1868_s2 + $0x128] sm:$0xff] (!%p138_p2)  ;;  %vm500_vm2 = vcmask (!%p138_p2), 130048   ;;  %v460_v61 = vld [vmem:[%s1868_s2 + $0x120] sm:$0xff] (!%p138_p2) }
   0x7   : > { %1387 = vmatprep.subr.bf16.mxu1 (!%p138_p2), %v1424_v31  ;;  %1160 = vmatprep.mubr.msk.f32.mxu1 (!%p138_p2), %vm500_vm2, %v461_v32  ;;  %v425_v33 = vld [vmem:[%s1868_s2 + $0x8] sm:$0xff] (!%p138_p2)  ;;  %v424_v62 = vld [vmem:[%s1868_s2] sm:$0xff] (!%p138_p2)  ;;  %v463_v63 = vld [vmem:[%s1868_s2 + $0x138] sm:$0xff] (!%p138_p2)  ;;  %vm1022_vm3 = vcmask (!%p138_p2), 273408  }
   0x8   : > { %1357 = vmatprep.subr.bf16.mxu0 (!%p138_p2), %v1356_v2  ;;  %v427_v0 = vld [vmem:[%s1868_s2 + $0x18] sm:$0xff] (!%p138_p2)  ;;  %v462_v1 = vld [vmem:[%s1868_s2 + $0x130] sm:$0xff] (!%p138_p2) }
   0x9   : > { %1359 = vmatpush3.bf16.msra.mxu0 (!%p138_p2), %v1356_v2  ;;  %v426_v2 = vld [vmem:[%s1868_s2 + $0x10] sm:$0xff] (!%p138_p2)  ;;  %v443_v32 = vld [vmem:[%s1868_s2 + $0x98] sm:$0xff] (!%p138_p2) }
   0xa   : > { %1327 = vmatprep.subr.msk.mxu0 (!%p138_p2), %vm265_vm0, %v209_v3 }
   0xd   : > { %s1871_s13 = smov (!%p161_p3, %s1116_s13), 1  ;;  %1328 = vmatpush3.msk.msra.mxu0 %vm265_vm0, %v209_v3  ;;  %v465_v3 = vld [vmem:[%s1868_s2 + $0x148] sm:$0xff] }
   0xe   : > { %s1405_s20 = smul.u32 72, %s1871_s13  ;;  %1360 = vmatprep.subr.bf16.mxu0 %v1424_v31 }
   0xf   : > { %s1406_s26 = smul.u32 152, %s1871_s13 }
  0x10   : > { %s1468_s23 = scalar_lea.vmem %s1866_s0, %s1405_s20 }
  0x11   : > { %v1259_v4 = vld [vmem:[%s1468_s23] sm:$0xff]   ;;  %v1294_v5 = vld [vmem:[%s1468_s23 + $0x8] sm:$0xff]   ;;  %v1295_v9 = vld [vmem:[%s1468_s23 + $0x10] sm:$0xff]   ;;  %s1785_s29 = scalar_lea.vmem %s1869_s3, %s1406_s26 }
  0x12   : > { %v1260_v6 = vunpack.c.l.bf16 %v1259_v4  ;;  %v1261_v7 = vunpack.c.h.bf16 %v1259_v4  ;;  %v1264_v8 = vunpack.c.l.bf16 %v1294_v5  ;;  %v1265_v10 = vunpack.c.h.bf16 %v1294_v5  ;;  %v1296_v12 = vld [vmem:[%s1468_s23 + $0x18] sm:$0xff]   ;;  %v1297_v15 = vld [vmem:[%s1468_s23 + $0x20] sm:$0xff]   ;;  %v1298_v18 = vld [vmem:[%s1468_s23 + $0x28] sm:$0xff]  }
  0x13   : > { %v1268_v11 = vunpack.c.l.bf16 %v1295_v9  ;;  %v1269_v13 = vunpack.c.h.bf16 %v1295_v9  ;;  %v1272_v14 = vunpack.c.l.bf16 %v1296_v12  ;;  %v1273_v16 = vunpack.c.h.bf16 %v1296_v12  ;;  %v1299_v21 = vld [vmem:[%s1468_s23 + $0x30] sm:$0xff]   ;;  %v1300_v24 = vld [vmem:[%s1468_s23 + $0x38] sm:$0xff]   ;;  %v1301_v27 = vld [vmem:[%s1468_s23 + $0x40] sm:$0xff]  }
  0x14   : > { %1329 = vmatprep.mubr.msk.f32.mxu0 %vm210_vm1, %v1260_v6  ;;  %v1276_v17 = vunpack.c.l.bf16 %v1297_v15  ;;  %v1277_v19 = vunpack.c.h.bf16 %v1297_v15  ;;  %v1280_v20 = vunpack.c.l.bf16 %v1298_v18  ;;  %v1281_v22 = vunpack.c.h.bf16 %v1298_v18  ;;  %v429_v4 = vld [vmem:[%s1868_s2 + $0x28] sm:$0xff]  ;;  %v464_v5 = vld [vmem:[%s1868_s2 + $0x140] sm:$0xff]  ;;  %v466_v9 = vld [vmem:[%s1868_s2 + $0x150] sm:$0xff] }
  0x15   : > { %1330 = vmatmul.mubr.msk.f32.vlgmr.msra.gmra.mrb[0].mxu0 %vm210_vm1, %v1261_v7  ;;  %v1284_v23 = vunpack.c.l.bf16 %v1299_v21  ;;  %v1285_v25 = vunpack.c.h.bf16 %v1299_v21  ;;  %v1288_v26 = vunpack.c.l.bf16 %v1300_v24  ;;  %v1289_v28 = vunpack.c.h.bf16 %v1300_v24  ;;  %v428_v6 = vld [vmem:[%s1868_s2 + $0x20] sm:$0xff]  ;;  %v467_v7 = vld [vmem:[%s1868_s2 + $0x158] sm:$0xff]  ;;  %v433_v12 = vld [vmem:[%s1868_s2 + $0x48] sm:$0xff] }
  0x16   : > { %1332 = vmatprep.mubr.msk.f32.mxu0 %vm210_vm1, %v1264_v8  ;;  %v1292_v29 = vunpack.c.l.bf16 %v1301_v27  ;;  %v1293_v30 = vunpack.c.h.bf16 %v1301_v27  ;;  %v431_v8 = vld [vmem:[%s1868_s2 + $0x38] sm:$0xff]  ;;  %v434_v18 = vld [vmem:[%s1868_s2 + $0x50] sm:$0xff]  ;;  %v472_v21 = vld [vmem:[%s1868_s2 + $0x180] sm:$0xff] }
  0x17   : > { %v471_v15 = vld [vmem:[%s1868_s2 + $0x178] sm:$0xff]  ;;  %v477_v27 = vld [vmem:[%s1868_s2 + $0x1a8] sm:$0xff] }
  0x18   : > { %v439_v24 = vld [vmem:[%s1868_s2 + $0x78] sm:$0xff] }
  0x19   : > { %1333 = vmatmul.mubr.msk.f32.gmra.mrb[2].mxu0 %vm210_vm1, %v1265_v10  ;;  %v430_v10 = vld [vmem:[%s1868_s2 + $0x30] sm:$0xff] }
  0x1a   : > { %1335 = vmatprep.mubr.msk.f32.mxu0 %vm210_vm1, %v1268_v11  ;;  %v469_v11 = vld [vmem:[%s1868_s2 + $0x168] sm:$0xff] }
  0x1d   : > { %1336 = vmatmul.mubr.msk.f32.gmra.mrb[4].mxu0 %vm210_vm1, %v1269_v13  ;;  %v468_v13 = vld [vmem:[%s1868_s2 + $0x160] sm:$0xff] }
  0x1e   : > { %1338 = vmatprep.mubr.msk.f32.mxu0 %vm210_vm1, %v1272_v14  ;;  %v432_v14 = vld [vmem:[%s1868_s2 + $0x40] sm:$0xff] }
  0x21   : > { %1339 = vmatmul.mubr.msk.f32.gmra.mrb[6].mxu0 %vm210_vm1, %v1273_v16  ;;  %v435_v16 = vld [vmem:[%s1868_s2 + $0x58] sm:$0xff] }
  0x22   : > { %1341 = vmatprep.mubr.msk.f32.mxu0 %vm210_vm1, %v1276_v17  ;;  %v470_v17 = vld [vmem:[%s1868_s2 + $0x170] sm:$0xff] }
  0x25   : > { %1342 = vmatmul.mubr.msk.f32.gmra.mrb[8].mxu0 %vm210_vm1, %v1277_v19  ;;  %v473_v19 = vld [vmem:[%s1868_s2 + $0x188] sm:$0xff] }
  0x26   : > { %1344 = vmatprep.mubr.msk.f32.mxu0 %vm210_vm1, %v1280_v20  ;;  %v437_v20 = vld [vmem:[%s1868_s2 + $0x68] sm:$0xff] }
  0x29   : > { %1345 = vmatmul.mubr.msk.f32.gmra.mrb[10].mxu0 %vm210_vm1, %v1281_v22  ;;  %v436_v22 = vld [vmem:[%s1868_s2 + $0x60] sm:$0xff] }
  0x2a   : > { %1347 = vmatprep.mubr.msk.f32.mxu0 %vm210_vm1, %v1284_v23  ;;  %v475_v23 = vld [vmem:[%s1868_s2 + $0x198] sm:$0xff] }
  0x2d   : > { %1348 = vmatmul.mubr.msk.f32.gmra.mrb[12].mxu0 %vm210_vm1, %v1285_v25  ;;  %v474_v25 = vld [vmem:[%s1868_s2 + $0x190] sm:$0xff] }
  0x2e   : > { %1350 = vmatprep.mubr.msk.f32.mxu0 %vm210_vm1, %v1288_v26  ;;  %v438_v26 = vld [vmem:[%s1868_s2 + $0x70] sm:$0xff] }
  0x31   : > { %1351 = vmatmul.mubr.msk.f32.gmra.mrb[14].mxu0 %vm210_vm1, %v1289_v28  ;;  %v441_v28 = vld [vmem:[%s1868_s2 + $0x88] sm:$0xff] }
  0x32   : > { %1353 = vmatprep.mubr.msk.f32.mxu0 %vm210_vm1, %v1292_v29  ;;  %v476_v29 = vld [vmem:[%s1868_s2 + $0x1a0] sm:$0xff] }
  0x35   : > { %1354 = vmatmul.mubr.msk.f32.gmra.mrb[16].mxu0 %vm210_vm1, %v1293_v30  ;;  %v440_v30 = vld [vmem:[%s1868_s2 + $0x80] sm:$0xff] }
  0x36   : > { %1142 = vmatprep.mubr.msk.f32.mxu0 %vm500_vm2, %v425_v33  ;;  %v478_v33 = vld [vmem:[%s1868_s2 + $0x1b0] sm:$0xff] }
  0xe8   : > { %v1331_v34 = vpop.f32.mrb[0].mxu0 }
  0xe9   : > { %v335_v35 = vpop.f32.mrb[1].mxu0 }
  0xea   : > { %v1361_v36 = vpack.c.bf16 %v1331_v34, %v335_v35  ;;  %v442_v34 = vld [vmem:[%s1868_s2 + $0x90] sm:$0xff]  ;;  %v481_v35 = vld [vmem:[%s1868_s2 + $0x1c8] sm:$0xff] }
  0xec   : > { %v1334_v37 = vpop.f32.mrb[2].mxu0  ;;  %1362 = vmatpush1.bf16.msra.mxu0 %v1361_v36  ;;  %1396 = vmatpush1.bf16.msra.mxu1 %v1361_v36  ;;  %v445_v36 = vld [vmem:[%s1868_s2 + $0xa8] sm:$0xff] }
  0xed   : > { %v345_v38 = vpop.f32.mrb[3].mxu0  ;;  %1363 = vmatprep.subr.bf16.mxu0 %v1424_v31  ;;  %1388 = vmatprep.subr.bf16.mxu1 %v1424_v31 }
  0xee   : > { %v1364_v39 = vpack.c.bf16 %v1334_v37, %v345_v38  ;;  %v480_v37 = vld [vmem:[%s1868_s2 + $0x1c0] sm:$0xff] }
  0xef   : > { %v444_v38 = vld [vmem:[%s1868_s2 + $0xa0] sm:$0xff] }
  0xf0   : > { %v1337_v40 = vpop.f32.mrb[4].mxu0  ;;  %1365 = vmatpush1.bf16.msra.mxu0 %v1364_v39  ;;  %1397 = vmatpush1.bf16.msra.mxu1 %v1364_v39  ;;  %v483_v39 = vld [vmem:[%s1868_s2 + $0x1d8] sm:$0xff] }
  0xf1   : > { %v355_v41 = vpop.f32.mrb[5].mxu0  ;;  %1366 = vmatprep.subr.bf16.mxu0 %v1424_v31  ;;  %1389 = vmatprep.subr.bf16.mxu1 %v1424_v31 }
  0xf2   : > { %v1367_v42 = vpack.c.bf16 %v1337_v40, %v355_v41  ;;  %v447_v40 = vld [vmem:[%s1868_s2 + $0xb8] sm:$0xff]  ;;  %v482_v41 = vld [vmem:[%s1868_s2 + $0x1d0] sm:$0xff] }
  0xf4   : > { %v1340_v43 = vpop.f32.mrb[6].mxu0  ;;  %1368 = vmatpush1.bf16.msra.mxu0 %v1367_v42  ;;  %1398 = vmatpush1.bf16.msra.mxu1 %v1367_v42  ;;  %v446_v42 = vld [vmem:[%s1868_s2 + $0xb0] sm:$0xff] }
  0xf5   : > { %v365_v44 = vpop.f32.mrb[7].mxu0  ;;  %1369 = vmatprep.subr.bf16.mxu0 %v1424_v31  ;;  %1390 = vmatprep.subr.bf16.mxu1 %v1424_v31 }
  0xf6   : > { %v1370_v45 = vpack.c.bf16 %v1340_v43, %v365_v44  ;;  %v485_v43 = vld [vmem:[%s1868_s2 + $0x1e8] sm:$0xff] }
  0xf7   : > { %v449_v44 = vld [vmem:[%s1868_s2 + $0xc8] sm:$0xff] }
  0xf8   : > { %v1343_v46 = vpop.f32.mrb[8].mxu0  ;;  %1371 = vmatpush1.bf16.msra.mxu0 %v1370_v45  ;;  %1399 = vmatpush1.bf16.msra.mxu1 %v1370_v45  ;;  %v484_v45 = vld [vmem:[%s1868_s2 + $0x1e0] sm:$0xff] }
  0xf9   : > { %v375_v47 = vpop.f32.mrb[9].mxu0  ;;  %1372 = vmatprep.subr.bf16.mxu0 %v1424_v31  ;;  %1391 = vmatprep.subr.bf16.mxu1 %v1424_v31 }
  0xfa   : > { %v1373_v48 = vpack.c.bf16 %v1343_v46, %v375_v47  ;;  %v448_v46 = vld [vmem:[%s1868_s2 + $0xc0] sm:$0xff]  ;;  %v487_v47 = vld [vmem:[%s1868_s2 + $0x1f8] sm:$0xff] }
  0xfc   : > { %v1346_v49 = vpop.f32.mrb[10].mxu0  ;;  %1374 = vmatpush1.bf16.msra.mxu0 %v1373_v48  ;;  %1400 = vmatpush1.bf16.msra.mxu1 %v1373_v48  ;;  %v451_v48 = vld [vmem:[%s1868_s2 + $0xd8] sm:$0xff] }
  0xfd   : > { %v385_v50 = vpop.f32.mrb[11].mxu0  ;;  %1375 = vmatprep.subr.bf16.mxu0 %v1424_v31  ;;  %1392 = vmatprep.subr.bf16.mxu1 %v1424_v31 }
  0xfe   : > { %v1376_v51 = vpack.c.bf16 %v1346_v49, %v385_v50  ;;  %v486_v49 = vld [vmem:[%s1868_s2 + $0x1f0] sm:$0xff] }
  0xff   : > { %v450_v50 = vld [vmem:[%s1868_s2 + $0xd0] sm:$0xff] }
 0x100   : > { %v1349_v52 = vpop.f32.mrb[12].mxu0  ;;  %1377 = vmatpush1.bf16.msra.mxu0 %v1376_v51  ;;  %1401 = vmatpush1.bf16.msra.mxu1 %v1376_v51  ;;  %v489_v51 = vld [vmem:[%s1868_s2 + $0x208] sm:$0xff] }
 0x101   : > { %v395_v53 = vpop.f32.mrb[13].mxu0  ;;  %1378 = vmatprep.subr.bf16.mxu0 %v1424_v31  ;;  %1393 = vmatprep.subr.bf16.mxu1 %v1424_v31 }
 0x102   : > { %v1379_v54 = vpack.c.bf16 %v1349_v52, %v395_v53  ;;  %v453_v52 = vld [vmem:[%s1868_s2 + $0xe8] sm:$0xff]  ;;  %v488_v53 = vld [vmem:[%s1868_s2 + $0x200] sm:$0xff] }
 0x104   : > { %v1352_v55 = vpop.f32.mrb[14].mxu0  ;;  %1380 = vmatpush1.bf16.msra.mxu0 %v1379_v54  ;;  %1402 = vmatpush1.bf16.msra.mxu1 %v1379_v54  ;;  %v452_v54 = vld [vmem:[%s1868_s2 + $0xe0] sm:$0xff] }
 0x105   : > { %v405_v56 = vpop.f32.mrb[15].mxu0  ;;  %1381 = vmatprep.subr.bf16.mxu0 %v1424_v31  ;;  %1394 = vmatprep.subr.bf16.mxu1 %v1424_v31 }
 0x106   : > { %v1382_v57 = vpack.c.bf16 %v1352_v55, %v405_v56  ;;  %v491_v55 = vld [vmem:[%s1868_s2 + $0x218] sm:$0xff] }
 0x107   : > { %v455_v56 = vld [vmem:[%s1868_s2 + $0xf8] sm:$0xff] }
 0x108   : > { %v1355_v58 = vpop.f32.mrb[16].mxu0  ;;  %1383 = vmatpush1.bf16.msra.mxu0 %v1382_v57  ;;  %1403 = vmatpush1.bf16.msra.mxu1 %v1382_v57  ;;  %v490_v57 = vld [vmem:[%s1868_s2 + $0x210] sm:$0xff] }
 0x109   : > { %v415_v59 = vpop.f32.mrb[17].mxu0  ;;  %1384 = vmatprep.subr.bf16.mxu0 %v1424_v31  ;;  %1395 = vmatprep.subr.bf16.mxu1 %v1424_v31  ;;  %v479_v31 = vld [vmem:[%s1868_s2 + $0x1b8] sm:$0xff] }
 0x10a   : > { %v1385_v60 = vpack.c.bf16 %v1355_v58, %v415_v59  ;;  %v454_v58 = vld [vmem:[%s1868_s2 + $0xf0] sm:$0xff]  ;;  %v493_v59 = vld [vmem:[%s1868_s2 + $0x228] sm:$0xff] }
 0x10c   : > { %1386 = vmatpush1.bf16.msra.mxu0 %v1385_v60  ;;  %1404 = vmatpush1.bf16.msra.mxu1 %v1385_v60  ;;  %v457_v60 = vld [vmem:[%s1868_s2 + $0x108] sm:$0xff] }
 0x10f   : > { %770 = vmatmul.mubr.f32.vlgmr.msra.gmra.mrb[0].mxu1 %v460_v61  ;;  %680 = vmatmul.mubr.f32.vlgmr.msra.gmra.mrb[18].mxu0 %v424_v62  ;;  %v492_v61 = vld [vmem:[%s1868_s2 + $0x220] sm:$0xff] }
 0x110   : > { %1161 = vmatprep.mubr.msk.f32.mxu1 %vm500_vm2, %v463_v63  ;;  %1143 = vmatprep.mubr.msk.f32.mxu0 %vm500_vm2, %v427_v0  ;;  %v456_v62 = vld [vmem:[%s1868_s2 + $0x100] sm:$0xff]  ;;  %v495_v63 = vld [vmem:[%s1868_s2 + $0x238] sm:$0xff] }
 0x111   : > { %v459_v0 = vld [vmem:[%s1868_s2 + $0x118] sm:$0xff] }
 0x113   : > { %775 = vmatmul.mubr.f32.gmra.mrb[2].mxu1 %v462_v1  ;;  %685 = vmatmul.mubr.f32.gmra.mrb[20].mxu0 %v426_v2  ;;  %v494_v1 = vld [vmem:[%s1868_s2 + $0x230] sm:$0xff] }
 0x114   : > { %1162 = vmatprep.mubr.msk.f32.mxu1 %vm500_vm2, %v465_v3  ;;  %1144 = vmatprep.mubr.msk.f32.mxu0 %vm500_vm2, %v429_v4  ;;  %v458_v2 = vld [vmem:[%s1868_s2 + $0x110] sm:$0xff]  ;;  %v497_v3 = vld [vmem:[%s1868_s2 + $0x248] sm:$0xff]  ;;  %v496_v4 = vld [vmem:[%s1868_s2 + $0x240] sm:$0xff] }
 0x117   : > { %780 = vmatmul.mubr.f32.gmra.mrb[4].mxu1 %v464_v5  ;;  %690 = vmatmul.mubr.f32.gmra.mrb[22].mxu0 %v428_v6  ;;  %v499_v5 = vld [vmem:[%s1868_s2 + $0x258] sm:$0xff]  ;;  %v498_v6 = vld [vmem:[%s1868_s2 + $0x250] sm:$0xff] }
 0x118   : > { %1163 = vmatprep.mubr.msk.f32.mxu1 %vm500_vm2, %v467_v7  ;;  %1145 = vmatprep.mubr.msk.f32.mxu0 %vm500_vm2, %v431_v8 }
 0x11b   : > { %785 = vmatmul.mubr.f32.gmra.mrb[6].mxu1 %v466_v9  ;;  %695 = vmatmul.mubr.f32.gmra.mrb[24].mxu0 %v430_v10 }
 0x11c   : > { %1164 = vmatprep.mubr.msk.f32.mxu1 %vm500_vm2, %v469_v11  ;;  %1146 = vmatprep.mubr.msk.f32.mxu0 %vm500_vm2, %v433_v12 }
 0x11f   : > { %790 = vmatmul.mubr.f32.gmra.mrb[8].mxu1 %v468_v13  ;;  %700 = vmatmul.mubr.f32.gmra.mrb[26].mxu0 %v432_v14 }
 0x120   : > { %1165 = vmatprep.mubr.msk.f32.mxu1 %vm500_vm2, %v471_v15  ;;  %1147 = vmatprep.mubr.msk.f32.mxu0 %vm500_vm2, %v435_v16 }
 0x123   : > { %795 = vmatmul.mubr.f32.gmra.mrb[10].mxu1 %v470_v17  ;;  %705 = vmatmul.mubr.f32.gmra.mrb[28].mxu0 %v434_v18 }
 0x124   : > { %1166 = vmatprep.mubr.msk.f32.mxu1 %vm500_vm2, %v473_v19  ;;  %1148 = vmatprep.mubr.msk.f32.mxu0 %vm500_vm2, %v437_v20 }
 0x127   : > { %800 = vmatmul.mubr.f32.gmra.mrb[12].mxu1 %v472_v21  ;;  %710 = vmatmul.mubr.f32.gmra.mrb[30].mxu0 %v436_v22 }
 0x128   : > { %1167 = vmatprep.mubr.msk.f32.mxu1 %vm500_vm2, %v475_v23  ;;  %1149 = vmatprep.mubr.msk.f32.mxu0 %vm500_vm2, %v439_v24 }
 0x12b   : > { %805 = vmatmul.mubr.f32.gmra.mrb[14].mxu1 %v474_v25  ;;  %715 = vmatmul.mubr.f32.gmra.mrb[32].mxu0 %v438_v26 }
 0x12c   : > { %1168 = vmatprep.mubr.msk.f32.mxu1 %vm500_vm2, %v477_v27  ;;  %1150 = vmatprep.mubr.msk.f32.mxu0 %vm500_vm2, %v441_v28 }
 0x12f   : > { %810 = vmatmul.mubr.f32.gmra.mrb[16].mxu1 %v476_v29  ;;  %720 = vmatmul.mubr.f32.gmra.mrb[34].mxu0 %v440_v30 }
 0x130   : > { %1169 = vmatprep.mubr.msk.f32.mxu1 %vm500_vm2, %v479_v31  ;;  %1151 = vmatprep.mubr.msk.f32.mxu0 %vm500_vm2, %v443_v32 }
 0x133   : > { %815 = vmatmul.mubr.f32.gmra.mrb[18].mxu1 %v478_v33  ;;  %725 = vmatmul.mubr.f32.gmra.mrb[36].mxu0 %v442_v34 }
 0x134   : > { %1170 = vmatprep.mubr.msk.f32.mxu1 %vm500_vm2, %v481_v35  ;;  %1152 = vmatprep.mubr.msk.f32.mxu0 %vm500_vm2, %v445_v36 }
 0x137   : > { %820 = vmatmul.mubr.f32.gmra.mrb[20].mxu1 %v480_v37  ;;  %730 = vmatmul.mubr.f32.gmra.mrb[38].mxu0 %v444_v38 }
 0x138   : > { %1171 = vmatprep.mubr.msk.f32.mxu1 %vm500_vm2, %v483_v39  ;;  %1153 = vmatprep.mubr.msk.f32.mxu0 %vm500_vm2, %v447_v40 }
 0x13b   : > { %825 = vmatmul.mubr.f32.gmra.mrb[22].mxu1 %v482_v41  ;;  %735 = vmatmul.mubr.f32.gmra.mrb[40].mxu0 %v446_v42 }
 0x13c   : > { %1172 = vmatprep.mubr.msk.f32.mxu1 %vm500_vm2, %v485_v43  ;;  %1154 = vmatprep.mubr.msk.f32.mxu0 %vm500_vm2, %v449_v44 }
 0x13f   : > { %830 = vmatmul.mubr.f32.gmra.mrb[24].mxu1 %v484_v45  ;;  %740 = vmatmul.mubr.f32.gmra.mrb[42].mxu0 %v448_v46 }
 0x140   : > { %1173 = vmatprep.mubr.msk.f32.mxu1 %vm500_vm2, %v487_v47  ;;  %1155 = vmatprep.mubr.msk.f32.mxu0 %vm500_vm2, %v451_v48 }
 0x143   : > { %835 = vmatmul.mubr.f32.gmra.mrb[26].mxu1 %v486_v49  ;;  %745 = vmatmul.mubr.f32.gmra.mrb[44].mxu0 %v450_v50 }
 0x144   : > { %1174 = vmatprep.mubr.msk.f32.mxu1 %vm500_vm2, %v489_v51  ;;  %1156 = vmatprep.mubr.msk.f32.mxu0 %vm500_vm2, %v453_v52 }
 0x147   : > { %840 = vmatmul.mubr.f32.gmra.mrb[28].mxu1 %v488_v53  ;;  %750 = vmatmul.mubr.f32.gmra.mrb[46].mxu0 %v452_v54 }
 0x148   : > { %1175 = vmatprep.mubr.msk.f32.mxu1 %vm500_vm2, %v491_v55  ;;  %1157 = vmatprep.mubr.msk.f32.mxu0 %vm500_vm2, %v455_v56 }
 0x14b   : > { %845 = vmatmul.mubr.f32.gmra.mrb[30].mxu1 %v490_v57  ;;  %755 = vmatmul.mubr.f32.gmra.mrb[48].mxu0 %v454_v58 }
 0x14c   : > { %1176 = vmatprep.mubr.msk.f32.mxu1 %vm500_vm2, %v493_v59  ;;  %1158 = vmatprep.mubr.msk.f32.mxu0 %vm500_vm2, %v457_v60 }
 0x14f   : > { %850 = vmatmul.mubr.f32.gmra.mrb[32].mxu1 %v492_v61  ;;  %760 = vmatmul.mubr.f32.gmra.mrb[50].mxu0 %v456_v62 }
 0x150   : > { %1177 = vmatprep.mubr.msk.f32.mxu1 %vm500_vm2, %v495_v63  ;;  %1159 = vmatprep.mubr.msk.f32.mxu0 %vm500_vm2, %v459_v0 }
 0x153   : > { %855 = vmatmul.mubr.f32.gmra.mrb[34].mxu1 %v494_v1  ;;  %765 = vmatmul.mubr.f32.gmra.mrb[52].mxu0 %v458_v2 }
 0x154   : > { %1178 = vmatprep.mubr.msk.f32.mxu1 %vm500_vm2, %v497_v3 }
 0x157   : > { %860 = vmatmul.mubr.f32.gmra.mrb[36].mxu1 %v496_v4 }
 0x158   : > { %1179 = vmatprep.mubr.msk.f32.mxu1 %vm500_vm2, %v499_v5 }
 0x15b   : > { %865 = vmatmul.mubr.f32.gmra.mrb[38].mxu1 %v498_v6 }
 0x1e2   : > { %v771_v7 = vpop.f32.mrb[0].mxu1  ;;  %v681_v8 = vpop.f32.mrb[18].mxu0 }
 0x1e3   : > { %v1238_v9 = vpack.c.bf16 %v771_v7, %v771_v7  ;;  %v773_v10 = vpop.f32.mrb[1].mxu1  ;;  %v1220_v11 = vpack.c.bf16 %v681_v8, %v681_v8  ;;  %v683_v12 = vpop.f32.mrb[19].mxu0 }
 0x1e5   : > { %1041 = vst.msk [vmem:[%s1785_s29 + $0x48] sm:$0xf] %vm1022_vm3, %v1238_v9  ;;  %1023 = vst.msk [vmem:[%s1785_s29] sm:$0xf] %vm1022_vm3, %v1220_v11 }
 0x1e6   : > { %v776_v13 = vpop.f32.mrb[2].mxu1  ;;  %v686_v14 = vpop.f32.mrb[20].mxu0 }
 0x1e7   : > { %v1239_v15 = vpack.c.bf16 %v776_v13, %v776_v13  ;;  %v778_v16 = vpop.f32.mrb[3].mxu1  ;;  %v1221_v17 = vpack.c.bf16 %v686_v14, %v686_v14  ;;  %v688_v18 = vpop.f32.mrb[21].mxu0 }
 0x1e9   : > { %1042 = vst.msk [vmem:[%s1785_s29 + $0x4c] sm:$0xf] %vm1022_vm3, %v1239_v15  ;;  %1024 = vst.msk [vmem:[%s1785_s29 + $0x4] sm:$0xf] %vm1022_vm3, %v1221_v17 }
 0x1ea   : > { %v781_v19 = vpop.f32.mrb[4].mxu1  ;;  %v691_v20 = vpop.f32.mrb[22].mxu0 }
 0x1eb   : > { %v1240_v21 = vpack.c.bf16 %v781_v19, %v781_v19  ;;  %v783_v22 = vpop.f32.mrb[5].mxu1  ;;  %v1222_v23 = vpack.c.bf16 %v691_v20, %v691_v20  ;;  %v693_v24 = vpop.f32.mrb[23].mxu0 }
 0x1ed   : > { %1043 = vst.msk [vmem:[%s1785_s29 + $0x50] sm:$0xf] %vm1022_vm3, %v1240_v21  ;;  %1025 = vst.msk [vmem:[%s1785_s29 + $0x8] sm:$0xf] %vm1022_vm3, %v1222_v23 }
 0x1ee   : > { %v786_v25 = vpop.f32.mrb[6].mxu1  ;;  %v696_v26 = vpop.f32.mrb[24].mxu0 }
 0x1ef   : > { %v1241_v27 = vpack.c.bf16 %v786_v25, %v786_v25  ;;  %v788_v28 = vpop.f32.mrb[7].mxu1  ;;  %v1223_v29 = vpack.c.bf16 %v696_v26, %v696_v26  ;;  %v698_v30 = vpop.f32.mrb[25].mxu0 }
 0x1f1   : > { %1044 = vst.msk [vmem:[%s1785_s29 + $0x54] sm:$0xf] %vm1022_vm3, %v1241_v27  ;;  %1026 = vst.msk [vmem:[%s1785_s29 + $0xc] sm:$0xf] %vm1022_vm3, %v1223_v29 }
 0x1f2   : > { %v791_v31 = vpop.f32.mrb[8].mxu1  ;;  %v701_v32 = vpop.f32.mrb[26].mxu0 }
 0x1f3   : > { %v1242_v33 = vpack.c.bf16 %v791_v31, %v791_v31  ;;  %v793_v34 = vpop.f32.mrb[9].mxu1  ;;  %v1224_v35 = vpack.c.bf16 %v701_v32, %v701_v32  ;;  %v703_v36 = vpop.f32.mrb[27].mxu0 }
 0x1f5   : > { %1045 = vst.msk [vmem:[%s1785_s29 + $0x58] sm:$0xf] %vm1022_vm3, %v1242_v33  ;;  %1027 = vst.msk [vmem:[%s1785_s29 + $0x10] sm:$0xf] %vm1022_vm3, %v1224_v35 }
 0x1f6   : > { %v796_v37 = vpop.f32.mrb[10].mxu1  ;;  %v706_v38 = vpop.f32.mrb[28].mxu0 }
 0x1f7   : > { %v1243_v39 = vpack.c.bf16 %v796_v37, %v796_v37  ;;  %v798_v40 = vpop.f32.mrb[11].mxu1  ;;  %v1225_v41 = vpack.c.bf16 %v706_v38, %v706_v38  ;;  %v708_v42 = vpop.f32.mrb[29].mxu0 }
 0x1f9   : > { %1046 = vst.msk [vmem:[%s1785_s29 + $0x5c] sm:$0xf] %vm1022_vm3, %v1243_v39  ;;  %1028 = vst.msk [vmem:[%s1785_s29 + $0x14] sm:$0xf] %vm1022_vm3, %v1225_v41 }
 0x1fa   : > { %v801_v43 = vpop.f32.mrb[12].mxu1  ;;  %v711_v44 = vpop.f32.mrb[30].mxu0 }
 0x1fb   : > { %v1244_v45 = vpack.c.bf16 %v801_v43, %v801_v43  ;;  %v803_v46 = vpop.f32.mrb[13].mxu1  ;;  %v1226_v47 = vpack.c.bf16 %v711_v44, %v711_v44  ;;  %v713_v48 = vpop.f32.mrb[31].mxu0 }
 0x1fd   : > { %1047 = vst.msk [vmem:[%s1785_s29 + $0x60] sm:$0xf] %vm1022_vm3, %v1244_v45  ;;  %1029 = vst.msk [vmem:[%s1785_s29 + $0x18] sm:$0xf] %vm1022_vm3, %v1226_v47 }
 0x1fe   : > { %v806_v49 = vpop.f32.mrb[14].mxu1  ;;  %v716_v50 = vpop.f32.mrb[32].mxu0 }
 0x1ff   : > { %v1245_v51 = vpack.c.bf16 %v806_v49, %v806_v49  ;;  %v808_v52 = vpop.f32.mrb[15].mxu1  ;;  %v1227_v53 = vpack.c.bf16 %v716_v50, %v716_v50  ;;  %v718_v54 = vpop.f32.mrb[33].mxu0 }
 0x201   : > { %1048 = vst.msk [vmem:[%s1785_s29 + $0x64] sm:$0xf] %vm1022_vm3, %v1245_v51  ;;  %1030 = vst.msk [vmem:[%s1785_s29 + $0x1c] sm:$0xf] %vm1022_vm3, %v1227_v53 }
 0x202   : > { %v811_v55 = vpop.f32.mrb[16].mxu1  ;;  %v721_v56 = vpop.f32.mrb[34].mxu0 }
 0x203   : > { %v1246_v57 = vpack.c.bf16 %v811_v55, %v811_v55  ;;  %v813_v58 = vpop.f32.mrb[17].mxu1  ;;  %v1228_v59 = vpack.c.bf16 %v721_v56, %v721_v56  ;;  %v723_v60 = vpop.f32.mrb[35].mxu0 }
 0x205   : > { %1049 = vst.msk [vmem:[%s1785_s29 + $0x68] sm:$0xf] %vm1022_vm3, %v1246_v57  ;;  %1031 = vst.msk [vmem:[%s1785_s29 + $0x20] sm:$0xf] %vm1022_vm3, %v1228_v59 }
 0x206   : > { %v816_v61 = vpop.f32.mrb[18].mxu1  ;;  %v726_v62 = vpop.f32.mrb[36].mxu0 }
 0x207   : > { %v1247_v63 = vpack.c.bf16 %v816_v61, %v816_v61  ;;  %v818_v0 = vpop.f32.mrb[19].mxu1  ;;  %v1229_v1 = vpack.c.bf16 %v726_v62, %v726_v62  ;;  %v728_v2 = vpop.f32.mrb[37].mxu0 }
 0x209   : > { %1050 = vst.msk [vmem:[%s1785_s29 + $0x6c] sm:$0xf] %vm1022_vm3, %v1247_v63  ;;  %1032 = vst.msk [vmem:[%s1785_s29 + $0x24] sm:$0xf] %vm1022_vm3, %v1229_v1 }
 0x20a   : > { %v821_v3 = vpop.f32.mrb[20].mxu1  ;;  %v731_v4 = vpop.f32.mrb[38].mxu0 }
 0x20b   : > { %v1248_v5 = vpack.c.bf16 %v821_v3, %v821_v3  ;;  %v823_v6 = vpop.f32.mrb[21].mxu1  ;;  %v1230_v7 = vpack.c.bf16 %v731_v4, %v731_v4  ;;  %v733_v8 = vpop.f32.mrb[39].mxu0 }
 0x20d   : > { %1051 = vst.msk [vmem:[%s1785_s29 + $0x70] sm:$0xf] %vm1022_vm3, %v1248_v5  ;;  %1033 = vst.msk [vmem:[%s1785_s29 + $0x28] sm:$0xf] %vm1022_vm3, %v1230_v7 }
 0x20e   : > { %v826_v9 = vpop.f32.mrb[22].mxu1  ;;  %v736_v10 = vpop.f32.mrb[40].mxu0 }
 0x20f   : > { %v1249_v11 = vpack.c.bf16 %v826_v9, %v826_v9  ;;  %v828_v12 = vpop.f32.mrb[23].mxu1  ;;  %v1231_v13 = vpack.c.bf16 %v736_v10, %v736_v10  ;;  %v738_v14 = vpop.f32.mrb[41].mxu0 }
 0x211   : > { %1052 = vst.msk [vmem:[%s1785_s29 + $0x74] sm:$0xf] %vm1022_vm3, %v1249_v11  ;;  %1034 = vst.msk [vmem:[%s1785_s29 + $0x2c] sm:$0xf] %vm1022_vm3, %v1231_v13 }
 0x212   : > { %v831_v15 = vpop.f32.mrb[24].mxu1  ;;  %v741_v16 = vpop.f32.mrb[42].mxu0 }
 0x213   : > { %v1250_v17 = vpack.c.bf16 %v831_v15, %v831_v15  ;;  %v833_v18 = vpop.f32.mrb[25].mxu1  ;;  %v1232_v19 = vpack.c.bf16 %v741_v16, %v741_v16  ;;  %v743_v20 = vpop.f32.mrb[43].mxu0 }
 0x215   : > { %1053 = vst.msk [vmem:[%s1785_s29 + $0x78] sm:$0xf] %vm1022_vm3, %v1250_v17  ;;  %1035 = vst.msk [vmem:[%s1785_s29 + $0x30] sm:$0xf] %vm1022_vm3, %v1232_v19 }
 0x216   : > { %v836_v21 = vpop.f32.mrb[26].mxu1  ;;  %v746_v22 = vpop.f32.mrb[44].mxu0 }
 0x217   : > { %v1251_v23 = vpack.c.bf16 %v836_v21, %v836_v21  ;;  %v838_v24 = vpop.f32.mrb[27].mxu1  ;;  %v1233_v25 = vpack.c.bf16 %v746_v22, %v746_v22  ;;  %v748_v26 = vpop.f32.mrb[45].mxu0 }
 0x219   : > { %1054 = vst.msk [vmem:[%s1785_s29 + $0x7c] sm:$0xf] %vm1022_vm3, %v1251_v23  ;;  %1036 = vst.msk [vmem:[%s1785_s29 + $0x34] sm:$0xf] %vm1022_vm3, %v1233_v25 }
 0x21a   : > { %v841_v27 = vpop.f32.mrb[28].mxu1  ;;  %v751_v28 = vpop.f32.mrb[46].mxu0 }
 0x21b   : > { %v1252_v29 = vpack.c.bf16 %v841_v27, %v841_v27  ;;  %v843_v30 = vpop.f32.mrb[29].mxu1  ;;  %v1234_v31 = vpack.c.bf16 %v751_v28, %v751_v28  ;;  %v753_v32 = vpop.f32.mrb[47].mxu0 }
 0x21d   : > { %1055 = vst.msk [vmem:[%s1785_s29 + $0x80] sm:$0xf] %vm1022_vm3, %v1252_v29  ;;  %1037 = vst.msk [vmem:[%s1785_s29 + $0x38] sm:$0xf] %vm1022_vm3, %v1234_v31 }
 0x21e   : > { %v846_v33 = vpop.f32.mrb[30].mxu1  ;;  %v756_v34 = vpop.f32.mrb[48].mxu0 }
 0x21f   : > { %v1253_v35 = vpack.c.bf16 %v846_v33, %v846_v33  ;;  %v848_v36 = vpop.f32.mrb[31].mxu1  ;;  %v1235_v37 = vpack.c.bf16 %v756_v34, %v756_v34  ;;  %v758_v38 = vpop.f32.mrb[49].mxu0 }
 0x221   : > { %1056 = vst.msk [vmem:[%s1785_s29 + $0x84] sm:$0xf] %vm1022_vm3, %v1253_v35  ;;  %1038 = vst.msk [vmem:[%s1785_s29 + $0x3c] sm:$0xf] %vm1022_vm3, %v1235_v37 }
 0x222   : > { %v851_v39 = vpop.f32.mrb[32].mxu1  ;;  %v761_v40 = vpop.f32.mrb[50].mxu0 }
 0x223   : > { %v1254_v41 = vpack.c.bf16 %v851_v39, %v851_v39  ;;  %v853_v42 = vpop.f32.mrb[33].mxu1  ;;  %v1236_v43 = vpack.c.bf16 %v761_v40, %v761_v40  ;;  %v763_v44 = vpop.f32.mrb[51].mxu0 }
 0x225   : > { %1057 = vst.msk [vmem:[%s1785_s29 + $0x88] sm:$0xf] %vm1022_vm3, %v1254_v41  ;;  %1039 = vst.msk [vmem:[%s1785_s29 + $0x40] sm:$0xf] %vm1022_vm3, %v1236_v43 }
 0x226   : > { %v856_v45 = vpop.f32.mrb[34].mxu1  ;;  %v766_v46 = vpop.f32.mrb[52].mxu0 }
 0x227   : > { %v1255_v47 = vpack.c.bf16 %v856_v45, %v856_v45  ;;  %v858_v48 = vpop.f32.mrb[35].mxu1  ;;  %v1237_v49 = vpack.c.bf16 %v766_v46, %v766_v46  ;;  %v768_v50 = vpop.f32.mrb[53].mxu0 }
 0x229   : > { %1058 = vst.msk [vmem:[%s1785_s29 + $0x8c] sm:$0xf] %vm1022_vm3, %v1255_v47  ;;  %1040 = vst.msk [vmem:[%s1785_s29 + $0x44] sm:$0xf] %vm1022_vm3, %v1237_v49 }
 0x22a   : > { %v861_v51 = vpop.f32.mrb[36].mxu1 }
 0x22b   : > { %v1256_v52 = vpack.c.bf16 %v861_v51, %v861_v51  ;;  %v863_v53 = vpop.f32.mrb[37].mxu1 }
 0x22d   : > { %1059 = vst.msk [vmem:[%s1785_s29 + $0x90] sm:$0xf] %vm1022_vm3, %v1256_v52 }
 0x22e   : > { %v866_v54 = vpop.f32.mrb[38].mxu1 }
 0x22f   : > { %v1257_v55 = vpack.c.bf16 %v866_v54, %v866_v54  ;;  %v868_v56 = vpop.f32.mrb[39].mxu1 }
 0x231   : > { %1060 = vst.msk [vmem:[%s1785_s29 + $0x94] sm:$0xf] %vm1022_vm3, %v1257_v55 }
 0x232 PF: > { %s13_s12 = sadd.s32 1, %s1422_s12  }
 0x233   : > { %p10_p4 = scmp.ge.s32.totalorder %s13_s12, 4  }
 0x235   :  { %12 = sbr.rel (!%p10_p4) target bundleno = 1 (0x1), region = 62 }

// kernel: multi_up_pallas.7
= control target key start
LH: loop header
LB: loop body
LE: loop exit
PB: predicated region body
PF: predicated region fallthrough
CT: control target
= control target key end

     0   :  { %s2880_s27 = smov 0   ;;  %s3587_s0 = inlined_call_operand.vmem [shape: bf16[2,8,1292], index: 0, kind: input, shape index: {}]   ;;  %s3588_s1 = inlined_call_operand.vmem [shape: bf16[4,72], index: 1, kind: input, shape index: {}]   ;;  %s3589_s2 = inlined_call_operand.vmem [shape: f32[4,1], index: 2, kind: input, shape index: {}]   ;;  %s3590_s3 = inlined_call_operand.vmem [shape: bf16[4,36], index: 3, kind: input, shape index: {}]   ;;  %s3591_s4 = inlined_call_operand.vmem [shape: f32[4,1], index: 4, kind: input, shape index: {}]   ;;  %s3592_s5 = inlined_call_operand.vmem [shape: f32[1,1156], index: 5, kind: input, shape index: {}]   ;;  %s3593_s6 = inlined_call_operand.vmem [shape: f32[3,4], index: 6, kind: input, shape index: {}]   ;;  %s3594_s7 = inlined_call_operand.vmem [shape: f32[3,1], index: 7, kind: input, shape index: {}]   ;;  %s3595_s8 = inlined_call_operand.vmem [shape: f32[2,3,1156], index: 8, kind: output, shape index: {}]  }
   0x1 LB: > { %s2594_s28 = sadd.s32 4294967295, %s2816_s27   ;;  %p2598_p0 = scmp.ge.s32.totalorder %s2816_s27, 1  ;;  %s2816_s27 = sphi %s2880_s27, %s18_s27  }
   0x2   : > { %p262_p1 = scmp.lt.s32.totalorder %s2816_s27, 3 }
   0x4   : > { %p263_p2 = pnand %p2598_p0, %p262_p1 }
   0x5   : > { %p296_p3 = scmp.lt.s32.totalorder (!%p263_p2), %s2594_s28, 1  ;;  %s2818_s11 = smov (!%p263_p2), 94   ;;  %v2827_v3 = vmov (!%p263_p2), 0   ;;  %v684_v6 = vld [vmem:[%s3589_s2] sm:$0xf] (!%p263_p2)  ;;  %vm334_vm0 = vcmask (!%p263_p2), 1043456  }
   0x6   : > { %266 = sbr.rel (%p263_p2) target bundleno = 1095 (0x447), region = 52  ;;  %s2819_s12 = smov (!%p263_p2), 95   ;;  %981 = vmatprep.mubr.bf16.mxu0 (!%p263_p2), %v2827_v3  ;;  %1226 = vst [vmem:[#allocation2] sm:$0x3] (!%p263_p2), %v2827_v3  ;;  %1022 = vmatprep.mubr.bf16.mxu1 (!%p263_p2), %v2827_v3  ;;  %vm374_vm1 = vcmask (!%p263_p2), 769024   ;;  %vm336_vm2 = vcmask (!%p263_p2), 777216  }
   0x7   : > { %s2820_s13 = smov (!%p263_p2), 93   ;;  %s2821_s14 = smov (!%p263_p2), 61   ;;  %2750 = vset.pattern.permute.xlu1 (!%p263_p2), %v2827_v3  ;;  %2751 = vset.pattern.permute.xlu0 (!%p263_p2), %v2827_v3  ;;  %vm409_vm3 = vcmask (!%p263_p2), 760832   ;;  %vm444_vm4 = vcmask (!%p263_p2), 498688   ;;  %vm479_vm5 = vcmask (!%p263_p2), 490496   ;;  %vm514_vm6 = vcmask (!%p263_p2), 482304  }
   0x8   : > { %s2822_s15 = smov (!%p263_p2), 60   ;;  %s2823_s16 = smov (!%p263_p2), 59   ;;  %vm549_vm7 = vcmask (!%p263_p2), 220160   ;;  %vm584_vm8 = vcmask (!%p263_p2), 211968   ;;  %vm619_vm9 = vcmask (!%p263_p2), 203776   ;;  %vm915_vm10 = vcmask (!%p263_p2), 588800  }
   0x9   : > { %s2824_s17 = smov (!%p263_p2), 27   ;;  %s2825_s18 = smov (!%p263_p2), 26   ;;  %vm355_vm11 = vcmask (!%p263_p2), 31748   ;;  %vm1227_vm13 = vcmask (!%p263_p2), 1041440   ;;  %vm1228_vm14 = vcmask (!%p263_p2), 27650  }
   0xa   : > { %s2826_s19 = smov (!%p263_p2), 25   ;;  %vm3061_vm12 = vmor (!%p263_p2), %vm355_vm11, %vm334_vm0  ;;  %s2829_s26 = smov (!%p263_p2), 34   ;;  %vm1497_vm11 = vcmask (!%p263_p2), 7168  }
   0xb   : > { %vm1229_vm15 = vmor (!%p263_p2), %vm1228_vm14, %vm1227_vm13  ;;  %s2831_s30 = smov (!%p263_p2), 1   ;;  %s2832_s9 = smov (!%p263_p2), 33   ;;  %vm1856_vm13 = vcmask (!%p263_p2), 293888  }
   0xc   : > { %1230 = vst.msk [vmem:[#allocation2 + $0x14] sm:$0xf] (!%p263_p2), %vm1229_vm15, %v2827_v3  ;;  %vm1440_vm15 = vcmask (!%p263_p2), 31750  }
   0xd   : > { %s3603_s28 = smov (!%p296_p3, %s2594_s28), 1 }
   0xe   : > { %s2723_s29 = smul.u32 44, %s3603_s28 }
   0xf   : > { %s2724_s21 = smul.u32 40, %s3603_s28 }
  0x10   : > { %s2894_s10 = scalar_lea.vmem %s3587_s0, %s2723_s29  ;;  %s2830_s29 = smov 35  }
  0x11   : > { %v309_v0 = vld [vmem:[%s2894_s10] sm:$0xff]  ;;  %v310_v1 = vld [vmem:[%s2894_s10 + $0x8] sm:$0xff]  ;;  %v311_v2 = vld [vmem:[%s2894_s10 + $0x10] sm:$0xff]  ;;  %s305_s24 = scalar_lea.vmem %s3595_s8, %s2724_s21 }
  0x12   : > { %358 = vrot.lane.b32.xlu1 %v309_v0, %s2818_s11  ;;  %319 = vrot.lane.b32.xlu0 %v309_v0, %s2819_s12  ;;  %v312_v4 = vld [vmem:[%s2894_s10 + $0x18] sm:$0xff]  ;;  %v313_v5 = vld [vmem:[%s2894_s10 + $0x20] sm:$0xff]  ;;  %s2833_s10 = smov 127  }
  0x16   : > { %360 = vrot.lane.b32.xlu1 %v310_v1, %s2818_s11  ;;  %321 = vrot.lane.b32.xlu0 %v310_v1, %s2819_s12 }
  0x1a   : > { %395 = vrot.lane.b32.xlu1 %v310_v1, %s2820_s13  ;;  %393 = vrot.lane.b32.xlu0 %v309_v0, %s2820_s13 }
  0x1e   : > { %430 = vrot.lane.b32.xlu1 %v310_v1, %s2821_s14  ;;  %428 = vrot.lane.b32.xlu0 %v309_v0, %s2821_s14 }
  0x22   : > { %362 = vrot.lane.b32.xlu1 %v311_v2, %s2818_s11  ;;  %323 = vrot.lane.b32.xlu0 %v311_v2, %s2819_s12 }
  0x26   : > { %465 = vrot.lane.b32.xlu1 %v310_v1, %s2822_s15  ;;  %463 = vrot.lane.b32.xlu0 %v309_v0, %s2822_s15 }
  0x2a   : > { %500 = vrot.lane.b32.xlu1 %v310_v1, %s2823_s16  ;;  %498 = vrot.lane.b32.xlu0 %v309_v0, %s2823_s16 }
  0x2e   : > { %432 = vrot.lane.b32.xlu1 %v311_v2, %s2821_s14  ;;  %397 = vrot.lane.b32.xlu0 %v311_v2, %s2820_s13 }
  0x32   : > { %535 = vrot.lane.b32.xlu1 %v310_v1, %s2824_s17  ;;  %533 = vrot.lane.b32.xlu0 %v309_v0, %s2824_s17 }
  0x36   : > { %570 = vrot.lane.b32.xlu1 %v310_v1, %s2825_s18  ;;  %568 = vrot.lane.b32.xlu0 %v309_v0, %s2825_s18 }
  0x3a   : > { %502 = vrot.lane.b32.xlu1 %v311_v2, %s2823_s16  ;;  %467 = vrot.lane.b32.xlu0 %v311_v2, %s2822_s15 }
  0x3e   : > { %605 = vrot.lane.b32.xlu1 %v310_v1, %s2826_s19  ;;  %603 = vrot.lane.b32.xlu0 %v309_v0, %s2826_s19 }
  0x42   : > { %572 = vrot.lane.b32.xlu1 %v311_v2, %s2825_s18  ;;  %537 = vrot.lane.b32.xlu0 %v311_v2, %s2824_s17 }
  0x46   : > { %364 = vrot.lane.b32.xlu1 %v312_v4, %s2818_s11  ;;  %325 = vrot.lane.b32.xlu0 %v312_v4, %s2819_s12 }
  0x4a   : > { %399 = vrot.lane.b32.xlu1 %v312_v4, %s2820_s13  ;;  %607 = vrot.lane.b32.xlu0 %v311_v2, %s2826_s19 }
  0x4e   : > { %327 = vrot.lane.b32.xlu1 %v313_v5, %s2819_s12  ;;  %434 = vrot.lane.b32.xlu0 %v312_v4, %s2821_s14 }
  0x52   : > { %469 = vrot.lane.b32.xlu1 %v312_v4, %s2822_s15  ;;  %366 = vrot.lane.b32.xlu0 %v313_v5, %s2818_s11 }
  0x56   : > { %401 = vrot.lane.b32.xlu1 %v313_v5, %s2820_s13  ;;  %504 = vrot.lane.b32.xlu0 %v312_v4, %s2823_s16 }
  0x5a   : > { %539 = vrot.lane.b32.xlu1 %v312_v4, %s2824_s17  ;;  %436 = vrot.lane.b32.xlu0 %v313_v5, %s2821_s14 }
  0x5e   : > { %471 = vrot.lane.b32.xlu1 %v313_v5, %s2822_s15  ;;  %574 = vrot.lane.b32.xlu0 %v312_v4, %s2825_s18 }
  0x62   : > { %609 = vrot.lane.b32.xlu1 %v312_v4, %s2826_s19  ;;  %506 = vrot.lane.b32.xlu0 %v313_v5, %s2823_s16 }
  0x66   : > { %576 = vrot.lane.b32.xlu1 %v313_v5, %s2825_s18  ;;  %541 = vrot.lane.b32.xlu0 %v313_v5, %s2824_s17 }
  0x6a   : > { %611 = vrot.lane.b32.xlu0 %v313_v5, %s2826_s19  ;;  %687 = vperm.xlu1 %2750, %v684_v6  }
  0x84   : > { %v359_v7 = vpop.permute.xlu1 %358  ;;  %v320_v8 = vpop.permute.xlu0 %319 }
  0x85   : > { %v368_v11 = vrot.slane %v359_v7, 4  ;;  %v329_v12 = vrot.slane %v320_v8, 4 }
  0x88   : > { %v361_v9 = vpop.permute.xlu1 %360  ;;  %v322_v10 = vpop.permute.xlu0 %321 }
  0x89   : > { %v369_v13 = vrot.slane %v361_v9, 4  ;;  %v330_v14 = vrot.slane %v322_v10, 4 }
  0x8b   : > { %v373_v15 = vsel %vm334_vm0, %v368_v11, %v369_v13  ;;  %v335_v16 = vsel %vm334_vm0, %v329_v12, %v330_v14 }
  0x8c   : > { %v375_v17 = vsel %vm374_vm1, %v359_v7, %v373_v15  ;;  %v337_v18 = vsel %vm336_vm2, %v320_v8, %v335_v16  ;;  %v396_v19 = vpop.permute.xlu1 %395  ;;  %v394_v20 = vpop.permute.xlu0 %393 }
  0x8d   : > { %v404_v21 = vrot.slane %v396_v19, 4  ;;  %v403_v22 = vrot.slane %v394_v20, 4  ;;  %v2602_v23 = vcombine.high %v337_v18, %v375_v17  ;;  %v2601_v24 = vcombine.low %v337_v18, %v375_v17 }
  0x8f   : > { %v408_v25 = vsel %vm334_vm0, %v403_v22, %v404_v21  ;;  %949 = vmatprep.subr.bf16.mxu0 %v2602_v23 }
  0x90   : > { %v410_v26 = vsel %vm409_vm3, %v394_v20, %v408_v25  ;;  %v431_v27 = vpop.permute.xlu1 %430  ;;  %v429_v28 = vpop.permute.xlu0 %428  ;;  %950 = vmatpush1.bf16.msra.mxu0 %v2601_v24 }
  0x91   : > { %v439_v29 = vrot.slane %v431_v27, 4  ;;  %v438_v30 = vrot.slane %v429_v28, 4 }
  0x93   : > { %v443_v31 = vsel %vm334_vm0, %v438_v30, %v439_v29 }
  0x94   : > { %v445_v32 = vsel %vm444_vm4, %v429_v28, %v443_v31  ;;  %v2962_v33 = vpop.permute.xlu1 %362  ;;  %v2964_v34 = vpop.permute.xlu0 %323 }
  0x95   : > { %v370_v35 = vrot.slane %v2962_v33, 4  ;;  %v331_v36 = vrot.slane %v2964_v34, 4  ;;  %v2612_v37 = vcombine.high %v410_v26, %v445_v32  ;;  %v2611_v38 = vcombine.low %v410_v26, %v445_v32 }
  0x97   : > { %v376_v39 = vsel %vm334_vm0, %v369_v13, %v370_v35  ;;  %v338_v40 = vsel %vm334_vm0, %v330_v14, %v331_v36  ;;  %951 = vmatprep.subr.bf16.mxu0 %v2612_v37 }
  0x98   : > { %v377_v41 = vsel %vm374_vm1, %v361_v9, %v376_v39  ;;  %v339_v42 = vsel %vm336_vm2, %v322_v10, %v338_v40  ;;  %v466_v43 = vpop.permute.xlu1 %465  ;;  %v464_v44 = vpop.permute.xlu0 %463  ;;  %952 = vmatpush1.bf16.msra.mxu0 %v2611_v38 }
  0x99   : > { %v474_v45 = vrot.slane %v466_v43, 4  ;;  %v473_v46 = vrot.slane %v464_v44, 4  ;;  %v2604_v47 = vcombine.high %v339_v42, %v377_v41  ;;  %v2603_v48 = vcombine.low %v339_v42, %v377_v41 }
  0x9b   : > { %v478_v49 = vsel %vm334_vm0, %v473_v46, %v474_v45  ;;  %990 = vmatprep.subr.bf16.mxu1 %v2604_v47 }
  0x9c   : > { %v480_v50 = vsel %vm479_vm5, %v464_v44, %v478_v49  ;;  %v501_v51 = vpop.permute.xlu1 %500  ;;  %v499_v52 = vpop.permute.xlu0 %498  ;;  %991 = vmatpush1.bf16.msra.mxu1 %v2603_v48 }
  0x9d   : > { %v509_v53 = vrot.slane %v501_v51, 4  ;;  %v508_v54 = vrot.slane %v499_v52, 4 }
  0x9f   : > { %v513_v55 = vsel %vm334_vm0, %v508_v54, %v509_v53 }
  0xa0   : > { %v515_v56 = vsel %vm514_vm6, %v499_v52, %v513_v55  ;;  %v2980_v57 = vpop.permute.xlu1 %432  ;;  %v2982_v58 = vpop.permute.xlu0 %397 }
  0xa1   : > { %v440_v59 = vrot.slane %v2980_v57, 4  ;;  %v405_v60 = vrot.slane %v2982_v58, 4  ;;  %v2622_v61 = vcombine.high %v480_v50, %v515_v56  ;;  %v2621_v62 = vcombine.low %v480_v50, %v515_v56 }
  0xa3   : > { %v446_v63 = vsel %vm334_vm0, %v439_v29, %v440_v59  ;;  %v411_v0 = vsel %vm334_vm0, %v404_v21, %v405_v60  ;;  %953 = vmatprep.subr.bf16.mxu0 %v2622_v61 }
  0xa4   : > { %v447_v1 = vsel %vm444_vm4, %v431_v27, %v446_v63  ;;  %v412_v2 = vsel %vm409_vm3, %v396_v19, %v411_v0  ;;  %v536_v4 = vpop.permute.xlu1 %535  ;;  %v534_v5 = vpop.permute.xlu0 %533  ;;  %954 = vmatpush1.bf16.msra.mxu0 %v2621_v62 }
  0xa5   : > { %v544_v6 = vrot.slane %v536_v4, 4  ;;  %v543_v7 = vrot.slane %v534_v5, 4  ;;  %v2614_v8 = vcombine.high %v412_v2, %v447_v1  ;;  %v2613_v9 = vcombine.low %v412_v2, %v447_v1 }
  0xa7   : > { %v548_v10 = vsel %vm334_vm0, %v543_v7, %v544_v6  ;;  %992 = vmatprep.subr.bf16.mxu1 %v2614_v8 }
  0xa8   : > { %v550_v11 = vsel %vm549_vm7, %v534_v5, %v548_v10  ;;  %v571_v12 = vpop.permute.xlu1 %570  ;;  %v569_v13 = vpop.permute.xlu0 %568  ;;  %993 = vmatpush1.bf16.msra.mxu1 %v2613_v9 }
  0xa9   : > { %v579_v14 = vrot.slane %v571_v12, 4  ;;  %v578_v15 = vrot.slane %v569_v13, 4 }
  0xab   : > { %v583_v16 = vsel %vm334_vm0, %v578_v15, %v579_v14 }
  0xac   : > { %v585_v17 = vsel %vm584_vm8, %v569_v13, %v583_v16  ;;  %v2998_v18 = vpop.permute.xlu1 %502  ;;  %v3000_v19 = vpop.permute.xlu0 %467 }
  0xad   : > { %v510_v20 = vrot.slane %v2998_v18, 4  ;;  %v475_v21 = vrot.slane %v3000_v19, 4  ;;  %v2632_v22 = vcombine.high %v550_v11, %v585_v17  ;;  %v2631_v23 = vcombine.low %v550_v11, %v585_v17 }
  0xaf   : > { %v516_v24 = vsel %vm334_vm0, %v509_v53, %v510_v20  ;;  %v481_v25 = vsel %vm334_vm0, %v474_v45, %v475_v21  ;;  %955 = vmatprep.subr.bf16.mxu0 %v2632_v22  ;;  %v3033_v53 = vld [vmem:[%s3588_s1] sm:$0x3] }
  0xb0   : > { %v517_v26 = vsel %vm514_vm6, %v501_v51, %v516_v24  ;;  %v482_v27 = vsel %vm479_vm5, %v466_v43, %v481_v25  ;;  %v606_v28 = vpop.permute.xlu1 %605  ;;  %v604_v29 = vpop.permute.xlu0 %603  ;;  %956 = vmatpush1.bf16.msra.mxu0 %v2631_v23 }
  0xb1   : > { %v614_v30 = vrot.slane %v606_v28, 4  ;;  %v613_v31 = vrot.slane %v604_v29, 4  ;;  %v2624_v32 = vcombine.high %v482_v27, %v517_v26  ;;  %v2623_v37 = vcombine.low %v482_v27, %v517_v26 }
  0xb3   : > { %v618_v38 = vsel %vm334_vm0, %v613_v31, %v614_v30  ;;  %994 = vmatprep.subr.bf16.mxu1 %v2624_v32 }
  0xb4   : > { %v620_v39 = vsel %vm619_vm9, %v604_v29, %v618_v38  ;;  %v3014_v40 = vpop.permute.xlu1 %572  ;;  %v3016_v41 = vpop.permute.xlu0 %537  ;;  %995 = vmatpush1.bf16.msra.mxu1 %v2623_v37 }
  0xb5   : > { %v580_v42 = vrot.slane %v3014_v40, 4  ;;  %v545_v43 = vrot.slane %v3016_v41, 4  ;;  %v2642_v44 = vcombine.high %v620_v39, %v620_v39  ;;  %v2641_v45 = vcombine.low %v620_v39, %v620_v39 }
  0xb7   : > { %v586_v46 = vsel %vm334_vm0, %v579_v14, %v580_v42  ;;  %v551_v47 = vsel %vm334_vm0, %v544_v6, %v545_v43  ;;  %2651 = vmatprep.subr.msk.bf16.mxu0 %vm334_vm0, %v2642_v44  ;;  %v920_v48 = vsel %vm334_vm0, %v2641_v45, 0 }
  0xb8   : > { %v587_v49 = vsel %vm584_vm8, %v571_v12, %v586_v46  ;;  %v552_v50 = vsel %vm549_vm7, %v536_v4, %v551_v47  ;;  %v365_v51 = vpop.permute.xlu1 %364  ;;  %v326_v52 = vpop.permute.xlu0 %325  ;;  %958 = vmatpush1.bf16.msra.mxu0 %v920_v48 }
  0xb9   : > { %v371_v54 = vrot.slane %v365_v51, 4  ;;  %v332_v55 = vrot.slane %v326_v52, 4  ;;  %v2634_v56 = vcombine.high %v552_v50, %v587_v49  ;;  %v2633_v61 = vcombine.low %v552_v50, %v587_v49 }
  0xbb   : > { %v378_v62 = vsel %vm334_vm0, %v370_v35, %v371_v54  ;;  %v340_v63 = vsel %vm334_vm0, %v331_v36, %v332_v55  ;;  %996 = vmatprep.subr.bf16.mxu1 %v2634_v56  ;;  %2652 = vmatmul.mubr.msk.bf16.vlgmr.msra.gmra.mrb[0].mxu0 %vm915_vm10, %v3033_v53 }
  0xbc   : > { %v379_v0 = vsel %vm374_vm1, %v2962_v33, %v378_v62  ;;  %v341_v1 = vsel %vm336_vm2, %v2964_v34, %v340_v63  ;;  %v400_v2 = vpop.permute.xlu1 %399  ;;  %v3047_v4 = vpop.permute.xlu0 %607  ;;  %997 = vmatpush1.bf16.msra.mxu1 %v2633_v61  ;;  %1063 = vmatprep.mubr.bf16.mxu0 %v2827_v3 }
  0xbd   : > { %v406_v35 = vrot.slane %v400_v2, 4  ;;  %v615_v5 = vrot.slane %v3047_v4, 4  ;;  %v2605_v36 = vcombine.low %v341_v1, %v379_v0  ;;  %v2606_v6 = vcombine.high %v341_v1, %v379_v0 }
  0xbf   : > { %v413_v7 = vsel %vm334_vm0, %v405_v60, %v406_v35  ;;  %v621_v33 = vsel %vm334_vm0, %v614_v30, %v615_v5  ;;  %1031 = vmatprep.subr.bf16.mxu0 %v2606_v6 }
  0xc0   : > { %v414_v34 = vsel %vm409_vm3, %v2982_v58, %v413_v7  ;;  %v622_v8 = vsel %vm619_vm9, %v606_v28, %v621_v33  ;;  %v328_v9 = vpop.permute.xlu1 %327  ;;  %v435_v10 = vpop.permute.xlu0 %434  ;;  %1032 = vmatpush1.bf16.msra.mxu0 %v2605_v36 }
  0xc1   : > { %v333_v12 = vrot.slane %v328_v9, 4  ;;  %v441_v60 = vrot.slane %v435_v10, 4  ;;  %v2644_v13 = vcombine.high %v622_v8, %v622_v8  ;;  %v2643_v14 = vcombine.low %v622_v8, %v622_v8 }
  0xc3   : > { %v342_v15 = vsel %vm334_vm0, %v332_v55, %v333_v12  ;;  %v344_v16 = vsel %vm336_vm2, %v328_v9, %v333_v12  ;;  %v448_v58 = vsel %vm334_vm0, %v440_v59, %v441_v60  ;;  %2653 = vmatprep.subr.msk.bf16.mxu1 %vm334_vm0, %v2644_v13  ;;  %v926_v17 = vsel %vm334_vm0, %v2643_v14, 0 }
  0xc4   : > { %v343_v22 = vsel %vm336_vm2, %v326_v52, %v342_v15  ;;  %357 = vst.msk [vmem:[#allocation3 + $0x20] sm:$0xff] %vm3061_vm12, %v344_v16  ;;  %v449_v23 = vsel %vm444_vm4, %v2980_v57, %v448_v58  ;;  %v470_v24 = vpop.permute.xlu1 %469  ;;  %v367_v25 = vpop.permute.xlu0 %366  ;;  %999 = vmatpush1.bf16.msra.mxu1 %v926_v17 }
  0xc5   : > { %v476_v26 = vrot.slane %v470_v24, 4  ;;  %v372_v27 = vrot.slane %v367_v25, 4  ;;  %v2615_v28 = vcombine.low %v414_v34, %v449_v23  ;;  %v2616_v29 = vcombine.high %v414_v34, %v449_v23 }
  0xc7   : > { %v483_v59 = vsel %vm334_vm0, %v475_v21, %v476_v26  ;;  %v380_v30 = vsel %vm334_vm0, %v371_v54, %v372_v27  ;;  %v382_v31 = vsel %vm374_vm1, %v367_v25, %v372_v27  ;;  %2654 = vmatmul.mubr.msk.bf16.vlgmr.msra.gmra.mrb[0].mxu1 %vm915_vm10, %v3033_v53  ;;  %1033 = vmatprep.subr.bf16.mxu0 %v2616_v29 }
  0xc8   : > { %v484_v57 = vsel %vm479_vm5, %v3000_v19, %v483_v59  ;;  %v381_v32 = vsel %vm374_vm1, %v365_v51, %v380_v30  ;;  %392 = vst.msk [vmem:[#allocation3 + $0x48] sm:$0xff] %vm3061_vm12, %v382_v31  ;;  %v402_v37 = vpop.permute.xlu1 %401  ;;  %v505_v38 = vpop.permute.xlu0 %504  ;;  %1034 = vmatpush1.bf16.msra.mxu0 %v2615_v28  ;;  %1104 = vmatprep.mubr.bf16.mxu1 %v2827_v3 }
  0xc9   : > { %v407_v21 = vrot.slane %v402_v37, 4  ;;  %v511_v39 = vrot.slane %v505_v38, 4  ;;  %v2607_v44 = vcombine.low %v343_v22, %v381_v32  ;;  %v2608_v45 = vcombine.high %v343_v22, %v381_v32 }
  0xcb   : > { %v415_v46 = vsel %vm334_vm0, %v406_v35, %v407_v21  ;;  %v417_v47 = vsel %vm409_vm3, %v402_v37, %v407_v21  ;;  %v518_v19 = vsel %vm334_vm0, %v510_v20, %v511_v39  ;;  %1072 = vmatprep.subr.bf16.mxu1 %v2608_v45 }
  0xcc   : > { %v416_v48 = vsel %vm409_vm3, %v400_v2, %v415_v46  ;;  %427 = vst.msk [vmem:[#allocation3 + $0x70] sm:$0xff] %vm3061_vm12, %v417_v47  ;;  %v519_v49 = vsel %vm514_vm6, %v2998_v18, %v518_v19  ;;  %v540_v50 = vpop.permute.xlu1 %539  ;;  %v437_v51 = vpop.permute.xlu0 %436  ;;  %1073 = vmatpush1.bf16.msra.mxu1 %v2607_v44 }
  0xcd   : > { %v546_v52 = vrot.slane %v540_v50, 4  ;;  %v442_v54 = vrot.slane %v437_v51, 4  ;;  %v2625_v55 = vcombine.low %v484_v57, %v519_v49  ;;  %v2626_v56 = vcombine.high %v484_v57, %v519_v49 }
  0xcf   : > { %v553_v20 = vsel %vm334_vm0, %v545_v43, %v546_v52  ;;  %v450_v61 = vsel %vm334_vm0, %v441_v60, %v442_v54  ;;  %v452_v62 = vsel %vm444_vm4, %v437_v51, %v442_v54  ;;  %1035 = vmatprep.subr.bf16.mxu0 %v2626_v56  ;;  %v2754_v32 = vld [vmem:[#allocation3 + $0x24] ss:$40 sps:$4 sm:$0xff]   ;;  %v2752_v45 = vld [vmem:[#allocation3 + $0x20] ss:$40 sps:$4 sm:$0xff]  }
  0xd0   : > { %v554_v63 = vsel %vm549_vm7, %v3016_v41, %v553_v20  ;;  %v451_v18 = vsel %vm444_vm4, %v435_v10, %v450_v61  ;;  %462 = vst.msk [vmem:[#allocation3 + $0x98] sm:$0xff] %vm3061_vm12, %v452_v62  ;;  %v472_v0 = vpop.permute.xlu1 %471  ;;  %v575_v1 = vpop.permute.xlu0 %574  ;;  %1036 = vmatpush1.bf16.msra.mxu0 %v2625_v55  ;;  %v1166_v62 = vlaneseq  ;;  %vm1298_vm4 = vcmask 1041408  }
  0xd1   : > { %v477_v2 = vrot.slane %v472_v0, 4  ;;  %v581_v35 = vrot.slane %v575_v1, 4  ;;  %v2617_v36 = vcombine.low %v416_v48, %v451_v18  ;;  %v2618_v43 = vcombine.high %v416_v48, %v451_v18 }
  0xd3   : > { %v485_v6 = vsel %vm334_vm0, %v476_v26, %v477_v2  ;;  %v487_v7 = vsel %vm479_vm5, %v472_v0, %v477_v2  ;;  %v588_v41 = vsel %vm334_vm0, %v580_v42, %v581_v35  ;;  %1074 = vmatprep.subr.bf16.mxu1 %v2618_v43 }
  0xd4   : > { %v486_v33 = vsel %vm479_vm5, %v470_v24, %v485_v6  ;;  %497 = vst.msk [vmem:[#allocation3 + $0xc0] sm:$0xff] %vm3061_vm12, %v487_v7  ;;  %v589_v34 = vsel %vm584_vm8, %v3014_v40, %v588_v41  ;;  %v610_v8 = vpop.permute.xlu1 %609  ;;  %v507_v9 = vpop.permute.xlu0 %506  ;;  %1075 = vmatpush1.bf16.msra.mxu1 %v2617_v36  ;;  %vm1299_vm5 = vmor %vm1228_vm14, %vm1298_vm4  ;;  %vm1439_vm14 = vcmask 1043458  }
  0xd5   : > { %v616_v10 = vrot.slane %v610_v8, 4  ;;  %v512_v12 = vrot.slane %v507_v9, 4  ;;  %v2635_v60 = vcombine.low %v554_v63, %v589_v34  ;;  %v2636_v13 = vcombine.high %v554_v63, %v589_v34 }
  0xd6   : > { %v3162_v63 = vshrl.u32 %v1166_v62, 7 }
  0xd7   : > { %v623_v42 = vsel %vm334_vm0, %v615_v5, %v616_v10  ;;  %v520_v14 = vsel %vm334_vm0, %v511_v39, %v512_v12  ;;  %v522_v15 = vsel %vm514_vm6, %v507_v9, %v512_v12  ;;  %1037 = vmatprep.subr.bf16.mxu0 %v2636_v13  ;;  %v2757_v47 = vld [vmem:[#allocation3 + $0x74] ss:$40 sps:$4 sm:$0xff]   ;;  %v2755_v49 = vld [vmem:[#allocation3 + $0x70] ss:$40 sps:$4 sm:$0xff]   ;;  %v2828_v12 = vmov 1983009808  }
  0xd8   : > { %v624_v16 = vsel %vm619_vm9, %v3047_v4, %v623_v42  ;;  %v521_v40 = vsel %vm514_vm6, %v505_v38, %v520_v14  ;;  %532 = vst.msk [vmem:[#allocation3 + $0xe8] sm:$0xff] %vm3061_vm12, %v522_v15  ;;  %v577_v58 = vpop.permute.xlu1 %576  ;;  %v542_v17 = vpop.permute.xlu0 %541  ;;  %1038 = vmatpush1.bf16.msra.mxu0 %v2635_v60  ;;  %v1168_v18 = vsub.s32 0, %v3162_v63  ;;  %v1254_v60 = vunpack.c.l.s4 %v2828_v12 }
  0xd9   : > { %v582_v22 = vrot.slane %v577_v58, 4  ;;  %v547_v23 = vrot.slane %v542_v17, 4  ;;  %v2646_v24 = vcombine.high %v624_v16, %v624_v16  ;;  %v2627_v5 = vcombine.low %v486_v33, %v521_v40 }
  0xda   : > { %v2628_v25 = vcombine.high %v486_v33, %v521_v40  ;;  %v2645_v26 = vcombine.low %v624_v16, %v624_v16  ;;  %v1176_v42 = vsub.s32 2, %v3162_v63  ;;  %v1180_v14 = vsub.s32 3, %v3162_v63 }
  0xdb   : > { %v590_v27 = vsel %vm334_vm0, %v581_v35, %v582_v22  ;;  %v592_v28 = vsel %vm584_vm8, %v577_v58, %v582_v22  ;;  %v555_v4 = vsel %vm334_vm0, %v546_v52, %v547_v23  ;;  %v557_v29 = vsel %vm549_vm7, %v542_v17, %v547_v23  ;;  %2655 = vmatprep.subr.msk.bf16.mxu0 %vm334_vm0, %v2646_v24 }
  0xdc   : > { %v591_v59 = vsel %vm584_vm8, %v575_v1, %v590_v27  ;;  %602 = vst.msk [vmem:[#allocation3 + $0x138] sm:$0xff] %vm3061_vm12, %v592_v28  ;;  %v556_v30 = vsel %vm549_vm7, %v540_v50, %v555_v4  ;;  %567 = vst.msk [vmem:[#allocation3 + $0x110] sm:$0xff] %vm3061_vm12, %v557_v29  ;;  %v612_v31 = vpop.permute.xlu0 %611  ;;  %1076 = vmatprep.subr.bf16.mxu1 %v2628_v25  ;;  %v932_v57 = vsel %vm334_vm0, %v2645_v26, 0  ;;  %v3170_v1 = vld [vmem:[%s3592_s5] sm:$0xff]  ;;  %v1255_v16 = vunpack.c.0.s8 %v1254_v60 }
  0xdd   : > { %v617_v37 = vrot.slane %v612_v31, 4  ;;  %1040 = vmatpush1.bf16.msra.mxu0 %v932_v57  ;;  %1077 = vmatpush1.bf16.msra.mxu1 %v2627_v5  ;;  %v2637_v38 = vcombine.low %v556_v30, %v591_v59  ;;  %v2638_v21 = vcombine.high %v556_v30, %v591_v59  ;;  %v3177_v43 = vrot.slane %v3170_v1, %v1168_v18 }
  0xde   : > { %1113 = vmatprep.subr.bf16.mxu0 %v2754_v32  ;;  %v3191_v58 = vrot.slane %v3170_v1, %v1176_v42  ;;  %v3195_v23 = vrot.slane %v3170_v1, %v1180_v14  ;;  %v3198_v26 = vsub.s32 %v1255_v16, %v3162_v63  ;;  %v1196_v62 = vsub.s32 7, %v3162_v63 }
  0xdf   : > { %v625_v39 = vsel %vm334_vm0, %v616_v10, %v617_v37  ;;  %v627_v44 = vsel %vm619_vm9, %v612_v31, %v617_v37  ;;  %1078 = vmatprep.subr.bf16.mxu1 %v2638_v21  ;;  %v2760_v51 = vld [vmem:[#allocation3 + $0xc4] ss:$40 sps:$4 sm:$0xff]   ;;  %v2758_v11 = vld [vmem:[#allocation3 + $0xc0] ss:$40 sps:$4 sm:$0xff]   ;;  %v1184_v37 = vsub.s32 4, %v3162_v63  ;;  %v1188_v21 = vsub.s32 5, %v3162_v63 }
  0xe0   : > { %v626_v46 = vsel %vm619_vm9, %v610_v8, %v625_v39  ;;  %637 = vst.msk [vmem:[#allocation3 + $0x160] sm:$0xff] %vm3061_vm12, %v627_v44  ;;  %2656 = vmatmul.mubr.msk.bf16.vlgmr.msra.gmra.mrb[4].mxu0 %vm915_vm10, %v3033_v53  ;;  %vm1378_vm6 = vcmask 29700   ;;  %vm1360_vm8 = vcmask 285696   ;;  %vm1421_vm9 = vcmask 277504  }
  0xe1   : > { %1079 = vmatpush1.bf16.msra.mxu1 %v2637_v38  ;;  %1114 = vmatpush1.bf16.msra.mxu0 %v2752_v45  ;;  %v2648_v19 = vcombine.high %v626_v46, %v626_v46  ;;  %v2647_v48 = vcombine.low %v626_v46, %v626_v46  ;;  %v3214_v46 = vrot.slane %v3170_v1, %v1184_v37  ;;  %vm3295_vm7 = vmor %vm1378_vm6, %vm1298_vm4  ;;  %vm1565_vm12 = vcmask 1039360  }
  0xe2   : > { %1115 = vmatprep.subr.bf16.mxu0 %v2757_v47  ;;  %1145 = vmatprep.mubr.bf16.mxu0 %v2827_v3 }
  0xe3   : > { %2657 = vmatprep.subr.msk.bf16.mxu1 %vm334_vm0, %v2648_v19  ;;  %v938_v50 = vsel %vm334_vm0, %v2647_v48, 0  ;;  %v2763_v52 = vld [vmem:[#allocation3 + $0x114] ss:$40 sps:$4 sm:$0xff]   ;;  %v2761_v55 = vld [vmem:[#allocation3 + $0x110] ss:$40 sps:$4 sm:$0xff]  }
  0xe5   : > { %1081 = vmatpush1.bf16.msra.mxu1 %v938_v50  ;;  %1116 = vmatpush1.bf16.msra.mxu0 %v2755_v49  ;;  %v3219_v50 = vrot.slane %v3170_v1, %v1188_v21 }
  0xe6   : > { %1117 = vmatprep.subr.bf16.mxu0 %v2760_v51 }
  0xe7   : > { %v683_v54 = vld [vmem:[#allocation3 + $0x160] sm:$0xff] }
  0xe8   : > { %2658 = vmatmul.mubr.msk.bf16.vlgmr.msra.gmra.mrb[4].mxu1 %vm915_vm10, %v3033_v53  ;;  %v2650_v56 = vcombine.high %v683_v54, %v683_v54  ;;  %v2649_v20 = vcombine.low %v683_v54, %v683_v54 }
  0xe9   : > { %1118 = vmatpush1.bf16.msra.mxu0 %v2758_v11  ;;  %1922 = vmatprep.mubr.bf16.mxu1 %v2827_v3  ;;  %v3165_v0 = vpop.permute.xlu1 %687 }
  0xea   : > { %1119 = vmatprep.subr.bf16.mxu0 %v2763_v52  ;;  %v944_v61 = vsel %vm334_vm0, %v2649_v20, 0  ;;  %v1192_v20 = vsub.s32 6, %v3162_v63 }
  0xed   : > { %1120 = vmatpush1.bf16.msra.mxu0 %v2761_v55 }
  0xee   : > { %2659 = vmatprep.subr.msk.bf16.mxu0 %vm334_vm0, %v2650_v56 }
  0xf1   : > { %1122 = vmatpush1.bf16.msra.mxu0 %v944_v61 }
  0xf4   : > { %2660 = vmatmul.mubr.msk.bf16.vlgmr.msra.gmra.mrb[8].mxu0 %vm915_vm10, %v3033_v53  ;;  %v1172_v53 = vsub.s32 1, %v3162_v63  ;;  %vm1459_vm10 = vcmask 269312  }
  0xf5   : > { %2004 = vmatprep.mubr.bf16.mxu0 %v2827_v3 }
  0xf6   : > { %v3183_v41 = vrot.slane %v3170_v1, %v1172_v53 }
 0x18e   : > { %v983_v2 = vpop.f32.mrb[0].mxu0 }
 0x18f   : > { %v985_v35 = vpop.f32.mrb[1].mxu0  ;;  %v984_v36 = vadd.f32 %v983_v2, %v3165_v0 }
 0x190   : > { %v987_v6 = vpop.f32.mrb[2].mxu0  ;;  %v986_v7 = vadd.f32 %v985_v35, %v3165_v0 }
 0x191   : > { %v988_v33 = vpop.f32.mrb[3].mxu0  ;;  %v1154_v34 = vmax.f32 %v984_v36, 0.0  ;;  %v3234_v6 = vrot.slane %v3170_v1, %v1192_v20 }
 0x192   : > { %v1155_v8 = vmax.f32 %v986_v7, 0.0 }
 0x193   : > { %v1216_v9 = vmul.f32 %v3177_v43, %v1154_v34 }
 0x194   : > { %v1217_v10 = vmul.f32 %v3183_v41, %v1155_v8  ;;  %v3238_v8 = vrot.slane %v3170_v1, %v1196_v62 }
 0x196   : > { %v2661_v13 = vpack.c.bf16 %v1217_v10, %v1216_v9 }
 0x198   : > { %v1259_v59 = vrot.slane %v2661_v13, %v3198_v26 }
 0x19a   : > { %v1024_v15 = vpop.f32.mrb[0].mxu1 }
 0x19b   : > { %v1025_v40 = vadd.f32 %v1024_v15, %v3165_v0  ;;  %v1026_v17 = vpop.f32.mrb[1].mxu1 }
 0x19c   : > { %v1027_v22 = vadd.f32 %v1026_v17, %v3165_v0  ;;  %v1028_v24 = vpop.f32.mrb[2].mxu1 }
 0x19d   : > { %v1156_v5 = vmax.f32 %v1025_v40, 0.0  ;;  %v1029_v25 = vpop.f32.mrb[3].mxu1  ;;  %v308_v40 = vld [vmem:[%s3592_s5 + $0x8] sm:$0x3] }
 0x19e   : > { %v1157_v27 = vmax.f32 %v1027_v22, 0.0 }
 0x19f   : > { %v1218_v28 = vmul.f32 %v3191_v58, %v1156_v5  ;;  %v3259_v5 = vrot.slane %v308_v40, %v1168_v18 }
 0x1a0   : > { %v1219_v4 = vmul.f32 %v3195_v23, %v1157_v27 }
 0x1a2   : > { %v2662_v29 = vpack.c.bf16 %v1219_v4, %v1218_v28  ;;  %v3264_v28 = vrot.slane %v308_v40, %v1172_v53 }
 0x1a4   : > { %v1266_v30 = vrot.slane %v2662_v29, %v3198_v26 }
 0x1a6   : > { %v1267_v31 = vcombine.low %v1259_v59, %v1266_v30 }
 0x1a8   : > { %1296 = vst [vmem:[#allocation2 + $0x2] sm:$0xff] %v1267_v31 }
 0x1af   : > { %v1301_v57 = vld [vmem:[#allocation2] sm:$0xff] }
 0x1b0   : > { %v1314_v32 = vrot.slane %v1301_v57, %v3198_v26  ;;  %v1307_v38 = vcombine.high %v1301_v57, %v1301_v57  ;;  %v1381_v33 = vcombine.low %v1301_v57, %v1301_v57 }
 0x1b2   : > { %1407 = vrot.lane.b32.xlu1 %v1314_v32, %s2829_s26  ;;  %1344 = vrot.lane.b32.xlu0 %v1314_v32, %s2830_s29  ;;  %v3210_v39 = vrot.slane %v1307_v38, %v3198_v26  ;;  %v1525_v19 = vrot.slane %v1314_v32, 4  ;;  %v1388_v42 = vrot.slane %v1381_v33, %v3198_v26 }
 0x1b3   : > { %v1065_v44 = vpop.f32.mrb[4].mxu0 }
 0x1b4   : > { %v1066_v45 = vadd.f32 %v1065_v44, %v3165_v0  ;;  %v1067_v47 = vpop.f32.mrb[5].mxu0  ;;  %v1526_v48 = vrot.slane %v3210_v39, 4 }
 0x1b5   : > { %v1068_v49 = vadd.f32 %v1067_v47, %v3165_v0  ;;  %v1069_v51 = vpop.f32.mrb[6].mxu0 }
 0x1b6   : > { %v1158_v11 = vmax.f32 %v1066_v45, 0.0  ;;  %1480 = vrot.lane.b32.xlu1 %v1314_v32, %s2831_s30  ;;  %1443 = vrot.lane.b32.xlu0 %v1314_v32, %s2832_s9  ;;  %v1070_v52 = vpop.f32.mrb[7].mxu0  ;;  %v1531_v54 = vsel %vm334_vm0, %v1525_v19, %v1526_v48 }
 0x1b7   : > { %v1159_v55 = vmax.f32 %v1068_v49, 0.0  ;;  %1541 = vst [vmem:[#allocation4 + $0x50] sm:$0x33] %v1531_v54 }
 0x1b8   : > { %v1220_v56 = vmul.f32 %v3214_v46, %v1158_v11 }
 0x1b9   : > { %v1221_v61 = vmul.f32 %v3219_v50, %v1159_v55 }
 0x1ba   : > { %1548 = vrot.lane.b32.xlu1 %v1314_v32, %s2833_s10  ;;  %1585 = vrot.lane.b32.xlu0 %v1314_v32, %s2819_s12 }
 0x1bb   : > { %v2663_v2 = vpack.c.bf16 %v1221_v61, %v1220_v56  ;;  %v1106_v35 = vpop.f32.mrb[4].mxu1 }
 0x1bc   : > { %v1107_v36 = vadd.f32 %v1106_v35, %v3165_v0  ;;  %v1108_v7 = vpop.f32.mrb[5].mxu1 }
 0x1bd   : > { %v1109_v34 = vadd.f32 %v1108_v7, %v3165_v0  ;;  %v1110_v9 = vpop.f32.mrb[6].mxu1  ;;  %v1276_v15 = vrot.slane %v2663_v2, %v3198_v26 }
 0x1be   : > { %v1160_v10 = vmax.f32 %v1107_v36, 0.0  ;;  %v1111_v12 = vpop.f32.mrb[7].mxu1  ;;  %1625 = vrot.lane.b32.xlu1 %v1314_v32, %s2818_s11  ;;  %1661 = vrot.lane.b32.xlu0 %v1314_v32, %s2820_s13 }
 0x1bf   : > { %v1161_v60 = vmax.f32 %v1109_v34, 0.0 }
 0x1c0   : > { %v1222_v13 = vmul.f32 %v3234_v6, %v1160_v10 }
 0x1c1   : > { %v1223_v14 = vmul.f32 %v3238_v8, %v1161_v60 }
 0x1c2   : > { %1405 = vrot.lane.b32.xlu0 %v1388_v42, %s2829_s26  ;;  %1346 = vrot.lane.b32.xlu1 %v3210_v39, %s2830_s29 }
 0x1c3   : > { %v2664_v1 = vpack.c.bf16 %v1223_v14, %v1222_v13 }
 0x1c5   : > { %v1283_v16 = vrot.slane %v2664_v1, %v3198_v26 }
 0x1c6   : > { %1478 = vrot.lane.b32.xlu0 %v1388_v42, %s2831_s30  ;;  %1445 = vrot.lane.b32.xlu1 %v3210_v39, %s2832_s9 }
 0x1c7   : > { %v1284_v17 = vcombine.low %v1276_v15, %v1283_v16  ;;  %v1147_v22 = vpop.f32.mrb[8].mxu0 }
 0x1c8   : > { %v1148_v24 = vadd.f32 %v1147_v22, %v3165_v0  ;;  %v1149_v25 = vpop.f32.mrb[9].mxu0 }
 0x1c9   : > { %1297 = vst [vmem:[#allocation2 + $0xa] sm:$0xff] %v1284_v17  ;;  %v1150_v27 = vadd.f32 %v1149_v25, %v3165_v0  ;;  %v1151_v4 = vpop.f32.mrb[10].mxu0 }
 0x1ca   : > { %v1162_v29 = vmax.f32 %v1148_v24, 0.0  ;;  %1546 = vrot.lane.b32.xlu0 %v1388_v42, %s2833_s10  ;;  %1587 = vrot.lane.b32.xlu1 %v3210_v39, %s2819_s12  ;;  %v1152_v59 = vpop.f32.mrb[11].mxu0 }
 0x1cb   : > { %v1163_v30 = vmax.f32 %v1150_v27, 0.0 }
 0x1cc   : > { %v1224_v18 = vmul.f32 %v3259_v5, %v1162_v29 }
 0x1cd   : > { %v1225_v31 = vmul.f32 %v3264_v28, %v1163_v30 }
 0x1ce   : > { %1623 = vrot.lane.b32.xlu0 %v1388_v42, %s2818_s11  ;;  %1663 = vrot.lane.b32.xlu1 %v3210_v39, %s2820_s13 }
 0x1cf   : > { %v2665_v63 = vpack.c.bf16 %v1225_v31, %v1224_v18 }
 0x1d0   : > { %v1302_v0 = vld [vmem:[#allocation2 + $0x8] sm:$0xff] }
 0x1d1   : > { %v1329_v53 = vrot.slane %v1302_v0, %v3198_v26  ;;  %v1292_v57 = vrot.slane %v2665_v63, %v3198_v26  ;;  %v1322_v32 = vcombine.high %v1302_v0, %v1302_v0  ;;  %v1389_v39 = vcombine.low %v1302_v0, %v1302_v0 }
 0x1d3   : > { %v1527_v37 = vrot.slane %v1329_v53, 4  ;;  %1300 = vst.msk [vmem:[#allocation2 + $0x12] sm:$0xf] %vm1299_vm5, %v1292_v57  ;;  %1411 = vrot.lane.b32.xlu1 %v1329_v53, %s2829_s26  ;;  %1348 = vrot.lane.b32.xlu0 %v1329_v53, %s2830_s29  ;;  %v1336_v38 = vrot.slane %v1322_v32, %v3198_v26  ;;  %v1396_v55 = vrot.slane %v1389_v39, %v3198_v26  ;;  %vm3472_vm5 = vmor %vm1440_vm15, %vm1439_vm14 }
 0x1d5   : > { %v1532_v21 = vsel %vm334_vm0, %v1526_v48, %v1527_v37  ;;  %v1528_v44 = vrot.slane %v1336_v38, 4 }
 0x1d6   : > { %1542 = vst [vmem:[#allocation4 + $0x58] sm:$0x33] %v1532_v21 }
 0x1d7   : > { %1484 = vrot.lane.b32.xlu1 %v1329_v53, %s2831_s30  ;;  %1447 = vrot.lane.b32.xlu0 %v1329_v53, %s2832_s9  ;;  %v1533_v45 = vsel %vm334_vm0, %v1527_v37, %v1528_v44 }
 0x1d8   : > { %1543 = vst [vmem:[#allocation4 + $0x60] sm:$0x33] %v1533_v45 }
 0x1da   : > { %v1303_v47 = vld [vmem:[#allocation2 + $0x10] sm:$0xff] }
 0x1db   : > { %1552 = vrot.lane.b32.xlu1 %v1329_v53, %s2833_s10  ;;  %1589 = vrot.lane.b32.xlu0 %v1329_v53, %s2819_s12  ;;  %v1343_v19 = vrot.slane %v1303_v47, %v3198_v26  ;;  %v1517_v49 = vcombine.high %v1303_v47, %v1303_v47  ;;  %v1397_v20 = vcombine.low %v1303_v47, %v1303_v47 }
 0x1dd   : > { %v1524_v48 = vrot.slane %v1517_v49, %v3198_v26  ;;  %v1529_v51 = vrot.slane %v1343_v19, 4  ;;  %v1404_v61 = vrot.slane %v1397_v20, %v3198_v26  ;;  %v1725_v26 = vld [vmem:[%s3591_s4] sm:$0xf] }
 0x1df   : > { %1629 = vrot.lane.b32.xlu1 %v1329_v53, %s2818_s11  ;;  %1665 = vrot.lane.b32.xlu0 %v1329_v53, %s2820_s13  ;;  %v1530_v11 = vrot.slane %v1524_v48, 4  ;;  %v1534_v52 = vsel %vm334_vm0, %v1528_v44, %v1529_v51 }
 0x1e0   : > { %1544 = vst [vmem:[#allocation4 + $0x68] sm:$0x33] %v1534_v52 }
 0x1e1   : > { %v1535_v56 = vsel %vm334_vm0, %v1529_v51, %v1530_v11 }
 0x1e2   : > { %1545 = vst.msk [vmem:[#allocation4 + $0x70] sm:$0x33] %vm3295_vm7, %v1535_v56 }
 0x1e3   : > { %1409 = vrot.lane.b32.xlu0 %v1396_v55, %s2829_s26  ;;  %1350 = vrot.lane.b32.xlu1 %v1336_v38, %s2830_s29 }
 0x1e7   : > { %1482 = vrot.lane.b32.xlu0 %v1396_v55, %s2831_s30  ;;  %1449 = vrot.lane.b32.xlu1 %v1336_v38, %s2832_s9 }
 0x1eb   : > { %1550 = vrot.lane.b32.xlu0 %v1396_v55, %s2833_s10  ;;  %1591 = vrot.lane.b32.xlu1 %v1336_v38, %s2819_s12 }
 0x1ef   : > { %1627 = vrot.lane.b32.xlu0 %v1396_v55, %s2818_s11  ;;  %1667 = vrot.lane.b32.xlu1 %v1336_v38, %s2820_s13 }
 0x1f3   : > { %1352 = vrot.lane.b32.xlu0 %v1343_v19, %s2830_s29  ;;  %1593 = vrot.lane.b32.xlu1 %v1343_v19, %s2819_s12 }
 0x1f7   : > { %1451 = vrot.lane.b32.xlu0 %v1343_v19, %s2832_s9  ;;  %1413 = vrot.lane.b32.xlu1 %v1404_v61, %s2829_s26 }
 0x1fb   : > { %1488 = vrot.lane.b32.xlu0 %v1343_v19, %s2831_s30  ;;  %1486 = vrot.lane.b32.xlu1 %v1404_v61, %s2831_s30 }
 0x1ff   : > { %1556 = vrot.lane.b32.xlu0 %v1343_v19, %s2833_s10  ;;  %1554 = vrot.lane.b32.xlu1 %v1404_v61, %s2833_s10 }
 0x203   : > { %1633 = vrot.lane.b32.xlu0 %v1343_v19, %s2818_s11  ;;  %1631 = vrot.lane.b32.xlu1 %v1404_v61, %s2818_s11 }
 0x207   : > { %1595 = vrot.lane.b32.xlu0 %v1524_v48, %s2819_s12  ;;  %1669 = vrot.lane.b32.xlu1 %v1343_v19, %s2820_s13 }
 0x20b   : > { %1671 = vrot.lane.b32.xlu0 %v1524_v48, %s2820_s13  ;;  %1728 = vperm.xlu1 %2750, %v1725_v26  }
 0x224   : > { %v3328_v62 = vpop.permute.xlu1 %1407  ;;  %v1345_v2 = vpop.permute.xlu0 %1344 }
 0x225   : > { %v1416_v60 = vrot.slane %v3328_v62, 4  ;;  %v1354_v13 = vrot.slane %v1345_v2, 4 }
 0x228   : > { %v3330_v35 = vpop.permute.xlu1 %1480  ;;  %v1444_v36 = vpop.permute.xlu0 %1443 }
 0x229   : > { %v1491_v24 = vrot.slane %v3330_v35, 4  ;;  %v1453_v25 = vrot.slane %v1444_v36, 4 }
 0x22c   : > { %v3332_v7 = vpop.permute.xlu1 %1548  ;;  %v1586_v33 = vpop.permute.xlu0 %1585 }
 0x22d   : > { %v1559_v0 = vrot.slane %v3332_v7, 4  ;;  %v1597_v53 = vrot.slane %v1586_v33, 4 }
 0x230   : > { %v3334_v34 = vpop.permute.xlu1 %1625  ;;  %v1662_v9 = vpop.permute.xlu0 %1661 }
 0x231   : > { %v1636_v19 = vrot.slane %v3334_v34, 4  ;;  %v1673_v49 = vrot.slane %v1662_v9, 4 }
 0x234   : > { %v1347_v10 = vpop.permute.xlu1 %1346  ;;  %v1406_v12 = vpop.permute.xlu0 %1405 }
 0x235   : > { %v1355_v42 = vrot.slane %v1347_v10, 4  ;;  %v1415_v14 = vrot.slane %v1406_v12, 4 }
 0x237   : > { %v1359_v1 = vsel %vm334_vm0, %v1354_v13, %v1355_v42  ;;  %v1420_v15 = vsel %vm334_vm0, %v1415_v14, %v1416_v60 }
 0x238   : > { %v1361_v16 = vsel %vm1360_vm8, %v1345_v2, %v1359_v1  ;;  %v1422_v40 = vsel %vm1421_vm9, %v1406_v12, %v1420_v15  ;;  %v1446_v17 = vpop.permute.xlu1 %1445  ;;  %v1479_v22 = vpop.permute.xlu0 %1478 }
 0x239   : > { %1374 = vst [vmem:[#allocation4] sm:$0x33] %v1361_v16  ;;  %1435 = vst [vmem:[#allocation4] sm:$0xcc] %v1422_v40  ;;  %v1454_v27 = vrot.slane %v1446_v17, 4  ;;  %v1490_v4 = vrot.slane %v1479_v22, 4 }
 0x23b   : > { %v1458_v29 = vsel %vm334_vm0, %v1453_v25, %v1454_v27  ;;  %v1496_v59 = vsel %vm334_vm0, %v1490_v4, %v1491_v24 }
 0x23c   : > { %v1460_v30 = vsel %vm1459_vm10, %v1444_v36, %v1458_v29  ;;  %v1498_v18 = vsel %vm1497_vm11, %v1479_v22, %v1496_v59  ;;  %v1588_v31 = vpop.permute.xlu1 %1587  ;;  %v1547_v63 = vpop.permute.xlu0 %1546 }
 0x23d   : > { %1473 = vst [vmem:[#allocation4 + $0x28] sm:$0x33] %v1460_v30  ;;  %1512 = vst [vmem:[#allocation4 + $0x28] sm:$0xcc] %v1498_v18  ;;  %v1598_v57 = vrot.slane %v1588_v31, 4  ;;  %v1558_v32 = vrot.slane %v1547_v63, 4 }
 0x23f   : > { %v1603_v37 = vsel %vm334_vm0, %v1597_v53, %v1598_v57  ;;  %v1564_v38 = vsel %vm334_vm0, %v1558_v32, %v1559_v0 }
 0x240   : > { %v1604_v21 = vsel %vm336_vm2, %v1603_v37, %v1588_v31  ;;  %v1566_v44 = vsel %vm1565_vm12, %v1564_v38, %v3332_v7  ;;  %v1664_v45 = vpop.permute.xlu1 %1663  ;;  %v1624_v47 = vpop.permute.xlu0 %1623  ;;  %v3385_v31 = vld [vmem:[%s3590_s3] sm:$0x3] }
 0x241   : > { %1618 = vst [vmem:[#allocation4 + $0x78] sm:$0x33] %v1604_v21  ;;  %1580 = vst [vmem:[#allocation4 + $0x50] sm:$0xcc] %v1566_v44  ;;  %v1674_v39 = vrot.slane %v1664_v45, 4  ;;  %v1635_v48 = vrot.slane %v1624_v47, 4 }
 0x243   : > { %v1679_v51 = vsel %vm334_vm0, %v1673_v49, %v1674_v39  ;;  %v1641_v11 = vsel %vm334_vm0, %v1635_v48, %v1636_v19 }
 0x244   : > { %v1680_v52 = vsel %vm409_vm3, %v1679_v51, %v1664_v45  ;;  %v1642_v55 = vsel %vm374_vm1, %v1641_v11, %v3334_v34  ;;  %v2770_v56 = vld [vmem:[#allocation4] ss:$40 sps:$4 sm:$0xff]   ;;  %v2772_v20 = vld [vmem:[#allocation4 + $0x4] ss:$40 sps:$4 sm:$0xff]  }
 0x245   : > { %1694 = vst [vmem:[#allocation4 + $0xa0] sm:$0x33] %v1680_v52  ;;  %1656 = vst [vmem:[#allocation4 + $0x78] sm:$0xcc] %v1642_v55  ;;  %v3366_v61 = vpop.permute.xlu1 %1411  ;;  %v1349_v26 = vpop.permute.xlu0 %1348  ;;  %1890 = vmatprep.subr.bf16.mxu1 %v2772_v20 }
 0x246   : > { %v1356_v2 = vrot.slane %v1349_v26, 4  ;;  %1891 = vmatpush1.bf16.msra.mxu1 %v2770_v56  ;;  %v1418_v37 = vrot.slane %v3366_v61, 4 }
 0x248   : > { %v1362_v36 = vsel %vm334_vm0, %v1355_v42, %v1356_v2 }
 0x249   : > { %v1363_v33 = vsel %vm1360_vm8, %v1347_v10, %v1362_v36  ;;  %v3370_v9 = vpop.permute.xlu1 %1484  ;;  %v1448_v12 = vpop.permute.xlu0 %1447 }
 0x24a   : > { %1375 = vst [vmem:[#allocation4 + $0x8] sm:$0x33] %v1363_v33  ;;  %v1455_v13 = vrot.slane %v1448_v12, 4  ;;  %v1493_v52 = vrot.slane %v3370_v9, 4 }
 0x24c   : > { %v1461_v14 = vsel %vm334_vm0, %v1454_v27, %v1455_v13  ;;  %v2773_v1 = vld [vmem:[#allocation4 + $0x50] ss:$40 sps:$4 sm:$0xff]   ;;  %v2775_v15 = vld [vmem:[#allocation4 + $0x54] ss:$40 sps:$4 sm:$0xff]   ;;  %v1720_v25 = vld [vmem:[#allocation4 + $0xa0] sm:$0x33] }
 0x24d   : > { %v1462_v16 = vsel %vm1459_vm10, %v1446_v17, %v1461_v14  ;;  %v3374_v40 = vpop.permute.xlu1 %1552  ;;  %v1590_v22 = vpop.permute.xlu0 %1589  ;;  %1892 = vmatprep.subr.bf16.mxu1 %v2775_v15  ;;  %v2687_v42 = vcombine.high %v1720_v25, %v1720_v25  ;;  %v2686_v10 = vcombine.low %v1720_v25, %v1720_v25 }
 0x24e   : > { %1474 = vst [vmem:[#allocation4 + $0x30] sm:$0x33] %v1462_v16  ;;  %v1599_v4 = vrot.slane %v1590_v22, 4  ;;  %1893 = vmatpush1.bf16.msra.mxu1 %v2773_v1  ;;  %v1561_v1 = vrot.slane %v3374_v40, 4 }
 0x24f   : > { %2696 = vmatprep.subr.msk.bf16.mxu1 %vm1298_vm4, %v2687_v42  ;;  %v1861_v18 = vsel %vm1298_vm4, %v2686_v10, 0 }
 0x250   : > { %v1605_v29 = vsel %vm334_vm0, %v1598_v57, %v1599_v4 }
 0x251   : > { %v1606_v27 = vsel %vm336_vm2, %v1605_v29, %v1590_v22  ;;  %v3379_v59 = vpop.permute.xlu1 %1629  ;;  %v1666_v30 = vpop.permute.xlu0 %1665 }
 0x252   : > { %1619 = vst [vmem:[#allocation4 + $0x80] sm:$0x33] %v1606_v27  ;;  %v1675_v17 = vrot.slane %v1666_v30, 4  ;;  %1895 = vmatpush1.bf16.msra.mxu1 %v1861_v18 }
 0x254   : > { %v1681_v63 = vsel %vm334_vm0, %v1674_v39, %v1675_v17 }
 0x255   : > { %v1682_v53 = vsel %vm409_vm3, %v1681_v63, %v1666_v30  ;;  %v3389_v57 = vpop.permute.xlu1 %1350  ;;  %v1410_v32 = vpop.permute.xlu0 %1409  ;;  %2697 = vmatmul.mubr.msk.bf16.vlgmr.msra.gmra.mrb[8].mxu1 %vm1856_vm13, %v3385_v31 }
 0x256   : > { %1695 = vst [vmem:[#allocation4 + $0xa8] sm:$0x33] %v1682_v53  ;;  %v1357_v38 = vrot.slane %v3389_v57, 4  ;;  %v1417_v21 = vrot.slane %v1410_v32, 4  ;;  %1963 = vmatprep.mubr.bf16.mxu1 %v2827_v3 }
 0x258   : > { %v1364_v44 = vsel %vm334_vm0, %v1356_v2, %v1357_v38  ;;  %v1423_v45 = vsel %vm334_vm0, %v1416_v60, %v1417_v21  ;;  %v1425_v47 = vsel %vm334_vm0, %v1417_v21, %v1418_v37 }
 0x259   : > { %v1365_v49 = vsel %vm1360_vm8, %v1349_v26, %v1364_v44  ;;  %v1424_v39 = vsel %vm1421_vm9, %v3328_v62, %v1423_v45  ;;  %v1426_v48 = vsel %vm1421_vm9, %v1410_v32, %v1425_v47  ;;  %v3409_v51 = vpop.permute.xlu1 %1449  ;;  %v1483_v11 = vpop.permute.xlu0 %1482 }
 0x25a   : > { %1376 = vst [vmem:[#allocation4 + $0x10] sm:$0x33] %v1365_v49  ;;  %1436 = vst [vmem:[#allocation4 + $0x8] sm:$0xcc] %v1424_v39  ;;  %v1456_v60 = vrot.slane %v3409_v51, 4  ;;  %v1492_v55 = vrot.slane %v1483_v11, 4 }
 0x25b   : > { %1437 = vst [vmem:[#allocation4 + $0x10] sm:$0xcc] %v1426_v48 }
 0x25c   : > { %v1463_v56 = vsel %vm334_vm0, %v1455_v13, %v1456_v60  ;;  %v1499_v62 = vsel %vm334_vm0, %v1491_v24, %v1492_v55  ;;  %v1501_v20 = vsel %vm334_vm0, %v1492_v55, %v1493_v52 }
 0x25d   : > { %v1464_v26 = vsel %vm1459_vm10, %v1448_v12, %v1463_v56  ;;  %v1500_v2 = vsel %vm1497_vm11, %v3330_v35, %v1499_v62  ;;  %v1502_v36 = vsel %vm1497_vm11, %v1483_v11, %v1501_v20  ;;  %v1592_v33 = vpop.permute.xlu1 %1591  ;;  %v1551_v14 = vpop.permute.xlu0 %1550 }
 0x25e   : > { %1475 = vst [vmem:[#allocation4 + $0x38] sm:$0x33] %v1464_v26  ;;  %1513 = vst [vmem:[#allocation4 + $0x30] sm:$0xcc] %v1500_v2  ;;  %v1600_v13 = vrot.slane %v1592_v33, 4  ;;  %v1560_v24 = vrot.slane %v1551_v14, 4 }
 0x25f   : > { %1514 = vst [vmem:[#allocation4 + $0x38] sm:$0xcc] %v1502_v36 }
 0x260   : > { %v1607_v15 = vsel %vm334_vm0, %v1599_v4, %v1600_v13  ;;  %v1567_v12 = vsel %vm334_vm0, %v1559_v0, %v1560_v24  ;;  %v1569_v35 = vsel %vm334_vm0, %v1560_v24, %v1561_v1  ;;  %v1638_v4 = vrot.slane %v3379_v59, 4 }
 0x261   : > { %v1608_v16 = vsel %vm336_vm2, %v1607_v15, %v1592_v33  ;;  %v1568_v22 = vsel %vm1565_vm12, %v1567_v12, %v1551_v14  ;;  %v1570_v25 = vsel %vm1565_vm12, %v1569_v35, %v3374_v40  ;;  %v3438_v42 = vpop.permute.xlu1 %1667  ;;  %v1628_v10 = vpop.permute.xlu0 %1627  ;;  %v1721_v14 = vld [vmem:[#allocation4 + $0xa8] sm:$0x33] }
 0x262   : > { %1620 = vst [vmem:[#allocation4 + $0x88] sm:$0x33] %v1608_v16  ;;  %1581 = vst [vmem:[#allocation4 + $0x58] sm:$0xcc] %v1568_v22  ;;  %v1676_v7 = vrot.slane %v3438_v42, 4  ;;  %v1637_v0 = vrot.slane %v1628_v10, 4 }
 0x263   : > { %1582 = vst [vmem:[#allocation4 + $0x60] sm:$0xcc] %v1570_v25  ;;  %v2689_v25 = vcombine.high %v1721_v14, %v1721_v14 }
 0x264   : > { %v1683_v29 = vsel %vm334_vm0, %v1675_v17, %v1676_v7  ;;  %v1643_v27 = vsel %vm334_vm0, %v1636_v19, %v1637_v0  ;;  %v1645_v30 = vsel %vm334_vm0, %v1637_v0, %v1638_v4  ;;  %v2688_v0 = vcombine.low %v1721_v14, %v1721_v14 }
 0x265   : > { %v1684_v18 = vsel %vm409_vm3, %v1683_v29, %v3438_v42  ;;  %v1644_v63 = vsel %vm374_vm1, %v1643_v27, %v1628_v10  ;;  %v1646_v53 = vsel %vm374_vm1, %v1645_v30, %v3379_v59  ;;  %v3456_v32 = vpop.permute.xlu1 %1593  ;;  %v1353_v21 = vpop.permute.xlu0 %1352  ;;  %v2778_v17 = vld [vmem:[#allocation4 + $0x8] ss:$40 sps:$4 sm:$0xff]   ;;  %v2780_v44 = vld [vmem:[#allocation4 + $0xc] ss:$40 sps:$4 sm:$0xff]  }
 0x266   : > { %1696 = vst [vmem:[#allocation4 + $0xb0] sm:$0x33] %v1684_v18  ;;  %1657 = vst [vmem:[#allocation4 + $0x80] sm:$0xcc] %v1644_v63  ;;  %v1601_v34 = vrot.slane %v3456_v32, 4  ;;  %v1358_v19 = vrot.slane %v1353_v21, 4  ;;  %1931 = vmatprep.subr.bf16.mxu1 %v2780_v44 }
 0x267   : > { %1658 = vst [vmem:[#allocation4 + $0x88] sm:$0xcc] %v1646_v53  ;;  %v2781_v45 = vld [vmem:[#allocation4 + $0x10] ss:$40 sps:$4 sm:$0xff]   ;;  %v2783_v47 = vld [vmem:[#allocation4 + $0x14] ss:$40 sps:$4 sm:$0xff]   ;;  %1932 = vmatpush1.bf16.msra.mxu1 %v2778_v17 }
 0x268   : > { %v1609_v49 = vsel %vm334_vm0, %v1600_v13, %v1601_v34  ;;  %v1366_v39 = vsel %vm334_vm0, %v1357_v38, %v1358_v19  ;;  %v1368_v48 = vsel %vm1360_vm8, %v1353_v21, %v1358_v19  ;;  %1972 = vmatprep.subr.bf16.mxu0 %v2783_v47  ;;  %v1867_v44 = vsel %vm1298_vm4, %v2688_v0, 0 }
 0x269   : > { %v1610_v11 = vsel %vm336_vm2, %v1609_v49, %v3456_v32  ;;  %v1367_v55 = vsel %vm1360_vm8, %v3389_v57, %v1366_v39  ;;  %1380 = vst.msk [vmem:[#allocation4 + $0x20] sm:$0x33] %vm3295_vm7, %v1368_v48  ;;  %v1414_v56 = vpop.permute.xlu1 %1413  ;;  %v1452_v62 = vpop.permute.xlu0 %1451  ;;  %1973 = vmatpush1.bf16.msra.mxu0 %v2781_v45  ;;  %v2834_v0 = vmov 0.0  }
 0x26a   : > { %1621 = vst [vmem:[#allocation4 + $0x90] sm:$0x33] %v1610_v11  ;;  %1377 = vst [vmem:[#allocation4 + $0x18] sm:$0x33] %v1367_v55  ;;  %v1419_v38 = vrot.slane %v1414_v56, 4  ;;  %v1457_v26 = vrot.slane %v1452_v62, 4 }
 0x26c   : > { %v1427_v2 = vsel %vm334_vm0, %v1418_v37, %v1419_v38  ;;  %v1429_v57 = vsel %vm1421_vm9, %v1414_v56, %v1419_v38  ;;  %v1465_v36 = vsel %vm334_vm0, %v1456_v60, %v1457_v26  ;;  %v1467_v33 = vsel %vm1459_vm10, %v1452_v62, %v1457_v26 }
 0x26d   : > { %v1428_v13 = vsel %vm1421_vm9, %v3366_v61, %v1427_v2  ;;  %1442 = vst.msk [vmem:[#allocation4 + $0x20] sm:$0xcc] %vm3472_vm5, %v1429_v57  ;;  %v1466_v24 = vsel %vm1459_vm10, %v3409_v51, %v1465_v36  ;;  %v1487_v37 = vpop.permute.xlu1 %1486  ;;  %v1489_v15 = vpop.permute.xlu0 %1488  ;;  %v2784_v12 = vld [vmem:[#allocation4 + $0x58] ss:$40 sps:$4 sm:$0xff]   ;;  %v2786_v35 = vld [vmem:[#allocation4 + $0x5c] ss:$40 sps:$4 sm:$0xff]  }
 0x26e   : > { %1477 = vst.msk [vmem:[#allocation4 + $0x48] sm:$0x33] %vm3295_vm7, %v1467_v33  ;;  %1438 = vst [vmem:[#allocation4 + $0x18] sm:$0xcc] %v1428_v13  ;;  %v1494_v60 = vrot.slane %v1487_v37, 4  ;;  %v1495_v16 = vrot.slane %v1489_v15, 4  ;;  %1933 = vmatprep.subr.bf16.mxu1 %v2786_v35 }
 0x26f   : > { %1476 = vst [vmem:[#allocation4 + $0x40] sm:$0x33] %v1466_v24  ;;  %v2787_v22 = vld [vmem:[#allocation4 + $0x60] ss:$40 sps:$4 sm:$0xff]   ;;  %v2789_v61 = vld [vmem:[#allocation4 + $0x64] ss:$40 sps:$4 sm:$0xff]   ;;  %1934 = vmatpush1.bf16.msra.mxu1 %v2784_v12 }
 0x270   : > { %v1722_v10 = vld [vmem:[#allocation4 + $0xb0] sm:$0x33]  ;;  %v1503_v51 = vsel %vm334_vm0, %v1493_v52, %v1494_v60  ;;  %v1505_v29 = vsel %vm334_vm0, %v1494_v60, %v1495_v16  ;;  %1974 = vmatprep.subr.bf16.mxu0 %v2789_v61  ;;  %2698 = vmatprep.subr.msk.bf16.mxu1 %vm1298_vm4, %v2689_v25 }
 0x271   : > { %v2691_v27 = vcombine.high %v1722_v10, %v1722_v10  ;;  %v1504_v30 = vsel %vm1497_vm11, %v3370_v9, %v1503_v51  ;;  %v1506_v18 = vsel %vm1497_vm11, %v1487_v37, %v1505_v29  ;;  %v1555_v63 = vpop.permute.xlu1 %1554  ;;  %v1557_v53 = vpop.permute.xlu0 %1556  ;;  %v2690_v21 = vcombine.low %v1722_v10, %v1722_v10  ;;  %1975 = vmatpush1.bf16.msra.mxu0 %v2787_v22  ;;  %v2116_v51 = vld [vmem:[%s3594_s7] sm:$0x7] }
 0x272   : > { %1515 = vst [vmem:[#allocation4 + $0x40] sm:$0xcc] %v1504_v30  ;;  %1516 = vst.msk [vmem:[#allocation4 + $0x48] sm:$0xcc] %vm3472_vm5, %v1506_v18  ;;  %v1562_v52 = vrot.slane %v1555_v63, 4  ;;  %v1563_v17 = vrot.slane %v1557_v53, 4  ;;  %2119 = vperm.xlu0 %2751, %v2116_v51  }
 0x273   : > { %2700 = vmatprep.subr.msk.bf16.mxu0 %vm1298_vm4, %v2691_v27  ;;  %1936 = vmatpush1.bf16.msra.mxu1 %v1867_v44  ;;  %v1873_v39 = vsel %vm1298_vm4, %v2690_v21, 0 }
 0x274   : > { %v1571_v9 = vsel %vm334_vm0, %v1561_v1, %v1562_v52  ;;  %v1573_v19 = vsel %vm334_vm0, %v1562_v52, %v1563_v17 }
 0x275   : > { %v1572_v45 = vsel %vm1565_vm12, %v1571_v9, %v1555_v63  ;;  %v1574_v47 = vsel %vm1565_vm12, %v1573_v19, %v1557_v53  ;;  %v1632_v49 = vpop.permute.xlu1 %1631  ;;  %v1634_v48 = vpop.permute.xlu0 %1633  ;;  %1977 = vmatpush1.bf16.msra.mxu0 %v1873_v39  ;;  %v2115_v9 = vld [vmem:[%s3593_s6] sm:$0x7] }
 0x276   : > { %1583 = vst [vmem:[#allocation4 + $0x68] sm:$0xcc] %v1572_v45  ;;  %1584 = vst.msk [vmem:[#allocation4 + $0x70] sm:$0xcc] %vm3472_vm5, %v1574_v47  ;;  %v1639_v11 = vrot.slane %v1632_v49, 4  ;;  %v1640_v40 = vrot.slane %v1634_v48, 4  ;;  %2699 = vmatmul.mubr.msk.bf16.vlgmr.msra.gmra.mrb[12].mxu1 %vm1856_vm13, %v3385_v31 }
 0x277   : > { %2045 = vmatprep.mubr.bf16.mxu1 %v2827_v3 }
 0x278   : > { %v1647_v1 = vsel %vm334_vm0, %v1638_v4, %v1639_v11  ;;  %v1649_v55 = vsel %vm334_vm0, %v1639_v11, %v1640_v40  ;;  %2701 = vmatmul.mubr.msk.bf16.vlgmr.msra.gmra.mrb[12].mxu0 %vm1856_vm13, %v3385_v31 }
 0x279   : > { %v1648_v56 = vsel %vm374_vm1, %v1647_v1, %v1632_v49  ;;  %v1650_v62 = vsel %vm374_vm1, %v1649_v55, %v1634_v48  ;;  %v1670_v38 = vpop.permute.xlu1 %1669  ;;  %v1596_v26 = vpop.permute.xlu0 %1595  ;;  %v2794_v2 = vld [vmem:[#allocation4 + $0x18] ss:$40 sps:$4 sm:$0xff]   ;;  %v2796_v57 = vld [vmem:[#allocation4 + $0x1c] ss:$40 sps:$4 sm:$0xff]   ;;  %2086 = vmatprep.mubr.bf16.mxu0 %v2827_v3  ;;  %vm2122_vm1 = vcmask 31744  }
 0x27a   : > { %1659 = vst [vmem:[#allocation4 + $0x90] sm:$0xcc] %v1648_v56  ;;  %1660 = vst.msk [vmem:[#allocation4 + $0x98] sm:$0xcc] %vm3472_vm5, %v1650_v62  ;;  %v1677_v59 = vrot.slane %v1670_v38, 4  ;;  %v1602_v4 = vrot.slane %v1596_v26, 4  ;;  %2013 = vmatprep.subr.bf16.mxu1 %v2796_v57 }
 0x27b   : > { %v2797_v36 = vld [vmem:[#allocation4 + $0x20] ss:$40 sps:$4 sm:$0xff]   ;;  %v2799_v33 = vld [vmem:[#allocation4 + $0x24] ss:$40 sps:$4 sm:$0xff]   ;;  %2014 = vmatpush1.bf16.msra.mxu1 %v2794_v2 }
 0x27c   : > { %v1685_v14 = vsel %vm334_vm0, %v1676_v7, %v1677_v59  ;;  %v1611_v13 = vsel %vm334_vm0, %v1601_v34, %v1602_v4  ;;  %2054 = vmatprep.subr.bf16.mxu0 %v2799_v33 }
 0x27d   : > { %v1686_v24 = vsel %vm409_vm3, %v1685_v14, %v1670_v38  ;;  %v1612_v20 = vsel %vm336_vm2, %v1611_v13, %v1596_v26  ;;  %v1672_v37 = vpop.permute.xlu0 %1671  ;;  %2055 = vmatpush1.bf16.msra.mxu0 %v2797_v36  ;;  %vm2536_vm2 = vcmask 30724  }
 0x27e   : > { %1697 = vst [vmem:[#allocation4 + $0xb8] sm:$0x33] %v1686_v24  ;;  %1622 = vst.msk [vmem:[#allocation4 + $0x98] sm:$0x33] %vm3295_vm7, %v1612_v20  ;;  %v1678_v3 = vrot.slane %v1672_v37, 4 }
 0x280   : > { %v1687_v42 = vsel %vm334_vm0, %v1677_v59, %v1678_v3 }
 0x281   : > { %v1688_v7 = vsel %vm409_vm3, %v1687_v42, %v1672_v37  ;;  %v2800_v32 = vld [vmem:[#allocation4 + $0x68] ss:$40 sps:$4 sm:$0xff]   ;;  %v2802_v15 = vld [vmem:[#allocation4 + $0x6c] ss:$40 sps:$4 sm:$0xff]  }
 0x282   : > { %1698 = vst.msk [vmem:[#allocation4 + $0xc0] sm:$0x33] %vm3295_vm7, %v1688_v7  ;;  %2015 = vmatprep.subr.bf16.mxu1 %v2802_v15 }
 0x283   : > { %2016 = vmatpush1.bf16.msra.mxu1 %v2800_v32 }
 0x285   : > { %v1723_v34 = vld [vmem:[#allocation4 + $0xb8] sm:$0x33] }
 0x286   : > { %v2804_v12 = vld [vmem:[#allocation4 + $0x70] ss:$40 sps:$4 sm:$0xff]   ;;  %v2693_v35 = vcombine.high %v1723_v34, %v1723_v34  ;;  %v2806_v60 = vld [vmem:[#allocation4 + $0x74] ss:$40 sps:$4 sm:$0xff]   ;;  %v2692_v16 = vcombine.low %v1723_v34, %v1723_v34 }
 0x287   : > { %2056 = vmatprep.subr.bf16.mxu0 %v2806_v60 }
 0x288   : > { %2702 = vmatprep.subr.msk.bf16.mxu1 %vm1298_vm4, %v2693_v35  ;;  %v1879_v22 = vsel %vm1298_vm4, %v2692_v16, 0  ;;  %2057 = vmatpush1.bf16.msra.mxu0 %v2804_v12 }
 0x289   : > { %2018 = vmatpush1.bf16.msra.mxu1 %v1879_v22  ;;  %v1724_v61 = vld [vmem:[#allocation4 + $0xc0] sm:$0x33] }
 0x28a   : > { %v2695_v25 = vcombine.high %v1724_v61, %v1724_v61  ;;  %v2694_v10 = vcombine.low %v1724_v61, %v1724_v61  ;;  %v1729_v29 = vpop.permute.xlu1 %1728 }
 0x28c   : > { %2703 = vmatmul.mubr.msk.bf16.vlgmr.msra.gmra.mrb[16].mxu1 %vm1856_vm13, %v3385_v31  ;;  %2704 = vmatprep.subr.msk.bf16.mxu0 %vm1298_vm4, %v2695_v25  ;;  %v1885_v54 = vsel %vm1298_vm4, %v2694_v10, 0 }
 0x28d   : > { %2059 = vmatpush1.bf16.msra.mxu0 %v1885_v54  ;;  %2220 = vmatprep.mubr.f32.mxu1 %v2834_v0 }
 0x290   : > { %2705 = vmatmul.mubr.msk.bf16.vlgmr.msra.gmra.mrb[16].mxu0 %vm1856_vm13, %v3385_v31 }
 0x291   : > { %2362 = vmatprep.mubr.f32.mxu0 %v2834_v0 }
 0x328   : > { %v1924_v27 = vpop.f32.mrb[8].mxu1 }
 0x329   : > { %v1925_v30 = vadd.f32 %v1924_v27, %v1729_v29  ;;  %v1926_v18 = vpop.f32.mrb[9].mxu1 }
 0x32a   : > { %v1927_v63 = vadd.f32 %v1926_v18, %v1729_v29  ;;  %v1928_v53 = vpop.f32.mrb[10].mxu1 }
 0x32b   : > { %v2095_v21 = vmax.f32 %v1925_v30, 0.0  ;;  %v1929_v52 = vpop.f32.mrb[11].mxu1 }
 0x32c   : > { %v2096_v17 = vmax.f32 %v1927_v63, 0.0 }
 0x32d   : > { %v2105_v31 = vmul.f32 %v2095_v21, %v3177_v43 }
 0x32e   : > { %v2106_v44 = vmul.f32 %v2096_v17, %v3183_v41 }
 0x330   : > { %2706 = vmatprep.subr.msk.mxu1 %vm334_vm0, %v2106_v44 }
 0x331   : > { %2707 = vmatpush1.msk.msra.mxu1 %vm334_vm0, %v2105_v31 }
 0x332   : > { %2708 = vmatmul.mubr.msk.f32.vlgmr.msra.gmra.mrb[20].mxu1 %vm2122_vm1, %v2115_v9 }
 0x333   : > { %2291 = vmatprep.mubr.f32.mxu1 %v2834_v0 }
 0x349   : > { %v1965_v19 = vpop.f32.mrb[12].mxu1 }
 0x34a   : > { %v1966_v45 = vadd.f32 %v1965_v19, %v1729_v29  ;;  %v1967_v47 = vpop.f32.mrb[13].mxu1 }
 0x34b   : > { %v2006_v49 = vpop.f32.mrb[12].mxu0  ;;  %v1968_v39 = vadd.f32 %v1967_v47, %v1729_v29  ;;  %v1969_v41 = vpop.f32.mrb[14].mxu1 }
 0x34c   : > { %v2097_v48 = vmax.f32 %v1966_v45, 0.0  ;;  %v2007_v43 = vadd.f32 %v2006_v49, %v1729_v29  ;;  %v2008_v11 = vpop.f32.mrb[13].mxu0  ;;  %v1970_v40 = vpop.f32.mrb[15].mxu1 }
 0x34d   : > { %v2098_v1 = vmax.f32 %v1968_v39, 0.0  ;;  %v2009_v55 = vadd.f32 %v2008_v11, %v1729_v29  ;;  %v2010_v56 = vpop.f32.mrb[14].mxu0 }
 0x34e   : > { %v2099_v62 = vmax.f32 %v2007_v43, 0.0  ;;  %v2011_v38 = vpop.f32.mrb[15].mxu0  ;;  %v2107_v57 = vmul.f32 %v2097_v48, %v3191_v58 }
 0x34f   : > { %v2108_v26 = vmul.f32 %v2098_v1, %v3195_v23  ;;  %v2100_v2 = vmax.f32 %v2009_v55, 0.0 }
 0x350   : > { %v2109_v4 = vmul.f32 %v2099_v62, %v3214_v46 }
 0x351   : > { %v2110_v59 = vmul.f32 %v2100_v2, %v3219_v50  ;;  %2709 = vmatprep.subr.msk.mxu1 %vm334_vm0, %v2108_v26 }
 0x352   : > { %2710 = vmatpush1.msk.msra.mxu1 %vm334_vm0, %v2107_v57 }
 0x353   : > { %2712 = vmatprep.subr.msk.mxu0 %vm334_vm0, %v2110_v59  ;;  %2711 = vmatmul.mubr.msk.f32.vlgmr.msra.gmra.mrb[22].mxu1 %vm2122_vm1, %v2115_v9 }
 0x354   : > { %2713 = vmatpush1.msk.msra.mxu0 %vm334_vm0, %v2109_v4  ;;  %2433 = vmatprep.mubr.f32.mxu1 %v2834_v0 }
 0x355   : > { %2714 = vmatmul.mubr.msk.f32.vlgmr.msra.gmra.mrb[20].mxu0 %vm2122_vm1, %v2115_v9 }
 0x356   : > { %2504 = vmatprep.mubr.f32.mxu0 %v2834_v0 }
 0x35f   : > { %v2047_v23 = vpop.f32.mrb[16].mxu1 }
 0x360   : > { %v2048_v58 = vadd.f32 %v2047_v23, %v1729_v29  ;;  %v2049_v36 = vpop.f32.mrb[17].mxu1 }
 0x361   : > { %v2050_v50 = vadd.f32 %v2049_v36, %v1729_v29  ;;  %v2051_v33 = vpop.f32.mrb[18].mxu1 }
 0x362   : > { %v2101_v14 = vmax.f32 %v2048_v58, 0.0  ;;  %v2052_v13 = vpop.f32.mrb[19].mxu1 }
 0x363   : > { %v2102_v46 = vmax.f32 %v2050_v50, 0.0  ;;  %v2088_v24 = vpop.f32.mrb[16].mxu0 }
 0x364   : > { %v2089_v20 = vadd.f32 %v2088_v24, %v1729_v29  ;;  %v2090_v37 = vpop.f32.mrb[17].mxu0  ;;  %v2111_v32 = vmul.f32 %v2101_v14, %v3234_v6  ;;  %v2120_v6 = vpop.permute.xlu0 %2119 }
 0x365   : > { %v2112_v3 = vmul.f32 %v2102_v46, %v3238_v8  ;;  %v2091_v42 = vadd.f32 %v2090_v37, %v1729_v29  ;;  %v2092_v7 = vpop.f32.mrb[18].mxu0 }
 0x366   : > { %v2103_v15 = vmax.f32 %v2089_v20, 0.0  ;;  %v2093_v34 = vpop.f32.mrb[19].mxu0 }
 0x367   : > { %v2104_v12 = vmax.f32 %v2091_v42, 0.0  ;;  %2715 = vmatprep.subr.msk.mxu1 %vm334_vm0, %v2112_v3 }
 0x368   : > { %2716 = vmatpush1.msk.msra.mxu1 %vm334_vm0, %v2111_v32  ;;  %v2113_v60 = vmul.f32 %v2103_v15, %v3259_v5 }
 0x369   : > { %v2114_v35 = vmul.f32 %v2104_v12, %v3264_v28  ;;  %2717 = vmatmul.mubr.msk.f32.vlgmr.msra.gmra.mrb[24].mxu1 %vm2122_vm1, %v2115_v9 }
 0x36b   : > { %2718 = vmatprep.subr.msk.mxu0 %vm334_vm0, %v2114_v35 }
 0x36c   : > { %2719 = vmatpush1.msk.msra.mxu0 %vm334_vm0, %v2113_v60  ;;  %vm2535_vm0 = vcmask 1042432  }
 0x36d   : > { %2720 = vmatmul.mubr.msk.f32.vlgmr.msra.gmra.mrb[22].mxu0 %vm2122_vm1, %v2115_v9  ;;  %vm2537_vm3 = vmor %vm2536_vm2, %vm2535_vm0 }
 0x405   : > { %v2222_v8 = vpop.f32.mrb[20].mxu1 }
 0x406   : > { %v2224_v16 = vpop.f32.mrb[21].mxu1  ;;  %v2223_v22 = vadd.f32 %v2222_v8, %v2120_v6 }
 0x407   : > { %v2225_v61 = vadd.f32 %v2224_v16, %v2120_v6 }
 0x409   : > { %v2521_v28 = vcombine.low %v2223_v22, %v2225_v61 }
 0x40b   : > { %2531 = vst [vmem:[%s305_s24] sm:$0x77] %v2521_v28 }
 0x426   : > { %v2293_v25 = vpop.f32.mrb[22].mxu1 }
 0x427   : > { %v2294_v5 = vadd.f32 %v2293_v25, %v2120_v6  ;;  %v2295_v10 = vpop.f32.mrb[23].mxu1 }
 0x428   : > { %v2364_v54 = vpop.f32.mrb[20].mxu0  ;;  %v2296_v0 = vadd.f32 %v2295_v10, %v2120_v6 }
 0x429   : > { %v2365_v51 = vadd.f32 %v2364_v54, %v2120_v6  ;;  %v2366_v29 = vpop.f32.mrb[21].mxu0 }
 0x42a   : > { %v2522_v27 = vcombine.low %v2294_v5, %v2296_v0  ;;  %v2367_v30 = vadd.f32 %v2366_v29, %v2120_v6 }
 0x42c   : > { %2532 = vst [vmem:[%s305_s24 + $0x8] sm:$0x77] %v2522_v27  ;;  %v2523_v18 = vcombine.low %v2365_v51, %v2367_v30 }
 0x42e   : > { %2533 = vst [vmem:[%s305_s24 + $0x10] sm:$0x77] %v2523_v18 }
 0x43c   : > { %v2435_v63 = vpop.f32.mrb[24].mxu1 }
 0x43d   : > { %v2436_v53 = vadd.f32 %v2435_v63, %v2120_v6  ;;  %v2437_v21 = vpop.f32.mrb[25].mxu1 }
 0x43e   : > { %v2438_v52 = vadd.f32 %v2437_v21, %v2120_v6 }
 0x440   : > { %v2506_v17 = vpop.f32.mrb[22].mxu0  ;;  %v2524_v44 = vcombine.low %v2436_v53, %v2438_v52 }
 0x441   : > { %v2507_v31 = vadd.f32 %v2506_v17, %v2120_v6  ;;  %v2508_v9 = vpop.f32.mrb[23].mxu0 }
 0x442   : > { %2534 = vst [vmem:[%s305_s24 + $0x18] sm:$0x77] %v2524_v44  ;;  %v2509_v19 = vadd.f32 %v2508_v9, %v2120_v6 }
 0x444   : > { %v2525_v45 = vcombine.low %v2507_v31, %v2509_v19 }
 0x446   : > { %2538 = vst.msk [vmem:[%s305_s24 + $0x20] sm:$0x77] %vm2537_vm3, %v2525_v45 }
 0x447 PF: > { %s18_s27 = sadd.s32 1, %s2816_s27  }
 0x448   : > { %p15_p4 = scmp.ge.s32.totalorder %s18_s27, 4  }
 0x44a   :  { %17 = sbr.rel (!%p15_p4) target bundleno = 1 (0x1), region = 82 }

</bundles_post_ra>
